<compile_context>
chip_gen: v5e
topology: v5e:2x2
jax: 0.10.0
libtpu: 0.0.40
codegen_flags: <defaults>
</compile_context>

<pallas_src>
import functools
import math

import jax
import jax.numpy as jnp
from jax.experimental import pallas as pl
from jax.experimental.pallas import tpu as pltpu

_LN_EPS = 1e-6                      # norm_cfg=dict(type='LN', eps=1e-06)
_ROW_TILE = 256                     # row tile (multiple of 8) for token-major kernels
_ATTN_VMEM_BUDGET = 8 * 1024 * 1024  # conservative; fits default scoped VMEM everywhere


# ------------------------------ spec helpers ------------------------------

def _cparams(n_parallel=1):
    return pltpu.CompilerParams(
        dimension_semantics=("parallel",) * n_parallel,
        vmem_limit_bytes=32 * 1024 * 1024)


def _row_tile(m):
    return m if m <= _ROW_TILE else _ROW_TILE


def _rows_spec(tm, ncols):
    return pl.BlockSpec((tm, ncols), lambda i: (i, 0))


def _resident_spec(shape):
    zeros = (0,) * len(shape)
    return pl.BlockSpec(shape, lambda i: zeros)


# ------------------------------ kernel bodies ------------------------------

def _layernorm_f32(x, g, b):
    mean = jnp.mean(x, axis=-1, keepdims=True)
    xc = x - mean
    var = jnp.mean(xc * xc, axis=-1, keepdims=True)
    return xc * jax.lax.rsqrt(var + _LN_EPS) * g + b


def _gelu_f32(x):
    # TODO(synk): PyTorch nn.GELU defaults to the exact erf formulation; a tanh
    # approximation is used here (erf lowering is not guaranteed in Mosaic).
    return 0.5 * x * (1.0 + jnp.tanh(0.7978845608028654 * (x + 0.044715 * x * x * x)))


def _linear_kernel(x_ref, w_ref, b_ref, o_ref):
    x = x_ref[...].astype(jnp.bfloat16)
    y = jnp.dot(x, w_ref[...], preferred_element_type=jnp.float32) + b_ref[...]
    o_ref[...] = y.astype(o_ref.dtype)


def _ln_linear_kernel(x_ref, g_ref, bta_ref, w_ref, b_ref, o_ref):
    xn = _layernorm_f32(x_ref[...].astype(jnp.float32),
                        g_ref[...], bta_ref[...]).astype(jnp.bfloat16)
    y = jnp.dot(xn, w_ref[...], preferred_element_type=jnp.float32) + b_ref[...]
    o_ref[...] = y.astype(o_ref.dtype)


def _layernorm_kernel(x_ref, g_ref, bta_ref, o_ref):
    o_ref[...] = _layernorm_f32(x_ref[...], g_ref[...], bta_ref[...])


def _proj_fc_res_kernel(x_ref, wo_ref, bo_ref, wfc_ref, bfc_ref, r_ref, o_ref):
    """Temporal path: out-proj -> temporal_fc -> + residual, one kernel."""
    h = jnp.dot(x_ref[...].astype(jnp.bfloat16), wo_ref[...],
                preferred_element_type=jnp.float32) + bo_ref[...]
    y = jnp.dot(h.astype(jnp.bfloat16), wfc_ref[...],
                preferred_element_type=jnp.float32) + bfc_ref[...]
    o_ref[...] = r_ref[...] + y


def _add_ln_ffn_kernel(a_ref, d_ref, g_ref, bta_ref, w1_ref, b1_ref,
                       w2_ref, b2_ref, o_ref):
    """x = a + d (fused spatial residual); out = x + MLP(LN(x)) (fused FFN residual)."""
    x = a_ref[...] + d_ref[...]
    h = jnp.dot(_layernorm_f32(x, g_ref[...], bta_ref[...]).astype(jnp.bfloat16),
                w1_ref[...], preferred_element_type=jnp.float32) + b1_ref[...]
    h = _gelu_f32(h).astype(jnp.bfloat16)
    y = jnp.dot(h, w2_ref[...], preferred_element_type=jnp.float32) + b2_ref[...]
    o_ref[...] = x + y


def _attn_kernel(qkv_ref, o_ref, *, num_heads):
    """Multi-head softmax attention on G sequences per grid step.

    qkv_ref: (G, S, 3D) packed [q|k|v] (bf16) with heads packed along the lane
    dim.  Q is already pre-scaled (1/sqrt(dh) folded into the QKV projection).
    Output is lane-dense: (G, S, D) bf16.
    """
    G, S, three_d = qkv_ref.shape
    D = three_d // 3
    dh = D // num_heads
    qkv = qkv_ref[...]
    heads_out = []
    for h in range(num_heads):                                   # static unroll
        q = qkv[:, :, h * dh:(h + 1) * dh].astype(jnp.bfloat16)
        k = qkv[:, :, D + h * dh:D + (h + 1) * dh].astype(jnp.bfloat16)
        v = qkv[:, :, 2 * D + h * dh:2 * D + (h + 1) * dh].astype(jnp.bfloat16)
        s = jnp.einsum('gsd,gtd->gst', q, k,
                       preferred_element_type=jnp.float32)       # (G, S, S) f32
        m = jnp.max(s, axis=-1, keepdims=True)
        p = jnp.exp(s - m)
        denom = jnp.sum(p, axis=-1, keepdims=True)
        p = p * pl.reciprocal(denom, approx=True)
        heads_out.append(jnp.einsum('gst,gtd->gsd', p.astype(jnp.bfloat16), v,
                                    preferred_element_type=jnp.float32))
    o_ref[...] = jnp.concatenate(heads_out, axis=-1).astype(o_ref.dtype)


# ------------------------------ kernel wrappers ------------------------------

def linear(x2d, w, b, out_dtype=jnp.float32):
    """(M, K) @ (K, N) + (N,); row-tiled, weight resident, bf16 MXU / f32 accum."""
    M, K = x2d.shape
    N = w.shape[1]
    tm = _row_tile(M)
    return pl.pallas_call(
        _linear_kernel,
        grid=(pl.cdiv(M, tm),),
        in_specs=[_rows_spec(tm, K), _resident_spec((K, N)), _resident_spec((1, N))],
        out_specs=_rows_spec(tm, N),
        out_shape=jax.ShapeDtypeStruct((M, N), out_dtype),
        compiler_params=_cparams(),
    )(x2d, w, b.reshape(1, N))


def ln_linear(x2d, g, bta, w, b, out_dtype=jnp.bfloat16):
    """LayerNorm fused into the following matmul: LN(x) @ w + b."""
    M, K = x2d.shape
    N = w.shape[1]
    tm = _row_tile(M)
    return pl.pallas_call(
        _ln_linear_kernel,
        grid=(pl.cdiv(M, tm),),
        in_specs=[_rows_spec(tm, K),
                  _resident_spec((1, K)), _resident_spec((1, K)),
                  _resident_spec((K, N)), _resident_spec((1, N))],
        out_specs=_rows_spec(tm, N),
        out_shape=jax.ShapeDtypeStruct((M, N), out_dtype),
        compiler_params=_cparams(),
    )(x2d, g.reshape(1, K), bta.reshape(1, K), w, b.reshape(1, N))


def layernorm(x2d, g, bta):
    M, K = x2d.shape
    tm = _row_tile(M)
    return pl.pallas_call(
        _layernorm_kernel,
        grid=(pl.cdiv(M, tm),),
        in_specs=[_rows_spec(tm, K), _resident_spec((1, K)), _resident_spec((1, K))],
        out_specs=_rows_spec(tm, K),
        out_shape=jax.ShapeDtypeStruct((M, K), jnp.float32),
        compiler_params=_cparams(),
    )(x2d, g.reshape(1, K), bta.reshape(1, K))


def proj_fc_residual(x2d, wo, bo, wfc, bfc, res2d):
    M, D = x2d.shape
    tm = _row_tile(M)
    return pl.pallas_call(
        _proj_fc_res_kernel,
        grid=(pl.cdiv(M, tm),),
        in_specs=[_rows_spec(tm, D),
                  _resident_spec((D, D)), _resident_spec((1, D)),
                  _resident_spec((D, D)), _resident_spec((1, D)),
                  _rows_spec(tm, D)],
        out_specs=_rows_spec(tm, D),
        out_shape=jax.ShapeDtypeStruct((M, D), jnp.float32),
        compiler_params=_cparams(),
    )(x2d, wo, bo.reshape(1, D), wfc, bfc.reshape(1, D), res2d)


def add_ln_ffn(a2d, d2d, g, bta, w1, b1, w2, b2):
    M, D = a2d.shape
    Dh = w1.shape[1]
    tm = _row_tile(M)
    return pl.pallas_call(
        _add_ln_ffn_kernel,
        grid=(pl.cdiv(M, tm),),
        in_specs=[_rows_spec(tm, D), _rows_spec(tm, D),
                  _resident_spec((1, D)), _resident_spec((1, D)),
                  _resident_spec((D, Dh)), _resident_spec((1, Dh)),
                  _resident_spec((Dh, D)), _resident_spec((1, D))],
        out_specs=_rows_spec(tm, D),
        out_shape=jax.ShapeDtypeStruct((M, D), jnp.float32),
        compiler_params=_cparams(),
    )(a2d, d2d, g.reshape(1, D), bta.reshape(1, D),
      w1, b1.reshape(1, Dh), w2, b2.reshape(1, D))


def _attn_group(batch, S, D):
    """Sequences per grid step: fill an ~8 MiB VMEM budget (qkv/out double-buffered)."""
    per_seq = (S * 3 * D * 2 * 2       # bf16 qkv in, double buffered
               + S * D * 2 * 2         # bf16 out, double buffered
               + S * S * 4 * 2         # f32 scores / probs working set
               + S * D * 4 * 2)        # f32 per-head context working set
    cap = max(1, min(64, batch, int(_ATTN_VMEM_BUDGET // per_seq)))
    for g in range(cap, 0, -1):        # largest divisor of `batch` <= cap
        if batch % g == 0:
            return g
    return 1


def attention(qkv3d, num_heads):
    """qkv3d: (batch, S, 3D) packed [q|k|v] -> (batch, S, D) attention context (bf16)."""
    Bq, S, three_d = qkv3d.shape
    D = three_d // 3
    G = _attn_group(Bq, S, D)
    return pl.pallas_call(
        functools.partial(_attn_kernel, num_heads=num_heads),
        grid=(Bq // G,),
        in_specs=[pl.BlockSpec((G, S, three_d), lambda i: (i, 0, 0))],
        out_specs=pl.BlockSpec((G, S, D), lambda i: (i, 0, 0)),
        out_shape=jax.ShapeDtypeStruct((Bq, S, D), jnp.bfloat16),
        compiler_params=_cparams(),
    )(qkv3d)


# --------------------------- model building blocks ---------------------------

def ln_mha_core(x3d, g, bta, w_qkv, b_qkv, num_heads):
    """LN -> packed QKV projection -> multi-head attention (pre out-projection).

    Returns the attention context flattened to (batch*S, D) in bf16; heads stay
    packed along the lane dim end-to-end (no (B*H, S, dh) transposes in HBM).
    """
    B_, S, D = x3d.shape
    qkv = ln_linear(x3d.reshape(B_ * S, D), g, bta, w_qkv, b_qkv)   # (B_*S, 3D) bf16
    ctx = attention(qkv.reshape(B_, S, 3 * D), num_heads)           # (B_, S, D) bf16
    return ctx.reshape(B_ * S, D)


def patch_embed(x_video, w_patch, b_patch, ph, pw):
    """Conv2d(kernel=stride=patch) as unfold (XLA glue) + row-tiled Pallas matmul."""
    B, C, T, H, W = x_video.shape
    nh, nw = H // ph, W // pw
    D = w_patch.shape[1]
    # TODO(synk): the unfold below is XLA reshape/transpose glue (one HBM copy of
    # the video); a gather-style Pallas index_map over the raw video would remove it.
    x = x_video.transpose(0, 2, 1, 3, 4)                     # (B, T, C, H, W)
    x = x.reshape(B * T, C, nh, ph, nw, pw)
    x = x.transpose(0, 2, 4, 1, 3, 5)                        # (BT, nh, nw, C, ph, pw)
    x = x.reshape(B * T * nh * nw, C * ph * pw)
    y = linear(x, w_patch, b_patch)                          # (BT*P, D) f32
    return y.reshape(B * T, nh * nw, D)


def transformer_layer(x, lp, B, P, T, num_heads):
    """BaseTransformerLayer('self_attn','self_attn','ffn') with divided attentions."""
    D = x.shape[-1]
    S_full = 1 + P * T

    # ---- DividedTemporalAttentionWithNorm ----
    init_cls = x[:, 0:1, :]                                  # (B, 1, D)
    identity = x[:, 1:, :]                                   # (B, P*T, D), (p t) order
    ctx_t = ln_mha_core(identity.reshape(B * P, T, D),
                        lp['t_norm_g'], lp['t_norm_b'],
                        lp['t_wqkv'], lp['t_bqkv'], num_heads)           # (B*P*T, D) bf16
    # out-projection + temporal_fc + residual fused in one kernel
    new_patch = proj_fc_residual(ctx_t, lp['t_wo'], lp['t_bo'],
                                 lp['t_fc_w'], lp['t_fc_b'],
                                 identity.reshape(B * P * T, D))
    x = jnp.concatenate([init_cls, new_patch.reshape(B, P * T, D)], axis=1)

    # ---- DividedSpatialAttentionWithNorm ----
    identity_full = x
    cls_rep = jnp.broadcast_to(x[:, 0:1, :], (B, T, D)).reshape(B * T, 1, D)
    # 'b (p t) m -> (b t) p m'
    qs = x[:, 1:, :].reshape(B, P, T, D).transpose(0, 2, 1, 3).reshape(B * T, P, D)
    qs = jnp.concatenate([cls_rep, qs], axis=1)              # (B*T, P+1, D)
    ctx_s = ln_mha_core(qs, lp['s_norm_g'], lp['s_norm_b'],
                        lp['s_wqkv'], lp['s_bqkv'], num_heads)           # (B*T*(P+1), D) bf16
    res_s = linear(ctx_s, lp['s_wo'], lp['s_bo']).reshape(B * T, P + 1, D)
    cls_out = res_s[:, 0, :].reshape(B, T, D).mean(axis=1, keepdims=True)
    # '(b t) p m -> b (p t) m'
    res_sp = res_s[:, 1:, :].reshape(B, T, P, D).transpose(0, 2, 1, 3).reshape(B, P * T, D)
    res_sp = jnp.concatenate([cls_out, res_sp], axis=1)      # (B, 1+P*T, D)

    # ---- FFNWithNorm (spatial residual add + LN + MLP + FFN residual fused) ----
    out = add_ln_ffn(identity_full.reshape(B * S_full, D),
                     res_sp.reshape(B * S_full, D),
                     lp['f_norm_g'], lp['f_norm_b'],
                     lp['f_w1'], lp['f_b1'], lp['f_w2'], lp['f_b2'])
    return out.reshape(B, S_full, D)


def timesformer_forward(x_video, params, patch, num_heads):
    """TimeSformer forward ('divided_space_time', eval mode: dropout = identity)."""
    B = x_video.shape[0]
    T = x_video.shape[2]
    x = patch_embed(x_video, params['w_patch'], params['b_patch'], patch, patch)
    BT, P, D = x.shape                                       # (B*T, P, D)

    cls = jnp.broadcast_to(params['cls_token'], (BT, 1, D))
    x = jnp.concatenate([cls, x], axis=1)                    # (B*T, P+1, D)
    x = x + params['pos_embed']                              # drop_after_pos: identity

    # divided_space_time temporal embedding
    cls_tokens = x[:B, 0:1, :]                               # (B, 1, D)
    xt = x[:, 1:, :]                                         # (B*T, P, D)
    # '(b t) p m -> (b p) t m'
    xt = xt.reshape(B, T, P, D).transpose(0, 2, 1, 3).reshape(B * P, T, D)
    xt = xt + params['time_embed']                           # drop_after_time: identity
    # '(b p) t m -> b (p t) m'
    x = xt.reshape(B, P * T, D)
    x = jnp.concatenate([cls_tokens, x], axis=1)             # (B, 1 + P*T, D)

    for lp in params['layers']:
        x = transformer_layer(x, lp, B, P, T, num_heads)

    # Only the CLS rows are returned by the module -> LayerNorm just those rows.
    cls_rows = x[:, 0, :]                                    # (B, D)
    cls_score = layernorm(cls_rows, params['norm_g'], params['norm_b'])
    return {'cls_score': cls_score,
            'h265_bitcosts': jnp.zeros((), jnp.float32),
            'code_bpp': jnp.zeros((), jnp.float32)}


# ----------------------------- parameter setup -----------------------------

def init_params(key, *, C, T, P, D, L, ph, pw, num_heads):
    ffn_dim = 4 * D
    qk_scale = 1.0 / math.sqrt(D // num_heads)

    def nrm(k, shape, std=0.02):
        return std * jax.random.normal(k, shape, dtype=jnp.float32)

    keys = iter(jax.random.split(key, 8 + 16 * L))

    def qkv_params():
        # PyTorch nn.MultiheadAttention in_proj_weight is (3D, D) applied as
        # x @ W^T; w_qkv here is its transpose (D, 3D).  The 1/sqrt(dh) softmax
        # scale is pre-folded into the Q slice of the weight and bias.
        w = nrm(next(keys), (D, 3 * D)).at[:, :D].multiply(qk_scale)
        b = nrm(next(keys), (3 * D,)).at[:D].multiply(qk_scale)
        return w.astype(jnp.bfloat16), b

    params = dict(
        # Conv2d weight (D, C, ph, pw) flattened + transposed -> (C*ph*pw, D)
        w_patch=nrm(next(keys), (C * ph * pw, D)).astype(jnp.bfloat16),
        b_patch=nrm(next(keys), (D,)),
        cls_token=nrm(next(keys), (1, 1, D)),
        pos_embed=nrm(next(keys), (1, P + 1, D)),
        time_embed=nrm(next(keys), (1, T, D)),
        norm_g=jnp.ones((D,), jnp.float32),
        norm_b=jnp.zeros((D,), jnp.float32),
        layers=[],
    )
    for _ in range(L):
        t_wqkv, t_bqkv = qkv_params()
        s_wqkv, s_bqkv = qkv_params()
        lp = dict(
            t_norm_g=jnp.ones((D,), jnp.float32), t_norm_b=jnp.zeros((D,), jnp.float32),
            t_wqkv=t_wqkv, t_bqkv=t_bqkv,
            t_wo=nrm(next(keys), (D, D)).astype(jnp.bfloat16), t_bo=nrm(next(keys), (D,)),
            # reference constant-inits temporal_fc to zero (constant_init(val=0, bias=0))
            t_fc_w=jnp.zeros((D, D), jnp.bfloat16), t_fc_b=jnp.zeros((D,), jnp.float32),
            s_norm_g=jnp.ones((D,), jnp.float32), s_norm_b=jnp.zeros((D,), jnp.float32),
            s_wqkv=s_wqkv, s_bqkv=s_bqkv,
            s_wo=nrm(next(keys), (D, D)).astype(jnp.bfloat16), s_bo=nrm(next(keys), (D,)),
            f_norm_g=jnp.ones((D,), jnp.float32), f_norm_b=jnp.zeros((D,), jnp.float32),
            f_w1=nrm(next(keys), (D, ffn_dim)).astype(jnp.bfloat16),
            f_b1=nrm(next(keys), (ffn_dim,)),
            f_w2=nrm(next(keys), (ffn_dim, D)).astype(jnp.bfloat16),
            f_b2=nrm(next(keys), (D,)),
        )
        params['layers'].append(lp)
    return params


if __name__ == "__main__":
    # Small shapes consistent with the module:
    B, C, T = 2, 3, 2
    IMG, PATCH = 16, 8
    D, HEADS, LAYERS = 32, 4, 2
    nh = IMG // PATCH
    P = nh * nh                                              # num_patches = 4

    key = jax.random.PRNGKey(0)
    kx, kp = jax.random.split(key)
    x = jax.random.normal(kx, (B, C, T, IMG, IMG), dtype=jnp.float32)
    params = init_params(kp, C=C, T=T, P=P, D=D, L=LAYERS, ph=PATCH, pw=PATCH,
                         num_heads=HEADS)

    fwd = jax.jit(functools.partial(timesformer_forward, patch=PATCH,
                                    num_heads=HEADS))
    out = fwd(x, params)
    jax.block_until_ready(out['cls_score'])
    assert out['cls_score'].shape == (B, D)
    print("KERNEL_OK")
</pallas_src>

<mosaic_0001>
module attributes {stable_mosaic.version = 11 : i64} {
  func.func @_linear_kernel(%arg0: i32, %arg1: memref<16x192xf32, #tpu.memory_space<vmem>>, %arg2: memref<192x32xbf16, #tpu.memory_space<vmem>>, %arg3: memref<1x32xf32, #tpu.memory_space<vmem>>, %arg4: memref<16x32xf32, #tpu.memory_space<vmem>>) attributes {dimension_semantics = [#tpu.dimension_semantics<parallel>], iteration_bounds = array<i64: 1>, scalar_prefetch = 0 : i64, scratch_operands = 0 : i64, tpu.core_type = #tpu.core_type<tc>, window_params = [{transform_indices = @transform_0, window_bounds = array<i64: 16, 192>}, {pipeline_mode = #tpu.pipeline_mode<synchronous>, transform_indices = @transform_1, window_bounds = array<i64: 192, 32>}, {pipeline_mode = #tpu.pipeline_mode<synchronous>, transform_indices = @transform_2, window_bounds = array<i64: 1, 32>}, {transform_indices = @transform_3, window_bounds = array<i64: 16, 32>}]} {
    %c0 = arith.constant 0 : index
    %c0_0 = arith.constant 0 : index
    %0 = vector.load %arg1[%c0, %c0_0] : memref<16x192xf32, #tpu.memory_space<vmem>>, vector<16x192xf32>
    %1 = arith.truncf %0 : vector<16x192xf32> to vector<16x192xbf16>
    %c0_1 = arith.constant 0 : index
    %c0_2 = arith.constant 0 : index
    %2 = vector.load %arg2[%c0_1, %c0_2] : memref<192x32xbf16, #tpu.memory_space<vmem>>, vector<192x32xbf16>
    %cst = arith.constant dense<0.000000e+00> : vector<16x32xf32>
    %3 = tpu.matmul %1, %2, %cst {dimension_numbers = #tpu.dot_dimension_numbers<[1], [0], [0], [1], [0, 0, 1, 1], [], []>} : vector<16x192xbf16>, vector<192x32xbf16>, vector<16x32xf32> -> vector<16x32xf32>
    %c0_3 = arith.constant 0 : index
    %c0_4 = arith.constant 0 : index
    %4 = vector.load %arg3[%c0_3, %c0_4] : memref<1x32xf32, #tpu.memory_space<vmem>>, vector<1x32xf32>
    %5 = vector.broadcast %4 : vector<1x32xf32> to vector<16x32xf32>
    %6 = arith.addf %3, %5 : vector<16x32xf32>
    %c0_5 = arith.constant 0 : index
    %c0_6 = arith.constant 0 : index
    %7 = vector.load %arg4[%c0_5, %c0_6] : memref<16x32xf32, #tpu.memory_space<vmem>>, vector<16x32xf32>
    tpu.vector_store %arg4[%c0_5, %c0_6], %6 {strides = array<i32>} : memref<16x32xf32, #tpu.memory_space<vmem>>, vector<16x32xf32>,
    return
  }
  func.func @transform_0(%arg0: i32) -> (i32, i32) {
    %c0_i32 = arith.constant 0 : i32
    %c0_i32_0 = arith.constant 0 : i32
    return %arg0, %c0_i32 : i32, i32
  }
  func.func @transform_1(%arg0: i32) -> (i32, i32) {
    %c0_i32 = arith.constant 0 : i32
    %c0_i32_0 = arith.constant 0 : i32
    %c0_i32_1 = arith.constant 0 : i32
    return %c0_i32, %c0_i32_0 : i32, i32
  }
  func.func @transform_2(%arg0: i32) -> (i32, i32) {
    %c0_i32 = arith.constant 0 : i32
    %c0_i32_0 = arith.constant 0 : i32
    %c0_i32_1 = arith.constant 0 : i32
    return %c0_i32, %c0_i32_0 : i32, i32
  }
  func.func @transform_3(%arg0: i32) -> (i32, i32) {
    %c0_i32 = arith.constant 0 : i32
    %c0_i32_0 = arith.constant 0 : i32
    return %arg0, %c0_i32 : i32, i32
  }
}

module attributes {stable_mosaic.version = 11 : i64} {
  func.func @_ln_linear_kernel(%arg0: i32, %arg1: memref<16x32xf32, #tpu.memory_space<vmem>>, %arg2: memref<1x32xf32, #tpu.memory_space<vmem>>, %arg3: memref<1x32xf32, #tpu.memory_space<vmem>>, %arg4: memref<32x96xbf16, #tpu.memory_space<vmem>>, %arg5: memref<1x96xf32, #tpu.memory_space<vmem>>, %arg6: memref<16x96xbf16, #tpu.memory_space<vmem>>) attributes {dimension_semantics = [#tpu.dimension_semantics<parallel>], iteration_bounds = array<i64: 1>, scalar_prefetch = 0 : i64, scratch_operands = 0 : i64, tpu.core_type = #tpu.core_type<tc>, window_params = [{transform_indices = @transform_0, window_bounds = array<i64: 16, 32>}, {pipeline_mode = #tpu.pipeline_mode<synchronous>, transform_indices = @transform_1, window_bounds = array<i64: 1, 32>}, {pipeline_mode = #tpu.pipeline_mode<synchronous>, transform_indices = @transform_2, window_bounds = array<i64: 1, 32>}, {pipeline_mode = #tpu.pipeline_mode<synchronous>, transform_indices = @transform_3, window_bounds = array<i64: 32, 96>}, {pipeline_mode = #tpu.pipeline_mode<synchronous>, transform_indices = @transform_4, window_bounds = array<i64: 1, 96>}, {transform_indices = @transform_5, window_bounds = array<i64: 16, 96>}]} {
    %c0 = arith.constant 0 : index
    %c0_0 = arith.constant 0 : index
    %0 = vector.load %arg1[%c0, %c0_0] : memref<16x32xf32, #tpu.memory_space<vmem>>, vector<16x32xf32>
    %c0_1 = arith.constant 0 : index
    %c0_2 = arith.constant 0 : index
    %1 = vector.load %arg2[%c0_1, %c0_2] : memref<1x32xf32, #tpu.memory_space<vmem>>, vector<1x32xf32>
    %c0_3 = arith.constant 0 : index
    %c0_4 = arith.constant 0 : index
    %2 = vector.load %arg3[%c0_3, %c0_4] : memref<1x32xf32, #tpu.memory_space<vmem>>, vector<1x32xf32>
    %cst = arith.constant dense<0.000000e+00> : vector<16xf32>
    %3 = vector.multi_reduction <add>, %0, %cst [1] : vector<16x32xf32> to vector<16xf32>
    %4 = vector.shape_cast %3 : vector<16xf32> to vector<16x1xf32>
    %cst_5 = arith.constant 3.200000e+01 : f32
    %5 = vector.broadcast %cst_5 : f32 to vector<16x1xf32>
    %6 = arith.divf %4, %5 : vector<16x1xf32>
    %7 = vector.broadcast %6 : vector<16x1xf32> to vector<16x32xf32>
    %8 = arith.subf %0, %7 : vector<16x32xf32>
    %9 = arith.mulf %8, %8 : vector<16x32xf32>
    %cst_6 = arith.constant dense<0.000000e+00> : vector<16xf32>
    %10 = vector.multi_reduction <add>, %9, %cst_6 [1] : vector<16x32xf32> to vector<16xf32>
    %11 = vector.shape_cast %10 : vector<16xf32> to vector<16x1xf32>
    %cst_7 = arith.constant 3.200000e+01 : f32
    %12 = vector.broadcast %cst_7 : f32 to vector<16x1xf32>
    %13 = arith.divf %11, %12 : vector<16x1xf32>
    %cst_8 = arith.constant 9.99999997E-7 : f32
    %14 = vector.broadcast %cst_8 : f32 to vector<16x1xf32>
    %15 = arith.addf %13, %14 : vector<16x1xf32>
    %16 = math.rsqrt %15 : vector<16x1xf32>
    %17 = vector.broadcast %16 : vector<16x1xf32> to vector<16x32xf32>
    %18 = arith.mulf %8, %17 : vector<16x32xf32>
    %19 = vector.broadcast %1 : vector<1x32xf32> to vector<16x32xf32>
    %20 = arith.mulf %18, %19 : vector<16x32xf32>
    %21 = vector.broadcast %2 : vector<1x32xf32> to vector<16x32xf32>
    %22 = arith.addf %20, %21 : vector<16x32xf32>
    %23 = arith.truncf %22 : vector<16x32xf32> to vector<16x32xbf16>
    %c0_9 = arith.constant 0 : index
    %c0_10 = arith.constant 0 : index
    %24 = vector.load %arg4[%c0_9, %c0_10] : memref<32x96xbf16, #tpu.memory_space<vmem>>, vector<32x96xbf16>
    %cst_11 = arith.constant dense<0.000000e+00> : vector<16x96xf32>
    %25 = tpu.matmul %23, %24, %cst_11 {dimension_numbers = #tpu.dot_dimension_numbers<[1], [0], [0], [1], [0, 0, 1, 1], [], []>} : vector<16x32xbf16>, vector<32x96xbf16>, vector<16x96xf32> -> vector<16x96xf32>
    %c0_12 = arith.constant 0 : index
    %c0_13 = arith.constant 0 : index
    %26 = vector.load %arg5[%c0_12, %c0_13] : memref<1x96xf32, #tpu.memory_space<vmem>>, vector<1x96xf32>
    %27 = vector.broadcast %26 : vector<1x96xf32> to vector<16x96xf32>
    %28 = arith.addf %25, %27 : vector<16x96xf32>
    %29 = arith.truncf %28 : vector<16x96xf32> to vector<16x96xbf16>
    %c0_14 = arith.constant 0 : index
    %c0_15 = arith.constant 0 : index
    %30 = vector.load %arg6[%c0_14, %c0_15] : memref<16x96xbf16, #tpu.memory_space<vmem>>, vector<16x96xbf16>
    tpu.vector_store %arg6[%c0_14, %c0_15], %29 {strides = array<i32>} : memref<16x96xbf16, #tpu.memory_space<vmem>>, vector<16x96xbf16>,
    return
  }
  func.func @transform_0(%arg0: i32) -> (i32, i32) {
    %c0_i32 = arith.constant 0 : i32
    %c0_i32_0 = arith.constant 0 : i32
    return %arg0, %c0_i32 : i32, i32
  }
  func.func @transform_1(%arg0: i32) -> (i32, i32) {
    %c0_i32 = arith.constant 0 : i32
    %c0_i32_0 = arith.constant 0 : i32
    %c0_i32_1 = arith.constant 0 : i32
    return %c0_i32, %c0_i32_0 : i32, i32
  }
  func.func @transform_2(%arg0: i32) -> (i32, i32) {
    %c0_i32 = arith.constant 0 : i32
    %c0_i32_0 = arith.constant 0 : i32
    %c0_i32_1 = arith.constant 0 : i32
    return %c0_i32, %c0_i32_0 : i32, i32
  }
  func.func @transform_3(%arg0: i32) -> (i32, i32) {
    %c0_i32 = arith.constant 0 : i32
    %c0_i32_0 = arith.constant 0 : i32
    %c0_i32_1 = arith.constant 0 : i32
    return %c0_i32, %c0_i32_0 : i32, i32
  }
  func.func @transform_4(%arg0: i32) -> (i32, i32) {
    %c0_i32 = arith.constant 0 : i32
    %c0_i32_0 = arith.constant 0 : i32
    %c0_i32_1 = arith.constant 0 : i32
    return %c0_i32, %c0_i32_0 : i32, i32
  }
  func.func @transform_5(%arg0: i32) -> (i32, i32) {
    %c0_i32 = arith.constant 0 : i32
    %c0_i32_0 = arith.constant 0 : i32
    return %arg0, %c0_i32 : i32, i32
  }
}

module attributes {stable_mosaic.version = 11 : i64} {
  func.func @_proj_fc_res_kernel(%arg0: i32, %arg1: memref<16x32xbf16, #tpu.memory_space<vmem>>, %arg2: memref<32x32xbf16, #tpu.memory_space<vmem>>, %arg3: memref<1x32xf32, #tpu.memory_space<vmem>>, %arg4: memref<32x32xbf16, #tpu.memory_space<vmem>>, %arg5: memref<1x32xf32, #tpu.memory_space<vmem>>, %arg6: memref<16x32xf32, #tpu.memory_space<vmem>>, %arg7: memref<16x32xf32, #tpu.memory_space<vmem>>) attributes {dimension_semantics = [#tpu.dimension_semantics<parallel>], iteration_bounds = array<i64: 1>, scalar_prefetch = 0 : i64, scratch_operands = 0 : i64, tpu.core_type = #tpu.core_type<tc>, window_params = [{transform_indices = @transform_0, window_bounds = array<i64: 16, 32>}, {pipeline_mode = #tpu.pipeline_mode<synchronous>, transform_indices = @transform_1, window_bounds = array<i64: 32, 32>}, {pipeline_mode = #tpu.pipeline_mode<synchronous>, transform_indices = @transform_2, window_bounds = array<i64: 1, 32>}, {pipeline_mode = #tpu.pipeline_mode<synchronous>, transform_indices = @transform_3, window_bounds = array<i64: 32, 32>}, {pipeline_mode = #tpu.pipeline_mode<synchronous>, transform_indices = @transform_4, window_bounds = array<i64: 1, 32>}, {transform_indices = @transform_5, window_bounds = array<i64: 16, 32>}, {transform_indices = @transform_6, window_bounds = array<i64: 16, 32>}]} {
    %c0 = arith.constant 0 : index
    %c0_0 = arith.constant 0 : index
    %0 = vector.load %arg1[%c0, %c0_0] : memref<16x32xbf16, #tpu.memory_space<vmem>>, vector<16x32xbf16>
    %c0_1 = arith.constant 0 : index
    %c0_2 = arith.constant 0 : index
    %1 = vector.load %arg2[%c0_1, %c0_2] : memref<32x32xbf16, #tpu.memory_space<vmem>>, vector<32x32xbf16>
    %cst = arith.constant dense<0.000000e+00> : vector<16x32xf32>
    %2 = tpu.matmul %0, %1, %cst {dimension_numbers = #tpu.dot_dimension_numbers<[1], [0], [0], [1], [0, 0, 1, 1], [], []>} : vector<16x32xbf16>, vector<32x32xbf16>, vector<16x32xf32> -> vector<16x32xf32>
    %c0_3 = arith.constant 0 : index
    %c0_4 = arith.constant 0 : index
    %3 = vector.load %arg3[%c0_3, %c0_4] : memref<1x32xf32, #tpu.memory_space<vmem>>, vector<1x32xf32>
    %4 = vector.broadcast %3 : vector<1x32xf32> to vector<16x32xf32>
    %5 = arith.addf %2, %4 : vector<16x32xf32>
    %6 = arith.truncf %5 : vector<16x32xf32> to vector<16x32xbf16>
    %c0_5 = arith.constant 0 : index
    %c0_6 = arith.constant 0 : index
    %7 = vector.load %arg4[%c0_5, %c0_6] : memref<32x32xbf16, #tpu.memory_space<vmem>>, vector<32x32xbf16>
    %cst_7 = arith.constant dense<0.000000e+00> : vector<16x32xf32>
    %8 = tpu.matmul %6, %7, %cst_7 {dimension_numbers = #tpu.dot_dimension_numbers<[1], [0], [0], [1], [0, 0, 1, 1], [], []>} : vector<16x32xbf16>, vector<32x32xbf16>, vector<16x32xf32> -> vector<16x32xf32>
    %c0_8 = arith.constant 0 : index
    %c0_9 = arith.constant 0 : index
    %9 = vector.load %arg5[%c0_8, %c0_9] : memref<1x32xf32, #tpu.memory_space<vmem>>, vector<1x32xf32>
    %10 = vector.broadcast %9 : vector<1x32xf32> to vector<16x32xf32>
    %11 = arith.addf %8, %10 : vector<16x32xf32>
    %c0_10 = arith.constant 0 : index
    %c0_11 = arith.constant 0 : index
    %12 = vector.load %arg6[%c0_10, %c0_11] : memref<16x32xf32, #tpu.memory_space<vmem>>, vector<16x32xf32>
    %13 = arith.addf %12, %11 : vector<16x32xf32>
    %c0_12 = arith.constant 0 : index
    %c0_13 = arith.constant 0 : index
    %14 = vector.load %arg7[%c0_12, %c0_13] : memref<16x32xf32, #tpu.memory_space<vmem>>, vector<16x32xf32>
    tpu.vector_store %arg7[%c0_12, %c0_13], %13 {strides = array<i32>} : memref<16x32xf32, #tpu.memory_space<vmem>>, vector<16x32xf32>,
    return
  }
  func.func @transform_0(%arg0: i32) -> (i32, i32) {
    %c0_i32 = arith.constant 0 : i32
    %c0_i32_0 = arith.constant 0 : i32
    return %arg0, %c0_i32 : i32, i32
  }
  func.func @transform_1(%arg0: i32) -> (i32, i32) {
    %c0_i32 = arith.constant 0 : i32
    %c0_i32_0 = arith.constant 0 : i32
    %c0_i32_1 = arith.constant 0 : i32
    return %c0_i32, %c0_i32_0 : i32, i32
  }
  func.func @transform_2(%arg0: i32) -> (i32, i32) {
    %c0_i32 = arith.constant 0 : i32
    %c0_i32_0 = arith.constant 0 : i32
    %c0_i32_1 = arith.constant 0 : i32
    return %c0_i32, %c0_i32_0 : i32, i32
  }
  func.func @transform_3(%arg0: i32) -> (i32, i32) {
    %c0_i32 = arith.constant 0 : i32
    %c0_i32_0 = arith.constant 0 : i32
    %c0_i32_1 = arith.constant 0 : i32
    return %c0_i32, %c0_i32_0 : i32, i32
  }
  func.func @transform_4(%arg0: i32) -> (i32, i32) {
    %c0_i32 = arith.constant 0 : i32
    %c0_i32_0 = arith.constant 0 : i32
    %c0_i32_1 = arith.constant 0 : i32
    return %c0_i32, %c0_i32_0 : i32, i32
  }
  func.func @transform_5(%arg0: i32) -> (i32, i32) {
    %c0_i32 = arith.constant 0 : i32
    %c0_i32_0 = arith.constant 0 : i32
    return %arg0, %c0_i32 : i32, i32
  }
  func.func @transform_6(%arg0: i32) -> (i32, i32) {
    %c0_i32 = arith.constant 0 : i32
    %c0_i32_0 = arith.constant 0 : i32
    return %arg0, %c0_i32 : i32, i32
  }
}

module attributes {stable_mosaic.version = 11 : i64} {
  func.func @_attn_kernel(%arg0: i32, %arg1: memref<8x2x96xbf16, #tpu.memory_space<vmem>>, %arg2: memref<8x2x32xbf16, #tpu.memory_space<vmem>>) attributes {dimension_semantics = [#tpu.dimension_semantics<parallel>], iteration_bounds = array<i64: 1>, scalar_prefetch = 0 : i64, scratch_operands = 0 : i64, tpu.core_type = #tpu.core_type<tc>, window_params = [{transform_indices = @transform_0, window_bounds = array<i64: 8, 2, 96>}, {transform_indices = @transform_1, window_bounds = array<i64: 8, 2, 32>}]} {
    %c0 = arith.constant 0 : index
    %c0_0 = arith.constant 0 : index
    %c0_1 = arith.constant 0 : index
    %0 = vector.load %arg1[%c0, %c0_0, %c0_1] : memref<8x2x96xbf16, #tpu.memory_space<vmem>>, vector<8x2x96xbf16>
    %1 = vector.extract_strided_slice %0 {offsets = [0, 0, 0], sizes = [8, 2, 8], strides = [1, 1, 1]} : vector<8x2x96xbf16> to vector<8x2x8xbf16>
    %2 = vector.extract_strided_slice %0 {offsets = [0, 0, 32], sizes = [8, 2, 8], strides = [1, 1, 1]} : vector<8x2x96xbf16> to vector<8x2x8xbf16>
    %3 = vector.extract_strided_slice %0 {offsets = [0, 0, 64], sizes = [8, 2, 8], strides = [1, 1, 1]} : vector<8x2x96xbf16> to vector<8x2x8xbf16>
    "tpu.trace_start"() <{level = 10 : i32, message = "gsd,gtd->gst"}> : () -> ()
    %cst = arith.constant dense<0.000000e+00> : vector<8x2x2xf32>
    %4 = tpu.matmul %1, %2, %cst {dimension_numbers = #tpu.dot_dimension_numbers<[2], [2], [1], [1], [0, 0, 0, 1, 1, 1], [0], [0]>} : vector<8x2x8xbf16>, vector<8x2x8xbf16>, vector<8x2x2xf32> -> vector<8x2x2xf32>
    "tpu.trace_stop"() : () -> ()
    %cst_2 = arith.constant dense<0xFF800000> : vector<8x2xf32>
    %5 = vector.multi_reduction <maximumf>, %4, %cst_2 [2] : vector<8x2x2xf32> to vector<8x2xf32>
    %6 = vector.shape_cast %5 : vector<8x2xf32> to vector<8x2x1xf32>
    %7 = vector.broadcast %6 : vector<8x2x1xf32> to vector<8x2x2xf32>
    %8 = arith.subf %4, %7 : vector<8x2x2xf32>
    %9 = math.exp %8 : vector<8x2x2xf32>
    %cst_3 = arith.constant dense<0.000000e+00> : vector<8x2xf32>
    %10 = vector.multi_reduction <add>, %9, %cst_3 [2] : vector<8x2x2xf32> to vector<8x2xf32>
    %11 = vector.shape_cast %10 : vector<8x2xf32> to vector<8x2x1xf32>
    %12 = tpu.reciprocal %11 {approx = true} : vector<8x2x1xf32> -> vector<8x2x1xf32>
    %13 = vector.broadcast %12 : vector<8x2x1xf32> to vector<8x2x2xf32>
    %14 = arith.mulf %9, %13 : vector<8x2x2xf32>
    %15 = arith.truncf %14 : vector<8x2x2xf32> to vector<8x2x2xbf16>
    "tpu.trace_start"() <{level = 10 : i32, message = "gst,gtd->gsd"}> : () -> ()
    %cst_4 = arith.constant dense<0.000000e+00> : vector<8x2x8xf32>
    %16 = tpu.matmul %15, %3, %cst_4 {dimension_numbers = #tpu.dot_dimension_numbers<[2], [1], [1], [2], [0, 0, 0, 1, 1, 2], [0], [0]>} : vector<8x2x2xbf16>, vector<8x2x8xbf16>, vector<8x2x8xf32> -> vector<8x2x8xf32>
    "tpu.trace_stop"() : () -> ()
    %17 = vector.extract_strided_slice %0 {offsets = [0, 0, 8], sizes = [8, 2, 8], strides = [1, 1, 1]} : vector<8x2x96xbf16> to vector<8x2x8xbf16>
    %18 = vector.extract_strided_slice %0 {offsets = [0, 0, 40], sizes = [8, 2, 8], strides = [1, 1, 1]} : vector<8x2x96xbf16> to vector<8x2x8xbf16>
    %19 = vector.extract_strided_slice %0 {offsets = [0, 0, 72], sizes = [8, 2, 8], strides = [1, 1, 1]} : vector<8x2x96xbf16> to vector<8x2x8xbf16>
    "tpu.trace_start"() <{level = 10 : i32, message = "gsd,gtd->gst"}> : () -> ()
    %cst_5 = arith.constant dense<0.000000e+00> : vector<8x2x2xf32>
    %20 = tpu.matmul %17, %18, %cst_5 {dimension_numbers = #tpu.dot_dimension_numbers<[2], [2], [1], [1], [0, 0, 0, 1, 1, 1], [0], [0]>} : vector<8x2x8xbf16>, vector<8x2x8xbf16>, vector<8x2x2xf32> -> vector<8x2x2xf32>
    "tpu.trace_stop"() : () -> ()
    %cst_6 = arith.constant dense<0xFF800000> : vector<8x2xf32>
    %21 = vector.multi_reduction <maximumf>, %20, %cst_6 [2] : vector<8x2x2xf32> to vector<8x2xf32>
    %22 = vector.shape_cast %21 : vector<8x2xf32> to vector<8x2x1xf32>
    %23 = vector.broadcast %22 : vector<8x2x1xf32> to vector<8x2x2xf32>
    %24 = arith.subf %20, %23 : vector<8x2x2xf32>
    %25 = math.exp %24 : vector<8x2x2xf32>
    %cst_7 = arith.constant dense<0.000000e+00> : vector<8x2xf32>
    %26 = vector.multi_reduction <add>, %25, %cst_7 [2] : vector<8x2x2xf32> to vector<8x2xf32>
    %27 = vector.shape_cast %26 : vector<8x2xf32> to vector<8x2x1xf32>
    %28 = tpu.reciprocal %27 {approx = true} : vector<8x2x1xf32> -> vector<8x2x1xf32>
    %29 = vector.broadcast %28 : vector<8x2x1xf32> to vector<8x2x2xf32>
    %30 = arith.mulf %25, %29 : vector<8x2x2xf32>
    %31 = arith.truncf %30 : vector<8x2x2xf32> to vector<8x2x2xbf16>
    "tpu.trace_start"() <{level = 10 : i32, message = "gst,gtd->gsd"}> : () -> ()
    %cst_8 = arith.constant dense<0.000000e+00> : vector<8x2x8xf32>
    %32 = tpu.matmul %31, %19, %cst_8 {dimension_numbers = #tpu.dot_dimension_numbers<[2], [1], [1], [2], [0, 0, 0, 1, 1, 2], [0], [0]>} : vector<8x2x2xbf16>, vector<8x2x8xbf16>, vector<8x2x8xf32> -> vector<8x2x8xf32>
    "tpu.trace_stop"() : () -> ()
    %33 = vector.extract_strided_slice %0 {offsets = [0, 0, 16], sizes = [8, 2, 8], strides = [1, 1, 1]} : vector<8x2x96xbf16> to vector<8x2x8xbf16>
    %34 = vector.extract_strided_slice %0 {offsets = [0, 0, 48], sizes = [8, 2, 8], strides = [1, 1, 1]} : vector<8x2x96xbf16> to vector<8x2x8xbf16>
    %35 = vector.extract_strided_slice %0 {offsets = [0, 0, 80], sizes = [8, 2, 8], strides = [1, 1, 1]} : vector<8x2x96xbf16> to vector<8x2x8xbf16>
    "tpu.trace_start"() <{level = 10 : i32, message = "gsd,gtd->gst"}> : () -> ()
    %cst_9 = arith.constant dense<0.000000e+00> : vector<8x2x2xf32>
    %36 = tpu.matmul %33, %34, %cst_9 {dimension_numbers = #tpu.dot_dimension_numbers<[2], [2], [1], [1], [0, 0, 0, 1, 1, 1], [0], [0]>} : vector<8x2x8xbf16>, vector<8x2x8xbf16>, vector<8x2x2xf32> -> vector<8x2x2xf32>
    "tpu.trace_stop"() : () -> ()
    %cst_10 = arith.constant dense<0xFF800000> : vector<8x2xf32>
    %37 = vector.multi_reduction <maximumf>, %36, %cst_10 [2] : vector<8x2x2xf32> to vector<8x2xf32>
    %38 = vector.shape_cast %37 : vector<8x2xf32> to vector<8x2x1xf32>
    %39 = vector.broadcast %38 : vector<8x2x1xf32> to vector<8x2x2xf32>
    %40 = arith.subf %36, %39 : vector<8x2x2xf32>
    %41 = math.exp %40 : vector<8x2x2xf32>
    %cst_11 = arith.constant dense<0.000000e+00> : vector<8x2xf32>
    %42 = vector.multi_reduction <add>, %41, %cst_11 [2] : vector<8x2x2xf32> to vector<8x2xf32>
    %43 = vector.shape_cast %42 : vector<8x2xf32> to vector<8x2x1xf32>
    %44 = tpu.reciprocal %43 {approx = true} : vector<8x2x1xf32> -> vector<8x2x1xf32>
    %45 = vector.broadcast %44 : vector<8x2x1xf32> to vector<8x2x2xf32>
    %46 = arith.mulf %41, %45 : vector<8x2x2xf32>
    %47 = arith.truncf %46 : vector<8x2x2xf32> to vector<8x2x2xbf16>
    "tpu.trace_start"() <{level = 10 : i32, message = "gst,gtd->gsd"}> : () -> ()
    %cst_12 = arith.constant dense<0.000000e+00> : vector<8x2x8xf32>
    %48 = tpu.matmul %47, %35, %cst_12 {dimension_numbers = #tpu.dot_dimension_numbers<[2], [1], [1], [2], [0, 0, 0, 1, 1, 2], [0], [0]>} : vector<8x2x2xbf16>, vector<8x2x8xbf16>, vector<8x2x8xf32> -> vector<8x2x8xf32>
    "tpu.trace_stop"() : () -> ()
    %49 = vector.extract_strided_slice %0 {offsets = [0, 0, 24], sizes = [8, 2, 8], strides = [1, 1, 1]} : vector<8x2x96xbf16> to vector<8x2x8xbf16>
    %50 = vector.extract_strided_slice %0 {offsets = [0, 0, 56], sizes = [8, 2, 8], strides = [1, 1, 1]} : vector<8x2x96xbf16> to vector<8x2x8xbf16>
    %51 = vector.extract_strided_slice %0 {offsets = [0, 0, 88], sizes = [8, 2, 8], strides = [1, 1, 1]} : vector<8x2x96xbf16> to vector<8x2x8xbf16>
    "tpu.trace_start"() <{level = 10 : i32, message = "gsd,gtd->gst"}> : () -> ()
    %cst_13 = arith.constant dense<0.000000e+00> : vector<8x2x2xf32>
    %52 = tpu.matmul %49, %50, %cst_13 {dimension_numbers = #tpu.dot_dimension_numbers<[2], [2], [1], [1], [0, 0, 0, 1, 1, 1], [0], [0]>} : vector<8x2x8xbf16>, vector<8x2x8xbf16>, vector<8x2x2xf32> -> vector<8x2x2xf32>
    "tpu.trace_stop"() : () -> ()
    %cst_14 = arith.constant dense<0xFF800000> : vector<8x2xf32>
    %53 = vector.multi_reduction <maximumf>, %52, %cst_14 [2] : vector<8x2x2xf32> to vector<8x2xf32>
    %54 = vector.shape_cast %53 : vector<8x2xf32> to vector<8x2x1xf32>
    %55 = vector.broadcast %54 : vector<8x2x1xf32> to vector<8x2x2xf32>
    %56 = arith.subf %52, %55 : vector<8x2x2xf32>
    %57 = math.exp %56 : vector<8x2x2xf32>
    %cst_15 = arith.constant dense<0.000000e+00> : vector<8x2xf32>
    %58 = vector.multi_reduction <add>, %57, %cst_15 [2] : vector<8x2x2xf32> to vector<8x2xf32>
    %59 = vector.shape_cast %58 : vector<8x2xf32> to vector<8x2x1xf32>
    %60 = tpu.reciprocal %59 {approx = true} : vector<8x2x1xf32> -> vector<8x2x1xf32>
    %61 = vector.broadcast %60 : vector<8x2x1xf32> to vector<8x2x2xf32>
    %62 = arith.mulf %57, %61 : vector<8x2x2xf32>
    %63 = arith.truncf %62 : vector<8x2x2xf32> to vector<8x2x2xbf16>
    "tpu.trace_start"() <{level = 10 : i32, message = "gst,gtd->gsd"}> : () -> ()
    %cst_16 = arith.constant dense<0.000000e+00> : vector<8x2x8xf32>
    %64 = tpu.matmul %63, %51, %cst_16 {dimension_numbers = #tpu.dot_dimension_numbers<[2], [1], [1], [2], [0, 0, 0, 1, 1, 2], [0], [0]>} : vector<8x2x2xbf16>, vector<8x2x8xbf16>, vector<8x2x8xf32> -> vector<8x2x8xf32>
    "tpu.trace_stop"() : () -> ()
    %65 = tpu.concatenate %16, %32, %48, %64 in 2 : vector<8x2x8xf32>, vector<8x2x8xf32>, vector<8x2x8xf32>, vector<8x2x8xf32> -> vector<8x2x32xf32>
    %66 = arith.truncf %65 : vector<8x2x32xf32> to vector<8x2x32xbf16>
    %c0_17 = arith.constant 0 : index
    %c0_18 = arith.constant 0 : index
    %c0_19 = arith.constant 0 : index
    %67 = vector.load %arg2[%c0_17, %c0_18, %c0_19] : memref<8x2x32xbf16, #tpu.memory_space<vmem>>, vector<8x2x32xbf16>
    tpu.vector_store %arg2[%c0_17, %c0_18, %c0_19], %66 {strides = array<i32>} : memref<8x2x32xbf16, #tpu.memory_space<vmem>>, vector<8x2x32xbf16>,
    return
  }
  func.func @transform_0(%arg0: i32) -> (i32, i32, i32) {
    %c0_i32 = arith.constant 0 : i32
    %c0_i32_0 = arith.constant 0 : i32
    %c0_i32_1 = arith.constant 0 : i32
    return %arg0, %c0_i32, %c0_i32_0 : i32, i32, i32
  }
  func.func @transform_1(%arg0: i32) -> (i32, i32, i32) {
    %c0_i32 = arith.constant 0 : i32
    %c0_i32_0 = arith.constant 0 : i32
    %c0_i32_1 = arith.constant 0 : i32
    return %arg0, %c0_i32, %c0_i32_0 : i32, i32, i32
  }
}

module attributes {stable_mosaic.version = 11 : i64} {
  func.func @_ln_linear_kernel(%arg0: i32, %arg1: memref<20x32xf32, #tpu.memory_space<vmem>>, %arg2: memref<1x32xf32, #tpu.memory_space<vmem>>, %arg3: memref<1x32xf32, #tpu.memory_space<vmem>>, %arg4: memref<32x96xbf16, #tpu.memory_space<vmem>>, %arg5: memref<1x96xf32, #tpu.memory_space<vmem>>, %arg6: memref<20x96xbf16, #tpu.memory_space<vmem>>) attributes {dimension_semantics = [#tpu.dimension_semantics<parallel>], iteration_bounds = array<i64: 1>, scalar_prefetch = 0 : i64, scratch_operands = 0 : i64, tpu.core_type = #tpu.core_type<tc>, window_params = [{transform_indices = @transform_0, window_bounds = array<i64: 20, 32>}, {pipeline_mode = #tpu.pipeline_mode<synchronous>, transform_indices = @transform_1, window_bounds = array<i64: 1, 32>}, {pipeline_mode = #tpu.pipeline_mode<synchronous>, transform_indices = @transform_2, window_bounds = array<i64: 1, 32>}, {pipeline_mode = #tpu.pipeline_mode<synchronous>, transform_indices = @transform_3, window_bounds = array<i64: 32, 96>}, {pipeline_mode = #tpu.pipeline_mode<synchronous>, transform_indices = @transform_4, window_bounds = array<i64: 1, 96>}, {transform_indices = @transform_5, window_bounds = array<i64: 20, 96>}]} {
    %c0 = arith.constant 0 : index
    %c0_0 = arith.constant 0 : index
    %0 = vector.load %arg1[%c0, %c0_0] : memref<20x32xf32, #tpu.memory_space<vmem>>, vector<20x32xf32>
    %c0_1 = arith.constant 0 : index
    %c0_2 = arith.constant 0 : index
    %1 = vector.load %arg2[%c0_1, %c0_2] : memref<1x32xf32, #tpu.memory_space<vmem>>, vector<1x32xf32>
    %c0_3 = arith.constant 0 : index
    %c0_4 = arith.constant 0 : index
    %2 = vector.load %arg3[%c0_3, %c0_4] : memref<1x32xf32, #tpu.memory_space<vmem>>, vector<1x32xf32>
    %cst = arith.constant dense<0.000000e+00> : vector<20xf32>
    %3 = vector.multi_reduction <add>, %0, %cst [1] : vector<20x32xf32> to vector<20xf32>
    %4 = vector.shape_cast %3 : vector<20xf32> to vector<20x1xf32>
    %cst_5 = arith.constant 3.200000e+01 : f32
    %5 = vector.broadcast %cst_5 : f32 to vector<20x1xf32>
    %6 = arith.divf %4, %5 : vector<20x1xf32>
    %7 = vector.broadcast %6 : vector<20x1xf32> to vector<20x32xf32>
    %8 = arith.subf %0, %7 : vector<20x32xf32>
    %9 = arith.mulf %8, %8 : vector<20x32xf32>
    %cst_6 = arith.constant dense<0.000000e+00> : vector<20xf32>
    %10 = vector.multi_reduction <add>, %9, %cst_6 [1] : vector<20x32xf32> to vector<20xf32>
    %11 = vector.shape_cast %10 : vector<20xf32> to vector<20x1xf32>
    %cst_7 = arith.constant 3.200000e+01 : f32
    %12 = vector.broadcast %cst_7 : f32 to vector<20x1xf32>
    %13 = arith.divf %11, %12 : vector<20x1xf32>
    %cst_8 = arith.constant 9.99999997E-7 : f32
    %14 = vector.broadcast %cst_8 : f32 to vector<20x1xf32>
    %15 = arith.addf %13, %14 : vector<20x1xf32>
    %16 = math.rsqrt %15 : vector<20x1xf32>
    %17 = vector.broadcast %16 : vector<20x1xf32> to vector<20x32xf32>
    %18 = arith.mulf %8, %17 : vector<20x32xf32>
    %19 = vector.broadcast %1 : vector<1x32xf32> to vector<20x32xf32>
    %20 = arith.mulf %18, %19 : vector<20x32xf32>
    %21 = vector.broadcast %2 : vector<1x32xf32> to vector<20x32xf32>
    %22 = arith.addf %20, %21 : vector<20x32xf32>
    %23 = arith.truncf %22 : vector<20x32xf32> to vector<20x32xbf16>
    %c0_9 = arith.constant 0 : index
    %c0_10 = arith.constant 0 : index
    %24 = vector.load %arg4[%c0_9, %c0_10] : memref<32x96xbf16, #tpu.memory_space<vmem>>, vector<32x96xbf16>
    %cst_11 = arith.constant dense<0.000000e+00> : vector<20x96xf32>
    %25 = tpu.matmul %23, %24, %cst_11 {dimension_numbers = #tpu.dot_dimension_numbers<[1], [0], [0], [1], [0, 0, 1, 1], [], []>} : vector<20x32xbf16>, vector<32x96xbf16>, vector<20x96xf32> -> vector<20x96xf32>
    %c0_12 = arith.constant 0 : index
    %c0_13 = arith.constant 0 : index
    %26 = vector.load %arg5[%c0_12, %c0_13] : memref<1x96xf32, #tpu.memory_space<vmem>>, vector<1x96xf32>
    %27 = vector.broadcast %26 : vector<1x96xf32> to vector<20x96xf32>
    %28 = arith.addf %25, %27 : vector<20x96xf32>
    %29 = arith.truncf %28 : vector<20x96xf32> to vector<20x96xbf16>
    %c0_14 = arith.constant 0 : index
    %c0_15 = arith.constant 0 : index
    %30 = vector.load %arg6[%c0_14, %c0_15] : memref<20x96xbf16, #tpu.memory_space<vmem>>, vector<20x96xbf16>
    tpu.vector_store %arg6[%c0_14, %c0_15], %29 {strides = array<i32>} : memref<20x96xbf16, #tpu.memory_space<vmem>>, vector<20x96xbf16>,
    return
  }
  func.func @transform_0(%arg0: i32) -> (i32, i32) {
    %c0_i32 = arith.constant 0 : i32
    %c0_i32_0 = arith.constant 0 : i32
    return %arg0, %c0_i32 : i32, i32
  }
  func.func @transform_1(%arg0: i32) -> (i32, i32) {
    %c0_i32 = arith.constant 0 : i32
    %c0_i32_0 = arith.constant 0 : i32
    %c0_i32_1 = arith.constant 0 : i32
    return %c0_i32, %c0_i32_0 : i32, i32
  }
  func.func @transform_2(%arg0: i32) -> (i32, i32) {
    %c0_i32 = arith.constant 0 : i32
    %c0_i32_0 = arith.constant 0 : i32
    %c0_i32_1 = arith.constant 0 : i32
    return %c0_i32, %c0_i32_0 : i32, i32
  }
  func.func @transform_3(%arg0: i32) -> (i32, i32) {
    %c0_i32 = arith.constant 0 : i32
    %c0_i32_0 = arith.constant 0 : i32
    %c0_i32_1 = arith.constant 0 : i32
    return %c0_i32, %c0_i32_0 : i32, i32
  }
  func.func @transform_4(%arg0: i32) -> (i32, i32) {
    %c0_i32 = arith.constant 0 : i32
    %c0_i32_0 = arith.constant 0 : i32
    %c0_i32_1 = arith.constant 0 : i32
    return %c0_i32, %c0_i32_0 : i32, i32
  }
  func.func @transform_5(%arg0: i32) -> (i32, i32) {
    %c0_i32 = arith.constant 0 : i32
    %c0_i32_0 = arith.constant 0 : i32
    return %arg0, %c0_i32 : i32, i32
  }
}

module attributes {stable_mosaic.version = 11 : i64} {
  func.func @_attn_kernel(%arg0: i32, %arg1: memref<4x5x96xbf16, #tpu.memory_space<vmem>>, %arg2: memref<4x5x32xbf16, #tpu.memory_space<vmem>>) attributes {dimension_semantics = [#tpu.dimension_semantics<parallel>], iteration_bounds = array<i64: 1>, scalar_prefetch = 0 : i64, scratch_operands = 0 : i64, tpu.core_type = #tpu.core_type<tc>, window_params = [{transform_indices = @transform_0, window_bounds = array<i64: 4, 5, 96>}, {transform_indices = @transform_1, window_bounds = array<i64: 4, 5, 32>}]} {
    %c0 = arith.constant 0 : index
    %c0_0 = arith.constant 0 : index
    %c0_1 = arith.constant 0 : index
    %0 = vector.load %arg1[%c0, %c0_0, %c0_1] : memref<4x5x96xbf16, #tpu.memory_space<vmem>>, vector<4x5x96xbf16>
    %1 = vector.extract_strided_slice %0 {offsets = [0, 0, 0], sizes = [4, 5, 8], strides = [1, 1, 1]} : vector<4x5x96xbf16> to vector<4x5x8xbf16>
    %2 = vector.extract_strided_slice %0 {offsets = [0, 0, 32], sizes = [4, 5, 8], strides = [1, 1, 1]} : vector<4x5x96xbf16> to vector<4x5x8xbf16>
    %3 = vector.extract_strided_slice %0 {offsets = [0, 0, 64], sizes = [4, 5, 8], strides = [1, 1, 1]} : vector<4x5x96xbf16> to vector<4x5x8xbf16>
    "tpu.trace_start"() <{level = 10 : i32, message = "gsd,gtd->gst"}> : () -> ()
    %cst = arith.constant dense<0.000000e+00> : vector<4x5x5xf32>
    %4 = tpu.matmul %1, %2, %cst {dimension_numbers = #tpu.dot_dimension_numbers<[2], [2], [1], [1], [0, 0, 0, 1, 1, 1], [0], [0]>} : vector<4x5x8xbf16>, vector<4x5x8xbf16>, vector<4x5x5xf32> -> vector<4x5x5xf32>
    "tpu.trace_stop"() : () -> ()
    %cst_2 = arith.constant dense<0xFF800000> : vector<4x5xf32>
    %5 = vector.multi_reduction <maximumf>, %4, %cst_2 [2] : vector<4x5x5xf32> to vector<4x5xf32>
    %6 = vector.shape_cast %5 : vector<4x5xf32> to vector<4x5x1xf32>
    %7 = vector.broadcast %6 : vector<4x5x1xf32> to vector<4x5x5xf32>
    %8 = arith.subf %4, %7 : vector<4x5x5xf32>
    %9 = math.exp %8 : vector<4x5x5xf32>
    %cst_3 = arith.constant dense<0.000000e+00> : vector<4x5xf32>
    %10 = vector.multi_reduction <add>, %9, %cst_3 [2] : vector<4x5x5xf32> to vector<4x5xf32>
    %11 = vector.shape_cast %10 : vector<4x5xf32> to vector<4x5x1xf32>
    %12 = tpu.reciprocal %11 {approx = true} : vector<4x5x1xf32> -> vector<4x5x1xf32>
    %13 = vector.broadcast %12 : vector<4x5x1xf32> to vector<4x5x5xf32>
    %14 = arith.mulf %9, %13 : vector<4x5x5xf32>
    %15 = arith.truncf %14 : vector<4x5x5xf32> to vector<4x5x5xbf16>
    "tpu.trace_start"() <{level = 10 : i32, message = "gst,gtd->gsd"}> : () -> ()
    %cst_4 = arith.constant dense<0.000000e+00> : vector<4x5x8xf32>
    %16 = tpu.matmul %15, %3, %cst_4 {dimension_numbers = #tpu.dot_dimension_numbers<[2], [1], [1], [2], [0, 0, 0, 1, 1, 2], [0], [0]>} : vector<4x5x5xbf16>, vector<4x5x8xbf16>, vector<4x5x8xf32> -> vector<4x5x8xf32>
    "tpu.trace_stop"() : () -> ()
    %17 = vector.extract_strided_slice %0 {offsets = [0, 0, 8], sizes = [4, 5, 8], strides = [1, 1, 1]} : vector<4x5x96xbf16> to vector<4x5x8xbf16>
    %18 = vector.extract_strided_slice %0 {offsets = [0, 0, 40], sizes = [4, 5, 8], strides = [1, 1, 1]} : vector<4x5x96xbf16> to vector<4x5x8xbf16>
    %19 = vector.extract_strided_slice %0 {offsets = [0, 0, 72], sizes = [4, 5, 8], strides = [1, 1, 1]} : vector<4x5x96xbf16> to vector<4x5x8xbf16>
    "tpu.trace_start"() <{level = 10 : i32, message = "gsd,gtd->gst"}> : () -> ()
    %cst_5 = arith.constant dense<0.000000e+00> : vector<4x5x5xf32>
    %20 = tpu.matmul %17, %18, %cst_5 {dimension_numbers = #tpu.dot_dimension_numbers<[2], [2], [1], [1], [0, 0, 0, 1, 1, 1], [0], [0]>} : vector<4x5x8xbf16>, vector<4x5x8xbf16>, vector<4x5x5xf32> -> vector<4x5x5xf32>
    "tpu.trace_stop"() : () -> ()
    %cst_6 = arith.constant dense<0xFF800000> : vector<4x5xf32>
    %21 = vector.multi_reduction <maximumf>, %20, %cst_6 [2] : vector<4x5x5xf32> to vector<4x5xf32>
    %22 = vector.shape_cast %21 : vector<4x5xf32> to vector<4x5x1xf32>
    %23 = vector.broadcast %22 : vector<4x5x1xf32> to vector<4x5x5xf32>
    %24 = arith.subf %20, %23 : vector<4x5x5xf32>
    %25 = math.exp %24 : vector<4x5x5xf32>
    %cst_7 = arith.constant dense<0.000000e+00> : vector<4x5xf32>
    %26 = vector.multi_reduction <add>, %25, %cst_7 [2] : vector<4x5x5xf32> to vector<4x5xf32>
    %27 = vector.shape_cast %26 : vector<4x5xf32> to vector<4x5x1xf32>
    %28 = tpu.reciprocal %27 {approx = true} : vector<4x5x1xf32> -> vector<4x5x1xf32>
    %29 = vector.broadcast %28 : vector<4x5x1xf32> to vector<4x5x5xf32>
    %30 = arith.mulf %25, %29 : vector<4x5x5xf32>
    %31 = arith.truncf %30 : vector<4x5x5xf32> to vector<4x5x5xbf16>
    "tpu.trace_start"() <{level = 10 : i32, message = "gst,gtd->gsd"}> : () -> ()
    %cst_8 = arith.constant dense<0.000000e+00> : vector<4x5x8xf32>
    %32 = tpu.matmul %31, %19, %cst_8 {dimension_numbers = #tpu.dot_dimension_numbers<[2], [1], [1], [2], [0, 0, 0, 1, 1, 2], [0], [0]>} : vector<4x5x5xbf16>, vector<4x5x8xbf16>, vector<4x5x8xf32> -> vector<4x5x8xf32>
    "tpu.trace_stop"() : () -> ()
    %33 = vector.extract_strided_slice %0 {offsets = [0, 0, 16], sizes = [4, 5, 8], strides = [1, 1, 1]} : vector<4x5x96xbf16> to vector<4x5x8xbf16>
    %34 = vector.extract_strided_slice %0 {offsets = [0, 0, 48], sizes = [4, 5, 8], strides = [1, 1, 1]} : vector<4x5x96xbf16> to vector<4x5x8xbf16>
    %35 = vector.extract_strided_slice %0 {offsets = [0, 0, 80], sizes = [4, 5, 8], strides = [1, 1, 1]} : vector<4x5x96xbf16> to vector<4x5x8xbf16>
    "tpu.trace_start"() <{level = 10 : i32, message = "gsd,gtd->gst"}> : () -> ()
    %cst_9 = arith.constant dense<0.000000e+00> : vector<4x5x5xf32>
    %36 = tpu.matmul %33, %34, %cst_9 {dimension_numbers = #tpu.dot_dimension_numbers<[2], [2], [1], [1], [0, 0, 0, 1, 1, 1], [0], [0]>} : vector<4x5x8xbf16>, vector<4x5x8xbf16>, vector<4x5x5xf32> -> vector<4x5x5xf32>
    "tpu.trace_stop"() : () -> ()
    %cst_10 = arith.constant dense<0xFF800000> : vector<4x5xf32>
    %37 = vector.multi_reduction <maximumf>, %36, %cst_10 [2] : vector<4x5x5xf32> to vector<4x5xf32>
    %38 = vector.shape_cast %37 : vector<4x5xf32> to vector<4x5x1xf32>
    %39 = vector.broadcast %38 : vector<4x5x1xf32> to vector<4x5x5xf32>
    %40 = arith.subf %36, %39 : vector<4x5x5xf32>
    %41 = math.exp %40 : vector<4x5x5xf32>
    %cst_11 = arith.constant dense<0.000000e+00> : vector<4x5xf32>
    %42 = vector.multi_reduction <add>, %41, %cst_11 [2] : vector<4x5x5xf32> to vector<4x5xf32>
    %43 = vector.shape_cast %42 : vector<4x5xf32> to vector<4x5x1xf32>
    %44 = tpu.reciprocal %43 {approx = true} : vector<4x5x1xf32> -> vector<4x5x1xf32>
    %45 = vector.broadcast %44 : vector<4x5x1xf32> to vector<4x5x5xf32>
    %46 = arith.mulf %41, %45 : vector<4x5x5xf32>
    %47 = arith.truncf %46 : vector<4x5x5xf32> to vector<4x5x5xbf16>
    "tpu.trace_start"() <{level = 10 : i32, message = "gst,gtd->gsd"}> : () -> ()
    %cst_12 = arith.constant dense<0.000000e+00> : vector<4x5x8xf32>
    %48 = tpu.matmul %47, %35, %cst_12 {dimension_numbers = #tpu.dot_dimension_numbers<[2], [1], [1], [2], [0, 0, 0, 1, 1, 2], [0], [0]>} : vector<4x5x5xbf16>, vector<4x5x8xbf16>, vector<4x5x8xf32> -> vector<4x5x8xf32>
    "tpu.trace_stop"() : () -> ()
    %49 = vector.extract_strided_slice %0 {offsets = [0, 0, 24], sizes = [4, 5, 8], strides = [1, 1, 1]} : vector<4x5x96xbf16> to vector<4x5x8xbf16>
    %50 = vector.extract_strided_slice %0 {offsets = [0, 0, 56], sizes = [4, 5, 8], strides = [1, 1, 1]} : vector<4x5x96xbf16> to vector<4x5x8xbf16>
    %51 = vector.extract_strided_slice %0 {offsets = [0, 0, 88], sizes = [4, 5, 8], strides = [1, 1, 1]} : vector<4x5x96xbf16> to vector<4x5x8xbf16>
    "tpu.trace_start"() <{level = 10 : i32, message = "gsd,gtd->gst"}> : () -> ()
    %cst_13 = arith.constant dense<0.000000e+00> : vector<4x5x5xf32>
    %52 = tpu.matmul %49, %50, %cst_13 {dimension_numbers = #tpu.dot_dimension_numbers<[2], [2], [1], [1], [0, 0, 0, 1, 1, 1], [0], [0]>} : vector<4x5x8xbf16>, vector<4x5x8xbf16>, vector<4x5x5xf32> -> vector<4x5x5xf32>
    "tpu.trace_stop"() : () -> ()
    %cst_14 = arith.constant dense<0xFF800000> : vector<4x5xf32>
    %53 = vector.multi_reduction <maximumf>, %52, %cst_14 [2] : vector<4x5x5xf32> to vector<4x5xf32>
    %54 = vector.shape_cast %53 : vector<4x5xf32> to vector<4x5x1xf32>
    %55 = vector.broadcast %54 : vector<4x5x1xf32> to vector<4x5x5xf32>
    %56 = arith.subf %52, %55 : vector<4x5x5xf32>
    %57 = math.exp %56 : vector<4x5x5xf32>
    %cst_15 = arith.constant dense<0.000000e+00> : vector<4x5xf32>
    %58 = vector.multi_reduction <add>, %57, %cst_15 [2] : vector<4x5x5xf32> to vector<4x5xf32>
    %59 = vector.shape_cast %58 : vector<4x5xf32> to vector<4x5x1xf32>
    %60 = tpu.reciprocal %59 {approx = true} : vector<4x5x1xf32> -> vector<4x5x1xf32>
    %61 = vector.broadcast %60 : vector<4x5x1xf32> to vector<4x5x5xf32>
    %62 = arith.mulf %57, %61 : vector<4x5x5xf32>
    %63 = arith.truncf %62 : vector<4x5x5xf32> to vector<4x5x5xbf16>
    "tpu.trace_start"() <{level = 10 : i32, message = "gst,gtd->gsd"}> : () -> ()
    %cst_16 = arith.constant dense<0.000000e+00> : vector<4x5x8xf32>
    %64 = tpu.matmul %63, %51, %cst_16 {dimension_numbers = #tpu.dot_dimension_numbers<[2], [1], [1], [2], [0, 0, 0, 1, 1, 2], [0], [0]>} : vector<4x5x5xbf16>, vector<4x5x8xbf16>, vector<4x5x8xf32> -> vector<4x5x8xf32>
    "tpu.trace_stop"() : () -> ()
    %65 = tpu.concatenate %16, %32, %48, %64 in 2 : vector<4x5x8xf32>, vector<4x5x8xf32>, vector<4x5x8xf32>, vector<4x5x8xf32> -> vector<4x5x32xf32>
    %66 = arith.truncf %65 : vector<4x5x32xf32> to vector<4x5x32xbf16>
    %c0_17 = arith.constant 0 : index
    %c0_18 = arith.constant 0 : index
    %c0_19 = arith.constant 0 : index
    %67 = vector.load %arg2[%c0_17, %c0_18, %c0_19] : memref<4x5x32xbf16, #tpu.memory_space<vmem>>, vector<4x5x32xbf16>
    tpu.vector_store %arg2[%c0_17, %c0_18, %c0_19], %66 {strides = array<i32>} : memref<4x5x32xbf16, #tpu.memory_space<vmem>>, vector<4x5x32xbf16>,
    return
  }
  func.func @transform_0(%arg0: i32) -> (i32, i32, i32) {
    %c0_i32 = arith.constant 0 : i32
    %c0_i32_0 = arith.constant 0 : i32
    %c0_i32_1 = arith.constant 0 : i32
    return %arg0, %c0_i32, %c0_i32_0 : i32, i32, i32
  }
  func.func @transform_1(%arg0: i32) -> (i32, i32, i32) {
    %c0_i32 = arith.constant 0 : i32
    %c0_i32_0 = arith.constant 0 : i32
    %c0_i32_1 = arith.constant 0 : i32
    return %arg0, %c0_i32, %c0_i32_0 : i32, i32, i32
  }
}

module attributes {stable_mosaic.version = 11 : i64} {
  func.func @_linear_kernel(%arg0: i32, %arg1: memref<20x32xbf16, #tpu.memory_space<vmem>>, %arg2: memref<32x32xbf16, #tpu.memory_space<vmem>>, %arg3: memref<1x32xf32, #tpu.memory_space<vmem>>, %arg4: memref<20x32xf32, #tpu.memory_space<vmem>>) attributes {dimension_semantics = [#tpu.dimension_semantics<parallel>], iteration_bounds = array<i64: 1>, scalar_prefetch = 0 : i64, scratch_operands = 0 : i64, tpu.core_type = #tpu.core_type<tc>, window_params = [{transform_indices = @transform_0, window_bounds = array<i64: 20, 32>}, {pipeline_mode = #tpu.pipeline_mode<synchronous>, transform_indices = @transform_1, window_bounds = array<i64: 32, 32>}, {pipeline_mode = #tpu.pipeline_mode<synchronous>, transform_indices = @transform_2, window_bounds = array<i64: 1, 32>}, {transform_indices = @transform_3, window_bounds = array<i64: 20, 32>}]} {
    %c0 = arith.constant 0 : index
    %c0_0 = arith.constant 0 : index
    %0 = vector.load %arg1[%c0, %c0_0] : memref<20x32xbf16, #tpu.memory_space<vmem>>, vector<20x32xbf16>
    %c0_1 = arith.constant 0 : index
    %c0_2 = arith.constant 0 : index
    %1 = vector.load %arg2[%c0_1, %c0_2] : memref<32x32xbf16, #tpu.memory_space<vmem>>, vector<32x32xbf16>
    %cst = arith.constant dense<0.000000e+00> : vector<20x32xf32>
    %2 = tpu.matmul %0, %1, %cst {dimension_numbers = #tpu.dot_dimension_numbers<[1], [0], [0], [1], [0, 0, 1, 1], [], []>} : vector<20x32xbf16>, vector<32x32xbf16>, vector<20x32xf32> -> vector<20x32xf32>
    %c0_3 = arith.constant 0 : index
    %c0_4 = arith.constant 0 : index
    %3 = vector.load %arg3[%c0_3, %c0_4] : memref<1x32xf32, #tpu.memory_space<vmem>>, vector<1x32xf32>
    %4 = vector.broadcast %3 : vector<1x32xf32> to vector<20x32xf32>
    %5 = arith.addf %2, %4 : vector<20x32xf32>
    %c0_5 = arith.constant 0 : index
    %c0_6 = arith.constant 0 : index
    %6 = vector.load %arg4[%c0_5, %c0_6] : memref<20x32xf32, #tpu.memory_space<vmem>>, vector<20x32xf32>
    tpu.vector_store %arg4[%c0_5, %c0_6], %5 {strides = array<i32>} : memref<20x32xf32, #tpu.memory_space<vmem>>, vector<20x32xf32>,
    return
  }
  func.func @transform_0(%arg0: i32) -> (i32, i32) {
    %c0_i32 = arith.constant 0 : i32
    %c0_i32_0 = arith.constant 0 : i32
    return %arg0, %c0_i32 : i32, i32
  }
  func.func @transform_1(%arg0: i32) -> (i32, i32) {
    %c0_i32 = arith.constant 0 : i32
    %c0_i32_0 = arith.constant 0 : i32
    %c0_i32_1 = arith.constant 0 : i32
    return %c0_i32, %c0_i32_0 : i32, i32
  }
  func.func @transform_2(%arg0: i32) -> (i32, i32) {
    %c0_i32 = arith.constant 0 : i32
    %c0_i32_0 = arith.constant 0 : i32
    %c0_i32_1 = arith.constant 0 : i32
    return %c0_i32, %c0_i32_0 : i32, i32
  }
  func.func @transform_3(%arg0: i32) -> (i32, i32) {
    %c0_i32 = arith.constant 0 : i32
    %c0_i32_0 = arith.constant 0 : i32
    return %arg0, %c0_i32 : i32, i32
  }
}

module attributes {stable_mosaic.version = 11 : i64} {
  func.func @_add_ln_ffn_kernel(%arg0: i32, %arg1: memref<18x32xf32, #tpu.memory_space<vmem>>, %arg2: memref<18x32xf32, #tpu.memory_space<vmem>>, %arg3: memref<1x32xf32, #tpu.memory_space<vmem>>, %arg4: memref<1x32xf32, #tpu.memory_space<vmem>>, %arg5: memref<32x128xbf16, #tpu.memory_space<vmem>>, %arg6: memref<1x128xf32, #tpu.memory_space<vmem>>, %arg7: memref<128x32xbf16, #tpu.memory_space<vmem>>, %arg8: memref<1x32xf32, #tpu.memory_space<vmem>>, %arg9: memref<18x32xf32, #tpu.memory_space<vmem>>) attributes {dimension_semantics = [#tpu.dimension_semantics<parallel>], iteration_bounds = array<i64: 1>, scalar_prefetch = 0 : i64, scratch_operands = 0 : i64, tpu.core_type = #tpu.core_type<tc>, window_params = [{transform_indices = @transform_0, window_bounds = array<i64: 18, 32>}, {transform_indices = @transform_1, window_bounds = array<i64: 18, 32>}, {pipeline_mode = #tpu.pipeline_mode<synchronous>, transform_indices = @transform_2, window_bounds = array<i64: 1, 32>}, {pipeline_mode = #tpu.pipeline_mode<synchronous>, transform_indices = @transform_3, window_bounds = array<i64: 1, 32>}, {pipeline_mode = #tpu.pipeline_mode<synchronous>, transform_indices = @transform_4, window_bounds = array<i64: 32, 128>}, {pipeline_mode = #tpu.pipeline_mode<synchronous>, transform_indices = @transform_5, window_bounds = array<i64: 1, 128>}, {pipeline_mode = #tpu.pipeline_mode<synchronous>, transform_indices = @transform_6, window_bounds = array<i64: 128, 32>}, {pipeline_mode = #tpu.pipeline_mode<synchronous>, transform_indices = @transform_7, window_bounds = array<i64: 1, 32>}, {transform_indices = @transform_8, window_bounds = array<i64: 18, 32>}]} {
    %c0 = arith.constant 0 : index
    %c0_0 = arith.constant 0 : index
    %0 = vector.load %arg1[%c0, %c0_0] : memref<18x32xf32, #tpu.memory_space<vmem>>, vector<18x32xf32>
    %c0_1 = arith.constant 0 : index
    %c0_2 = arith.constant 0 : index
    %1 = vector.load %arg2[%c0_1, %c0_2] : memref<18x32xf32, #tpu.memory_space<vmem>>, vector<18x32xf32>
    %2 = arith.addf %0, %1 : vector<18x32xf32>
    %c0_3 = arith.constant 0 : index
    %c0_4 = arith.constant 0 : index
    %3 = vector.load %arg3[%c0_3, %c0_4] : memref<1x32xf32, #tpu.memory_space<vmem>>, vector<1x32xf32>
    %c0_5 = arith.constant 0 : index
    %c0_6 = arith.constant 0 : index
    %4 = vector.load %arg4[%c0_5, %c0_6] : memref<1x32xf32, #tpu.memory_space<vmem>>, vector<1x32xf32>
    %cst = arith.constant dense<0.000000e+00> : vector<18xf32>
    %5 = vector.multi_reduction <add>, %2, %cst [1] : vector<18x32xf32> to vector<18xf32>
    %6 = vector.shape_cast %5 : vector<18xf32> to vector<18x1xf32>
    %cst_7 = arith.constant 3.200000e+01 : f32
    %7 = vector.broadcast %cst_7 : f32 to vector<18x1xf32>
    %8 = arith.divf %6, %7 : vector<18x1xf32>
    %9 = vector.broadcast %8 : vector<18x1xf32> to vector<18x32xf32>
    %10 = arith.subf %2, %9 : vector<18x32xf32>
    %11 = arith.mulf %10, %10 : vector<18x32xf32>
    %cst_8 = arith.constant dense<0.000000e+00> : vector<18xf32>
    %12 = vector.multi_reduction <add>, %11, %cst_8 [1] : vector<18x32xf32> to vector<18xf32>
    %13 = vector.shape_cast %12 : vector<18xf32> to vector<18x1xf32>
    %cst_9 = arith.constant 3.200000e+01 : f32
    %14 = vector.broadcast %cst_9 : f32 to vector<18x1xf32>
    %15 = arith.divf %13, %14 : vector<18x1xf32>
    %cst_10 = arith.constant 9.99999997E-7 : f32
    %16 = vector.broadcast %cst_10 : f32 to vector<18x1xf32>
    %17 = arith.addf %15, %16 : vector<18x1xf32>
    %18 = math.rsqrt %17 : vector<18x1xf32>
    %19 = vector.broadcast %18 : vector<18x1xf32> to vector<18x32xf32>
    %20 = arith.mulf %10, %19 : vector<18x32xf32>
    %21 = vector.broadcast %3 : vector<1x32xf32> to vector<18x32xf32>
    %22 = arith.mulf %20, %21 : vector<18x32xf32>
    %23 = vector.broadcast %4 : vector<1x32xf32> to vector<18x32xf32>
    %24 = arith.addf %22, %23 : vector<18x32xf32>
    %25 = arith.truncf %24 : vector<18x32xf32> to vector<18x32xbf16>
    %c0_11 = arith.constant 0 : index
    %c0_12 = arith.constant 0 : index
    %26 = vector.load %arg5[%c0_11, %c0_12] : memref<32x128xbf16, #tpu.memory_space<vmem>>, vector<32x128xbf16>
    %cst_13 = arith.constant dense<0.000000e+00> : vector<18x128xf32>
    %27 = tpu.matmul %25, %26, %cst_13 {dimension_numbers = #tpu.dot_dimension_numbers<[1], [0], [0], [1], [0, 0, 1, 1], [], []>} : vector<18x32xbf16>, vector<32x128xbf16>, vector<18x128xf32> -> vector<18x128xf32>
    %c0_14 = arith.constant 0 : index
    %c0_15 = arith.constant 0 : index
    %28 = vector.load %arg6[%c0_14, %c0_15] : memref<1x128xf32, #tpu.memory_space<vmem>>, vector<1x128xf32>
    %29 = vector.broadcast %28 : vector<1x128xf32> to vector<18x128xf32>
    %30 = arith.addf %27, %29 : vector<18x128xf32>
    %cst_16 = arith.constant 5.000000e-01 : f32
    %31 = vector.broadcast %cst_16 : f32 to vector<18x128xf32>
    %32 = arith.mulf %31, %30 : vector<18x128xf32>
    %cst_17 = arith.constant 4.471500e-02 : f32
    %33 = vector.broadcast %cst_17 : f32 to vector<18x128xf32>
    %34 = arith.mulf %33, %30 : vector<18x128xf32>
    %35 = arith.mulf %34, %30 : vector<18x128xf32>
    %36 = arith.mulf %35, %30 : vector<18x128xf32>
    %37 = arith.addf %30, %36 : vector<18x128xf32>
    %cst_18 = arith.constant 0.797884583 : f32
    %38 = vector.broadcast %cst_18 : f32 to vector<18x128xf32>
    %39 = arith.mulf %38, %37 : vector<18x128xf32>
    %40 = math.tanh %39 : vector<18x128xf32>
    %cst_19 = arith.constant 1.000000e+00 : f32
    %41 = vector.broadcast %cst_19 : f32 to vector<18x128xf32>
    %42 = arith.addf %41, %40 : vector<18x128xf32>
    %43 = arith.mulf %32, %42 : vector<18x128xf32>
    %44 = arith.truncf %43 : vector<18x128xf32> to vector<18x128xbf16>
    %c0_20 = arith.constant 0 : index
    %c0_21 = arith.constant 0 : index
    %45 = vector.load %arg7[%c0_20, %c0_21] : memref<128x32xbf16, #tpu.memory_space<vmem>>, vector<128x32xbf16>
    %cst_22 = arith.constant dense<0.000000e+00> : vector<18x32xf32>
    %46 = tpu.matmul %44, %45, %cst_22 {dimension_numbers = #tpu.dot_dimension_numbers<[1], [0], [0], [1], [0, 0, 1, 1], [], []>} : vector<18x128xbf16>, vector<128x32xbf16>, vector<18x32xf32> -> vector<18x32xf32>
    %c0_23 = arith.constant 0 : index
    %c0_24 = arith.constant 0 : index
    %47 = vector.load %arg8[%c0_23, %c0_24] : memref<1x32xf32, #tpu.memory_space<vmem>>, vector<1x32xf32>
    %48 = vector.broadcast %47 : vector<1x32xf32> to vector<18x32xf32>
    %49 = arith.addf %46, %48 : vector<18x32xf32>
    %50 = arith.addf %2, %49 : vector<18x32xf32>
    %c0_25 = arith.constant 0 : index
    %c0_26 = arith.constant 0 : index
    %51 = vector.load %arg9[%c0_25, %c0_26] : memref<18x32xf32, #tpu.memory_space<vmem>>, vector<18x32xf32>
    tpu.vector_store %arg9[%c0_25, %c0_26], %50 {strides = array<i32>} : memref<18x32xf32, #tpu.memory_space<vmem>>, vector<18x32xf32>,
    return
  }
  func.func @transform_0(%arg0: i32) -> (i32, i32) {
    %c0_i32 = arith.constant 0 : i32
    %c0_i32_0 = arith.constant 0 : i32
    return %arg0, %c0_i32 : i32, i32
  }
  func.func @transform_1(%arg0: i32) -> (i32, i32) {
    %c0_i32 = arith.constant 0 : i32
    %c0_i32_0 = arith.constant 0 : i32
    return %arg0, %c0_i32 : i32, i32
  }
  func.func @transform_2(%arg0: i32) -> (i32, i32) {
    %c0_i32 = arith.constant 0 : i32
    %c0_i32_0 = arith.constant 0 : i32
    %c0_i32_1 = arith.constant 0 : i32
    return %c0_i32, %c0_i32_0 : i32, i32
  }
  func.func @transform_3(%arg0: i32) -> (i32, i32) {
    %c0_i32 = arith.constant 0 : i32
    %c0_i32_0 = arith.constant 0 : i32
    %c0_i32_1 = arith.constant 0 : i32
    return %c0_i32, %c0_i32_0 : i32, i32
  }
  func.func @transform_4(%arg0: i32) -> (i32, i32) {
    %c0_i32 = arith.constant 0 : i32
    %c0_i32_0 = arith.constant 0 : i32
    %c0_i32_1 = arith.constant 0 : i32
    return %c0_i32, %c0_i32_0 : i32, i32
  }
  func.func @transform_5(%arg0: i32) -> (i32, i32) {
    %c0_i32 = arith.constant 0 : i32
    %c0_i32_0 = arith.constant 0 : i32
    %c0_i32_1 = arith.constant 0 : i32
    return %c0_i32, %c0_i32_0 : i32, i32
  }
  func.func @transform_6(%arg0: i32) -> (i32, i32) {
    %c0_i32 = arith.constant 0 : i32
    %c0_i32_0 = arith.constant 0 : i32
    %c0_i32_1 = arith.constant 0 : i32
    return %c0_i32, %c0_i32_0 : i32, i32
  }
  func.func @transform_7(%arg0: i32) -> (i32, i32) {
    %c0_i32 = arith.constant 0 : i32
    %c0_i32_0 = arith.constant 0 : i32
    %c0_i32_1 = arith.constant 0 : i32
    return %c0_i32, %c0_i32_0 : i32, i32
  }
  func.func @transform_8(%arg0: i32) -> (i32, i32) {
    %c0_i32 = arith.constant 0 : i32
    %c0_i32_0 = arith.constant 0 : i32
    return %arg0, %c0_i32 : i32, i32
  }
}

module attributes {stable_mosaic.version = 11 : i64} {
  func.func @_layernorm_kernel(%arg0: i32, %arg1: memref<2x32xf32, #tpu.memory_space<vmem>>, %arg2: memref<1x32xf32, #tpu.memory_space<vmem>>, %arg3: memref<1x32xf32, #tpu.memory_space<vmem>>, %arg4: memref<2x32xf32, #tpu.memory_space<vmem>>) attributes {dimension_semantics = [#tpu.dimension_semantics<parallel>], iteration_bounds = array<i64: 1>, scalar_prefetch = 0 : i64, scratch_operands = 0 : i64, tpu.core_type = #tpu.core_type<tc>, window_params = [{transform_indices = @transform_0, window_bounds = array<i64: 2, 32>}, {pipeline_mode = #tpu.pipeline_mode<synchronous>, transform_indices = @transform_1, window_bounds = array<i64: 1, 32>}, {pipeline_mode = #tpu.pipeline_mode<synchronous>, transform_indices = @transform_2, window_bounds = array<i64: 1, 32>}, {transform_indices = @transform_3, window_bounds = array<i64: 2, 32>}]} {
    %c0 = arith.constant 0 : index
    %c0_0 = arith.constant 0 : index
    %0 = vector.load %arg1[%c0, %c0_0] : memref<2x32xf32, #tpu.memory_space<vmem>>, vector<2x32xf32>
    %c0_1 = arith.constant 0 : index
    %c0_2 = arith.constant 0 : index
    %1 = vector.load %arg2[%c0_1, %c0_2] : memref<1x32xf32, #tpu.memory_space<vmem>>, vector<1x32xf32>
    %c0_3 = arith.constant 0 : index
    %c0_4 = arith.constant 0 : index
    %2 = vector.load %arg3[%c0_3, %c0_4] : memref<1x32xf32, #tpu.memory_space<vmem>>, vector<1x32xf32>
    %cst = arith.constant dense<0.000000e+00> : vector<2xf32>
    %3 = vector.multi_reduction <add>, %0, %cst [1] : vector<2x32xf32> to vector<2xf32>
    %4 = vector.shape_cast %3 : vector<2xf32> to vector<2x1xf32>
    %cst_5 = arith.constant 3.200000e+01 : f32
    %5 = vector.broadcast %cst_5 : f32 to vector<2x1xf32>
    %6 = arith.divf %4, %5 : vector<2x1xf32>
    %7 = vector.broadcast %6 : vector<2x1xf32> to vector<2x32xf32>
    %8 = arith.subf %0, %7 : vector<2x32xf32>
    %9 = arith.mulf %8, %8 : vector<2x32xf32>
    %cst_6 = arith.constant dense<0.000000e+00> : vector<2xf32>
    %10 = vector.multi_reduction <add>, %9, %cst_6 [1] : vector<2x32xf32> to vector<2xf32>
    %11 = vector.shape_cast %10 : vector<2xf32> to vector<2x1xf32>
    %cst_7 = arith.constant 3.200000e+01 : f32
    %12 = vector.broadcast %cst_7 : f32 to vector<2x1xf32>
    %13 = arith.divf %11, %12 : vector<2x1xf32>
    %cst_8 = arith.constant 9.99999997E-7 : f32
    %14 = vector.broadcast %cst_8 : f32 to vector<2x1xf32>
    %15 = arith.addf %13, %14 : vector<2x1xf32>
    %16 = math.rsqrt %15 : vector<2x1xf32>
    %17 = vector.broadcast %16 : vector<2x1xf32> to vector<2x32xf32>
    %18 = arith.mulf %8, %17 : vector<2x32xf32>
    %19 = vector.broadcast %1 : vector<1x32xf32> to vector<2x32xf32>
    %20 = arith.mulf %18, %19 : vector<2x32xf32>
    %21 = vector.broadcast %2 : vector<1x32xf32> to vector<2x32xf32>
    %22 = arith.addf %20, %21 : vector<2x32xf32>
    %c0_9 = arith.constant 0 : index
    %c0_10 = arith.constant 0 : index
    %23 = vector.load %arg4[%c0_9, %c0_10] : memref<2x32xf32, #tpu.memory_space<vmem>>, vector<2x32xf32>
    tpu.vector_store %arg4[%c0_9, %c0_10], %22 {strides = array<i32>} : memref<2x32xf32, #tpu.memory_space<vmem>>, vector<2x32xf32>,
    return
  }
  func.func @transform_0(%arg0: i32) -> (i32, i32) {
    %c0_i32 = arith.constant 0 : i32
    %c0_i32_0 = arith.constant 0 : i32
    return %arg0, %c0_i32 : i32, i32
  }
  func.func @transform_1(%arg0: i32) -> (i32, i32) {
    %c0_i32 = arith.constant 0 : i32
    %c0_i32_0 = arith.constant 0 : i32
    %c0_i32_1 = arith.constant 0 : i32
    return %c0_i32, %c0_i32_0 : i32, i32
  }
  func.func @transform_2(%arg0: i32) -> (i32, i32) {
    %c0_i32 = arith.constant 0 : i32
    %c0_i32_0 = arith.constant 0 : i32
    %c0_i32_1 = arith.constant 0 : i32
    return %c0_i32, %c0_i32_0 : i32, i32
  }
  func.func @transform_3(%arg0: i32) -> (i32, i32) {
    %c0_i32 = arith.constant 0 : i32
    %c0_i32_0 = arith.constant 0 : i32
    return %arg0, %c0_i32 : i32, i32
  }
}

</mosaic_0001>

<bundles_post_ra>
// kernel: timesformer_forward.16
= control target key start
LH: loop header
LB: loop body
LE: loop exit
PB: predicated region body
PF: predicated region fallthrough
CT: control target
= control target key end

     0   :  { %vm121_vm0 = vcmask 523264   ;;  %vm153_vm1 = vcmask 261120   ;;  %s299_s1 = inlined_call_operand.vmem [shape: bf16[192,32], index: 1, kind: input, shape index: {}]   ;;  %s300_s0 = inlined_call_operand.vmem [shape: f32[16,192], index: 0, kind: input, shape index: {}]   ;;  %s301_s2 = inlined_call_operand.vmem [shape: f32[1,32], index: 2, kind: input, shape index: {}]   ;;  %s302_s3 = inlined_call_operand.vmem [shape: f32[16,32], index: 3, kind: output, shape index: {}]  }
   0x1   :  { %v216_v0 = vld [vmem:[%s299_s1 + $0x38] sm:$0xff]  ;;  %v215_v2 = vld [vmem:[%s299_s1 + $0x30] sm:$0xff]  ;;  %v214_v4 = vld [vmem:[%s299_s1 + $0x28] sm:$0xff] }
   0x2   :  { %v220_v1 = vld [vmem:[%s299_s1 + $0x58] sm:$0xff]  ;;  %125 = vmatpush.bf16.msra.mxu0 %v216_v0  ;;  %v219_v3 = vld [vmem:[%s299_s1 + $0x50] sm:$0xff]  ;;  %v218_v5 = vld [vmem:[%s299_s1 + $0x48] sm:$0xff] }
   0x3   :  { %143 = vmatpush.bf16.msra.mxu1 %v220_v1  ;;  %v213_v6 = vld [vmem:[%s299_s1 + $0x20] sm:$0xff]  ;;  %v16_v8 = vld [vmem:[%s300_s0 + $0x8] sm:$0xff]  ;;  %v18_v9 = vld [vmem:[%s300_s0 + $0x18] sm:$0xff] }
   0x4   :  { %v217_v7 = vld [vmem:[%s299_s1 + $0x40] sm:$0xff]  ;;  %v212_v10 = vld [vmem:[%s299_s1 + $0x18] sm:$0xff]  ;;  %v20_v11 = vpack.c.bf16 %v18_v9, %v16_v8  ;;  %v211_v12 = vld [vmem:[%s299_s1 + $0x10] sm:$0xff] }
   0x5   :  { %v210_v13 = vld [vmem:[%s299_s1 + $0x8] sm:$0xff]  ;;  %v209_v14 = vld [vmem:[%s299_s1] sm:$0xff]  ;;  %v17_v16 = vld [vmem:[%s300_s0 + $0x10] sm:$0xff] }
   0x6   :  { %126 = vmatpush.bf16.msra.mxu0 %v215_v2  ;;  %v15_v15 = vld [vmem:[%s300_s0] sm:$0xff] }
   0x7   :  { %144 = vmatpush.bf16.msra.mxu1 %v219_v3  ;;  %v19_v17 = vpack.c.bf16 %v17_v16, %v15_v15  ;;  %v221_v18 = vld [vmem:[%s301_s2] ss:$0 sm:$0xff] }
   0xa   :  { %127 = vmatpush.bf16.msra.mxu0 %v214_v4 }
   0xb   :  { %145 = vmatpush.bf16.msra.mxu1 %v218_v5 }
   0xe   :  { %128 = vmatpush.bf16.msra.mxu0 %v213_v6 }
   0xf   :  { %146 = vmatpush.bf16.msra.mxu1 %v217_v7 }
  0x12   :  { %129 = vmatpush.bf16.msra.mxu0 %v212_v10  ;;  %208 = vmatmul.msk.bf16.vlgmr.msra.gmra.mxu1 %vm121_vm0, %v20_v11 }
  0x16   :  { %130 = vmatpush.bf16.msra.mxu0 %v211_v12 }
  0x1a   :  { %131 = vmatpush.bf16.msra.mxu0 %v210_v13 }
  0x1e   :  { %132 = vmatpush.bf16.msra.mxu0 %v209_v14 }
  0x21   :  { %133 = vmatmul.bf16.vlgmr.msra.gmra.mxu0 %v19_v17 }
  0x8f   :  { %v148_v19 = vpop.f32.mrf.mxu1 }
  0x97   :  { %v150_v25 = vpop.f32.mrf.mxu1 }
  0x9e   :  { %v134_v20 = vpop.f32.mrf.mxu0 }
  0x9f   :  { %v135_v21 = vadd.f32 %v221_v18, %v134_v20 }
  0xa1   :  { %v149_v22 = vadd.f32 %v148_v19, %v135_v21 }
  0xa3   :  { %154 = vst.msk [vmem:[%s302_s3] sm:$0xff] %vm153_vm1, %v149_v22 }
  0xa6   :  { %v136_v23 = vpop.f32.mrf.mxu0 }
  0xa7   :  { %v137_v24 = vadd.f32 %v221_v18, %v136_v23 }
  0xa9   :  { %v151_v26 = vadd.f32 %v150_v25, %v137_v24 }
  0xab   :  { %155 = vst.msk [vmem:[%s302_s3 + $0x8] sm:$0xff] %vm153_vm1, %v151_v26 }

// kernel: timesformer_forward.19
= control target key start
LH: loop header
LB: loop body
LE: loop exit
PB: predicated region body
PF: predicated region fallthrough
CT: control target
= control target key end

     0   :  { %vm51_vm0 = vcmask 261120   ;;  %s218_s1 = inlined_call_operand.vmem [shape: bf16[32,32], index: 1, kind: input, shape index: {}]   ;;  %s219_s2 = inlined_call_operand.vmem [shape: f32[1,32], index: 2, kind: input, shape index: {}]   ;;  %s220_s0 = inlined_call_operand.vmem [shape: bf16[16,32], index: 0, kind: input, shape index: {}]   ;;  %s221_s4 = inlined_call_operand.vmem [shape: f32[1,32], index: 4, kind: input, shape index: {}]   ;;  %s222_s3 = inlined_call_operand.vmem [shape: bf16[32,32], index: 3, kind: input, shape index: {}]   ;;  %s223_s5 = inlined_call_operand.vmem [shape: f32[16,32], index: 5, kind: input, shape index: {}]   ;;  %s224_s6 = inlined_call_operand.vmem [shape: f32[16,32], index: 6, kind: output, shape index: {}]  }
   0x1   :  { %v141_v0 = vld [vmem:[%s218_s1 + $0x8] sm:$0xff]  ;;  %v140_v1 = vld [vmem:[%s218_s1] sm:$0xff] }
   0x2   :  { %61 = vmatpush.bf16.msra.mxu0 %v141_v0  ;;  %v139_v2 = vld [vmem:[%s220_s0] sm:$0xff]  ;;  %v143_v3 = vld [vmem:[%s222_s3 + $0x8] sm:$0xff] }
   0x3   :  { %99 = vmatpush.bf16.msra.mxu1 %v143_v3  ;;  %v142_v4 = vld [vmem:[%s222_s3] sm:$0xff]  ;;  %v108_v17 = vld [vmem:[%s223_s5 + $0x8] sm:$0xff] }
   0x4   :  { %v144_v6 = vld [vmem:[%s219_s2] ss:$0 sm:$0xff] }
   0x5   :  { %v145_v11 = vld [vmem:[%s221_s4] ss:$0 sm:$0xff] }
   0x6   :  { %62 = vmatpush.bf16.msra.mxu0 %v140_v1  ;;  %v107_v13 = vld [vmem:[%s223_s5] sm:$0xff] }
   0x7   :  { %100 = vmatpush.bf16.msra.mxu1 %v142_v4 }
   0x9   :  { %129 = vmatmul.msk.bf16.vlgmr.msra.gmra.mxu0 %vm51_vm0, %v139_v2 }
  0x86   :  { %v64_v5 = vpop.f32.mrf.mxu0 }
  0x87   :  { %v65_v8 = vadd.f32 %v144_v6, %v64_v5 }
  0x8e   :  { %v66_v7 = vpop.f32.mrf.mxu0 }
  0x8f   :  { %v67_v9 = vadd.f32 %v144_v6, %v66_v7 }
  0x91   :  { %v69_v10 = vpack.c.bf16 %v67_v9, %v65_v8 }
  0x93   :  { %138 = vmatmul.msk.bf16.vlgmr.msra.gmra.mxu1 %vm51_vm0, %v69_v10 }
 0x110   :  { %v102_v12 = vpop.f32.mrf.mxu1 }
 0x111   :  { %v103_v14 = vadd.f32 %v145_v11, %v102_v12 }
 0x113   :  { %v109_v15 = vadd.f32 %v107_v13, %v103_v14 }
 0x115   :  { %111 = vst.msk [vmem:[%s224_s6] sm:$0xff] %vm51_vm0, %v109_v15 }
 0x118   :  { %v104_v16 = vpop.f32.mrf.mxu1 }
 0x119   :  { %v105_v18 = vadd.f32 %v145_v11, %v104_v16 }
 0x11b   :  { %v110_v19 = vadd.f32 %v108_v17, %v105_v18 }
 0x11d   :  { %112 = vst.msk [vmem:[%s224_s6 + $0x8] sm:$0xff] %vm51_vm0, %v110_v19 }

// kernel: timesformer_forward.17
= control target key start
LH: loop header
LB: loop body
LE: loop exit
PB: predicated region body
PF: predicated region fallthrough
CT: control target
= control target key end

     0   :  { %vm25_vm0 = vcmask 261120   ;;  %v155_v4 = vmov 32.0   ;;  %vm127_vm8 = vcmask 781312   ;;  %s218_s0 = inlined_call_operand.vmem [shape: f32[16,32], index: 0, kind: input, shape index: {}]   ;;  %s219_s1 = inlined_call_operand.vmem [shape: f32[1,32], index: 1, kind: input, shape index: {}]   ;;  %s220_s2 = inlined_call_operand.vmem [shape: f32[1,32], index: 2, kind: input, shape index: {}]   ;;  %s221_s4 = inlined_call_operand.vmem [shape: f32[1,96], index: 4, kind: input, shape index: {}]   ;;  %s222_s3 = inlined_call_operand.vmem [shape: bf16[32,96], index: 3, kind: input, shape index: {}]   ;;  %s223_s5 = inlined_call_operand.vmem [shape: bf16[16,96], index: 5, kind: output, shape index: {}]  }
   0x1   :  { %v21_v0 = vld [vmem:[%s218_s0] sm:$0xff]  ;;  %v22_v2 = vld [vmem:[%s218_s0 + $0x8] sm:$0xff]  ;;  %149 = vrcp.f32 %v155_v4 }
   0x2   :  { %v26_v1 = vsel %vm25_vm0, %v21_v0, 0.0  ;;  %v29_v3 = vsel %vm25_vm0, %v22_v2, 0.0  ;;  %v144_v21 = vld [vmem:[%s222_s3 + $0x8] sm:$0xff]  ;;  %v143_v23 = vld [vmem:[%s222_s3] sm:$0xff] }
   0x3   :  { %27 = vadd.xlane.f32.xlu0 %v26_v1  ;;  %117 = vmatpush.bf16.msra.mxu0 %v144_v21  ;;  %v146_v42 = vld [vmem:[%s219_s1] ss:$0 sm:$0xff] }
   0x4   :  { %v147_v47 = vld [vmem:[%s220_s2] ss:$0 sm:$0xff] }
   0x5   :  { %v148_v52 = vld [vmem:[%s221_s4] ss:$0 sm:$0xff] }
   0x7   :  { %v150_v5 = vpop.eup %149  ;;  %118 = vmatpush.bf16.msra.mxu0 %v143_v23 }
   0x8   :  { %v33_v6 = vmul.f32 32.0, %v150_v5  ;;  %vm37_vm1 = vweird.f32 %v150_v5 }
   0xa   :  { %v34_v7 = vsub.f32 1.0, %v33_v6 }
   0xb   :  { %30 = vadd.xlane.f32.xlu0 %v29_v3 }
   0xc   :  { %v35_v8 = vmul.f32 %v150_v5, %v34_v7 }
   0xe   :  { %v36_v9 = vadd.f32 %v150_v5, %v35_v8 }
  0x10   :  { %v38_v10 = vsel %vm37_vm1, %v150_v5, %v36_v9 }
  0x76   :  { %v28_v11 = vpop.xlane.xlu0 %27 }
  0x77   :  { %v39_v12 = vmul.f32 %v38_v10, %v28_v11 }
  0x79   :  { %v41_v13 = vsub.f32 %v21_v0, %v39_v12 }
  0x7b   :  { %v43_v14 = vmul.f32 %v41_v13, %v41_v13 }
  0x7d   :  { %v45_v15 = vsel %vm25_vm0, %v43_v14, 0.0 }
  0x7e   :  { %46 = vadd.xlane.f32.xlu1 %v45_v15  ;;  %v31_v16 = vpop.xlane.xlu0 %30 }
  0x7f   :  { %v40_v17 = vmul.f32 %v38_v10, %v31_v16 }
  0x81   :  { %v42_v18 = vsub.f32 %v22_v2, %v40_v17 }
  0x83   :  { %v44_v19 = vmul.f32 %v42_v18, %v42_v18 }
  0x85   :  { %v48_v20 = vsel %vm25_vm0, %v44_v19, 0.0 }
  0x86   :  { %49 = vadd.xlane.f32.xlu1 %v48_v20 }
  0xf1   :  { %v47_v22 = vpop.xlane.xlu1 %46 }
  0xf2   :  { %v51_v24 = vmul.f32 %v47_v22, %v38_v10 }
  0xf4   :  { %v53_v25 = vadd.f32 1e-06, %v51_v24 }
  0xf6   :  { %151 = vrsqrt.f32 %v53_v25  ;;  %vm61_vm3 = vweird.f32 %v53_v25 }
  0xf9   :  { %v50_v26 = vpop.xlane.xlu1 %49 }
  0xfa   :  { %v52_v27 = vmul.f32 %v50_v26, %v38_v10 }
  0xfc   :  { %v152_v28 = vpop.eup %151  ;;  %v54_v29 = vadd.f32 1e-06, %v52_v27 }
  0xfd   :  { %v56_v30 = vmul.f32 %v152_v28, %v53_v25  ;;  %vm62_vm2 = vweird.f32 %v152_v28 }
  0xfe   :  { %153 = vrsqrt.f32 %v54_v29  ;;  %vm63_vm4 = vmor %vm61_vm3, %vm62_vm2  ;;  %vm71_vm6 = vweird.f32 %v54_v29 }
  0xff   :  { %v57_v31 = vmul.f32 %v152_v28, %v56_v30 }
 0x101   :  { %v58_v32 = vmul.f32 0.5, %v57_v31 }
 0x103   :  { %v59_v33 = vsub.f32 1.5, %v58_v32 }
 0x104   :  { %v154_v34 = vpop.eup %153 }
 0x105   :  { %v60_v35 = vmul.f32 %v152_v28, %v59_v33  ;;  %v66_v36 = vmul.f32 %v154_v34, %v54_v29  ;;  %vm72_vm5 = vweird.f32 %v154_v34 }
 0x106   :  { %vm73_vm7 = vmor %vm71_vm6, %vm72_vm5 }
 0x107   :  { %v67_v37 = vmul.f32 %v154_v34, %v66_v36  ;;  %v64_v38 = vsel %vm63_vm4, %v152_v28, %v60_v35 }
 0x108   :  { %v75_v41 = vmul.f32 %v64_v38, %v41_v13 }
 0x109   :  { %v68_v39 = vmul.f32 0.5, %v67_v37 }
 0x10a   :  { %v80_v46 = vmul.f32 %v146_v42, %v75_v41 }
 0x10b   :  { %v69_v40 = vsub.f32 1.5, %v68_v39 }
 0x10c   :  { %v85_v49 = vadd.f32 %v147_v47, %v80_v46 }
 0x10d   :  { %v70_v43 = vmul.f32 %v154_v34, %v69_v40 }
 0x10f   :  { %v74_v44 = vsel %vm73_vm7, %v154_v34, %v70_v43 }
 0x110   :  { %v76_v45 = vmul.f32 %v74_v44, %v42_v18 }
 0x112   :  { %v81_v48 = vmul.f32 %v146_v42, %v76_v45 }
 0x114   :  { %v86_v50 = vadd.f32 %v147_v47, %v81_v48 }
 0x116   :  { %v87_v51 = vpack.c.bf16 %v86_v50, %v85_v49 }
 0x118   :  { %142 = vmatmul.msk.bf16.vlgmr.msra.gmra.mxu0 %vm25_vm0, %v87_v51 }
 0x195   :  { %v120_v53 = vpop.f32.mrf.mxu0 }
 0x196   :  { %v121_v54 = vadd.f32 %v148_v52, %v120_v53 }
 0x198   :  { %v125_v55 = vpack.c.bf16 %v121_v54, %v121_v54 }
 0x19a   :  { %128 = vst.msk [vmem:[%s223_s5] sm:$0xf] %vm127_vm8, %v125_v55 }
 0x19d   :  { %v122_v56 = vpop.f32.mrf.mxu0 }
 0x19e   :  { %v123_v57 = vadd.f32 %v148_v52, %v122_v56 }
 0x1a0   :  { %v126_v58 = vpack.c.bf16 %v123_v57, %v123_v57 }
 0x1a2   :  { %129 = vst.msk [vmem:[%s223_s5 + $0x4] sm:$0xf] %vm127_vm8, %v126_v58 }

// kernel: timesformer_forward.20
= control target key start
LH: loop header
LB: loop body
LE: loop exit
PB: predicated region body
PF: predicated region fallthrough
CT: control target
= control target key end

     0   :  { %vm26_vm0 = vcmask 261120   ;;  %vm33_vm1 = vcmask 257024   ;;  %v197_v6 = vmov 32.0   ;;  %vm162_vm12 = vcmask 781312   ;;  %s274_s0 = inlined_call_operand.vmem [shape: f32[20,32], index: 0, kind: input, shape index: {}]   ;;  %s275_s1 = inlined_call_operand.vmem [shape: f32[1,32], index: 1, kind: input, shape index: {}]   ;;  %s276_s2 = inlined_call_operand.vmem [shape: f32[1,32], index: 2, kind: input, shape index: {}]   ;;  %s277_s4 = inlined_call_operand.vmem [shape: f32[1,96], index: 4, kind: input, shape index: {}]   ;;  %s278_s3 = inlined_call_operand.vmem [shape: bf16[32,96], index: 3, kind: input, shape index: {}]   ;;  %s279_s5 = inlined_call_operand.vmem [shape: bf16[20,96], index: 5, kind: output, shape index: {}]  }
   0x1   :  { %v21_v0 = vld [vmem:[%s274_s0] sm:$0xff]  ;;  %v23_v1 = vld [vmem:[%s274_s0 + $0x10] sm:$0xf]  ;;  %v22_v4 = vld [vmem:[%s274_s0 + $0x8] sm:$0xff]  ;;  %189 = vrcp.f32 %v197_v6  ;;  %vm165_vm13 = vcmask 779264  }
   0x2   :  { %v27_v2 = vsel %vm26_vm0, %v21_v0, 0.0  ;;  %v34_v3 = vsel %vm33_vm1, %v23_v1, 0.0  ;;  %v30_v5 = vsel %vm26_vm0, %v22_v4, 0.0  ;;  %v182_v28 = vld [vmem:[%s278_s3 + $0x8] sm:$0xff]  ;;  %v181_v31 = vld [vmem:[%s278_s3] sm:$0xff] }
   0x3   :  { %28 = vadd.xlane.f32.xlu0 %v27_v2  ;;  %35 = vadd.xlane.f32.xlu1 %v34_v3  ;;  %v186_v53 = vld [vmem:[%s275_s1] ss:$0 sm:$0xff] }
   0x4   :  { %147 = vmatpush.bf16.msra.mxu0 %v182_v28  ;;  %183 = vmatpush.bf16.msra.mxu1 %v182_v28  ;;  %v187_v60 = vld [vmem:[%s276_s2] ss:$0 sm:$0xff] }
   0x7   :  { %v190_v7 = vpop.eup %189 }
   0x8   :  { %v38_v8 = vmul.f32 32.0, %v190_v7  ;;  %vm42_vm2 = vweird.f32 %v190_v7  ;;  %148 = vmatpush.bf16.msra.mxu0 %v181_v31  ;;  %184 = vmatpush.bf16.msra.mxu1 %v181_v31 }
   0xa   :  { %v39_v9 = vsub.f32 1.0, %v38_v8 }
   0xb   :  { %31 = vadd.xlane.f32.xlu0 %v30_v5 }
   0xc   :  { %v40_v10 = vmul.f32 %v190_v7, %v39_v9  ;;  %v188_v9 = vld [vmem:[%s277_s4] ss:$0 sm:$0xff] }
   0xe   :  { %v41_v11 = vadd.f32 %v190_v7, %v40_v10 }
  0x10   :  { %v43_v12 = vsel %vm42_vm2, %v190_v7, %v41_v11 }
  0x76   :  { %v29_v13 = vpop.xlane.xlu0 %28  ;;  %v36_v17 = vpop.xlane.xlu1 %35 }
  0x77   :  { %v44_v14 = vmul.f32 %v43_v12, %v29_v13  ;;  %v46_v21 = vmul.f32 %v43_v12, %v36_v17 }
  0x79   :  { %v47_v15 = vsub.f32 %v21_v0, %v44_v14  ;;  %v241_v23 = vsub.f32 %v23_v1, %v46_v21 }
  0x7b   :  { %v50_v16 = vmul.f32 %v47_v15, %v47_v15  ;;  %v52_v26 = vmul.f32 %v241_v23, %v241_v23 }
  0x7d   :  { %v53_v18 = vsel %vm26_vm0, %v50_v16, 0.0  ;;  %v59_v27 = vsel %vm33_vm1, %v52_v26, 0.0 }
  0x7e   :  { %54 = vadd.xlane.f32.xlu1 %v53_v18  ;;  %v32_v19 = vpop.xlane.xlu0 %31 }
  0x7f   :  { %v45_v20 = vmul.f32 %v43_v12, %v32_v19 }
  0x81   :  { %v48_v22 = vsub.f32 %v22_v4, %v45_v20 }
  0x83   :  { %v51_v24 = vmul.f32 %v48_v22, %v48_v22 }
  0x85   :  { %v56_v25 = vsel %vm26_vm0, %v51_v24, 0.0 }
  0x86   :  { %57 = vadd.xlane.f32.xlu2 %v56_v25 }
  0x8e   :  { %60 = vadd.xlane.f32.xlu2 %v59_v27 }
  0xf1   :  { %v55_v29 = vpop.xlane.xlu1 %54 }
  0xf2   :  { %v62_v30 = vmul.f32 %v55_v29, %v43_v12 }
  0xf4   :  { %v65_v32 = vadd.f32 1e-06, %v62_v30 }
  0xf6   :  { %191 = vrsqrt.f32 %v65_v32  ;;  %vm74_vm4 = vweird.f32 %v65_v32 }
  0xf9   :  { %v58_v33 = vpop.xlane.xlu2 %57 }
  0xfa   :  { %v63_v34 = vmul.f32 %v58_v33, %v43_v12 }
  0xfc   :  { %v192_v35 = vpop.eup %191  ;;  %v66_v36 = vadd.f32 1e-06, %v63_v34 }
  0xfd   :  { %v69_v37 = vmul.f32 %v192_v35, %v65_v32  ;;  %vm75_vm3 = vweird.f32 %v192_v35 }
  0xfe   :  { %193 = vrsqrt.f32 %v66_v36  ;;  %vm76_vm5 = vmor %vm74_vm4, %vm75_vm3  ;;  %vm84_vm7 = vweird.f32 %v66_v36 }
  0xff   :  { %v70_v38 = vmul.f32 %v192_v35, %v69_v37 }
 0x101   :  { %v71_v39 = vmul.f32 0.5, %v70_v38  ;;  %v61_v40 = vpop.xlane.xlu2 %60 }
 0x102   :  { %v64_v41 = vmul.f32 %v61_v40, %v43_v12 }
 0x103   :  { %v72_v42 = vsub.f32 1.5, %v71_v39 }
 0x104   :  { %v194_v43 = vpop.eup %193  ;;  %v67_v44 = vadd.f32 1e-06, %v64_v41 }
 0x105   :  { %v73_v45 = vmul.f32 %v192_v35, %v72_v42  ;;  %v79_v46 = vmul.f32 %v194_v43, %v66_v36  ;;  %vm85_vm6 = vweird.f32 %v194_v43 }
 0x106   :  { %195 = vrsqrt.f32 %v67_v44  ;;  %vm86_vm8 = vmor %vm84_vm7, %vm85_vm6  ;;  %vm94_vm10 = vweird.f32 %v67_v44 }
 0x107   :  { %v80_v47 = vmul.f32 %v194_v43, %v79_v46  ;;  %v77_v48 = vsel %vm76_vm5, %v192_v35, %v73_v45 }
 0x108   :  { %v98_v52 = vmul.f32 %v77_v48, %v47_v15 }
 0x109   :  { %v81_v49 = vmul.f32 0.5, %v80_v47 }
 0x10a   :  { %v104_v59 = vmul.f32 %v186_v53, %v98_v52 }
 0x10b   :  { %v82_v50 = vsub.f32 1.5, %v81_v49 }
 0x10c   :  { %v196_v51 = vpop.eup %195  ;;  %v110_v0 = vadd.f32 %v187_v60, %v104_v59 }
 0x10d   :  { %v83_v54 = vmul.f32 %v194_v43, %v82_v50  ;;  %v89_v55 = vmul.f32 %v196_v51, %v67_v44  ;;  %vm95_vm9 = vweird.f32 %v196_v51 }
 0x10e   :  { %vm96_vm11 = vmor %vm94_vm10, %vm95_vm9 }
 0x10f   :  { %v87_v56 = vsel %vm86_vm8, %v194_v43, %v83_v54  ;;  %v90_v57 = vmul.f32 %v196_v51, %v89_v55 }
 0x110   :  { %v99_v58 = vmul.f32 %v87_v56, %v48_v22 }
 0x111   :  { %v91_v61 = vmul.f32 0.5, %v90_v57 }
 0x112   :  { %v105_v62 = vmul.f32 %v186_v53, %v99_v58 }
 0x113   :  { %v92_v63 = vsub.f32 1.5, %v91_v61 }
 0x114   :  { %v111_v1 = vadd.f32 %v187_v60, %v105_v62 }
 0x115   :  { %v93_v2 = vmul.f32 %v196_v51, %v92_v63 }
 0x116   :  { %v113_v3 = vpack.c.bf16 %v111_v1, %v110_v0 }
 0x117   :  { %v97_v4 = vsel %vm96_vm11, %v196_v51, %v93_v2 }
 0x118   :  { %179 = vmatmul.msk.bf16.vlgmr.msra.gmra.mxu0 %vm26_vm0, %v113_v3  ;;  %v100_v5 = vmul.f32 %v97_v4, %v241_v23 }
 0x11a   :  { %v106_v6 = vmul.f32 %v186_v53, %v100_v5 }
 0x11c   :  { %v112_v7 = vadd.f32 %v187_v60, %v106_v6 }
 0x11e   :  { %v114_v8 = vpack.c.bf16 %v112_v7, %v112_v7 }
 0x120   :  { %180 = vmatmul.msk.bf16.vlgmr.msra.gmra.mxu1 %vm26_vm0, %v114_v8 }
 0x195   :  { %v150_v10 = vpop.f32.mrf.mxu0 }
 0x196   :  { %v151_v11 = vadd.f32 %v188_v9, %v150_v10 }
 0x198   :  { %v159_v12 = vpack.c.bf16 %v151_v11, %v151_v11 }
 0x19a   :  { %163 = vst.msk [vmem:[%s279_s5] sm:$0xf] %vm162_vm12, %v159_v12 }
 0x19d   :  { %v152_v13 = vpop.f32.mrf.mxu0  ;;  %v155_v14 = vpop.f32.mrf.mxu1 }
 0x19e   :  { %v153_v15 = vadd.f32 %v188_v9, %v152_v13  ;;  %v156_v16 = vadd.f32 %v188_v9, %v155_v14 }
 0x1a0   :  { %v160_v17 = vpack.c.bf16 %v153_v15, %v153_v15  ;;  %v161_v18 = vpack.c.bf16 %v156_v16, %v156_v16 }
 0x1a2   :  { %164 = vst.msk [vmem:[%s279_s5 + $0x4] sm:$0xf] %vm162_vm12, %v160_v17 }
 0x1a3   :  { %166 = vst.msk [vmem:[%s279_s5 + $0x8] sm:$0x3] %vm165_vm13, %v161_v18 }
 0x1a5   :  { %v157_v19 = vpop.f32.mrf.mxu1 }

// kernel: timesformer_forward.22
= control target key start
LH: loop header
LB: loop body
LE: loop exit
PB: predicated region body
PF: predicated region fallthrough
CT: control target
= control target key end

     0   :  { %vm46_vm0 = vcmask 261120   ;;  %vm73_vm1 = vcmask 257024   ;;  %s143_s1 = inlined_call_operand.vmem [shape: bf16[32,32], index: 1, kind: input, shape index: {}]   ;;  %s144_s0 = inlined_call_operand.vmem [shape: bf16[20,32], index: 0, kind: input, shape index: {}]   ;;  %s145_s2 = inlined_call_operand.vmem [shape: f32[1,32], index: 2, kind: input, shape index: {}]   ;;  %s146_s3 = inlined_call_operand.vmem [shape: f32[20,32], index: 3, kind: output, shape index: {}]  }
   0x1   :  { %v95_v0 = vld [vmem:[%s143_s1 + $0x8] sm:$0xff]  ;;  %v94_v2 = vld [vmem:[%s143_s1] sm:$0xff] }
   0x2   :  { %v17_v1 = vld [vmem:[%s144_s0 + $0x8] sm:$0x3]  ;;  %59 = vmatpush.bf16.msra.mxu0 %v95_v0  ;;  %96 = vmatpush.bf16.msra.mxu1 %v95_v0  ;;  %v93_v4 = vld [vmem:[%s144_s0] sm:$0xff] }
   0x3   :  { %v31_v3 = vunpack.c.l.b16 %v17_v1  ;;  %v98_v6 = vld [vmem:[%s145_s2] ss:$0 sm:$0xff] }
   0x5   :  { %v33_v5 = vpack.c.b16 %v31_v3, %v31_v3 }
   0x6   :  { %60 = vmatpush.bf16.msra.mxu0 %v94_v2  ;;  %97 = vmatpush.bf16.msra.mxu1 %v94_v2 }
   0x9   :  { %91 = vmatmul.msk.bf16.vlgmr.msra.gmra.mxu0 %vm46_vm0, %v93_v4  ;;  %92 = vmatmul.msk.bf16.vlgmr.msra.gmra.mxu1 %vm46_vm0, %v33_v5 }
  0x86   :  { %v62_v7 = vpop.f32.mrf.mxu0  ;;  %v67_v8 = vpop.f32.mrf.mxu1 }
  0x87   :  { %v63_v9 = vadd.f32 %v98_v6, %v62_v7  ;;  %v68_v10 = vadd.f32 %v98_v6, %v67_v8 }
  0x89   :  { %71 = vst.msk [vmem:[%s146_s3] sm:$0xff] %vm46_vm0, %v63_v9 }
  0x8a   :  { %74 = vst.msk [vmem:[%s146_s3 + $0x10] sm:$0xf] %vm73_vm1, %v68_v10 }
  0x8e   :  { %v64_v11 = vpop.f32.mrf.mxu0  ;;  %v69_v12 = vpop.f32.mrf.mxu1 }
  0x8f   :  { %v65_v13 = vadd.f32 %v98_v6, %v64_v11 }
  0x91   :  { %72 = vst.msk [vmem:[%s146_s3 + $0x8] sm:$0xff] %vm46_vm0, %v65_v13 }

// kernel: timesformer_forward.18
= control target key start
LH: loop header
LB: loop body
LE: loop exit
PB: predicated region body
PF: predicated region fallthrough
CT: control target
= control target key end

     0   :  { %s2470_s10 = smov 96   ;;  %s2471_s23 = smov 64   ;;  %vm23_vm0 = vcmask 64512   ;;  %vm210_vm1 = vcmask 9216   ;;  %vm316_vm2 = vcmask 1040384   ;;  %vm312_vm3 = vcmask 15360   ;;  %s3395_s0 = inlined_call_operand.vmem [shape: bf16[8,2,96], index: 0, kind: input, shape index: {}]   ;;  %s3396_s1 = inlined_call_operand.vmem [shape: bf16[8,2,32], index: 1, kind: output, shape index: {}]  }
   0x1   :  { %v2497_v0 = vld [vmem:[%s3395_s0] sm:$0x1]  ;;  %v2503_v1 = vld [vmem:[%s3395_s0 + $0x1] sm:$0x1]  ;;  %v2509_v3 = vld [vmem:[%s3395_s0 + $0x2] sm:$0x1] }
   0x2   :  { %18 = vst [vmem:[#allocation1] ss:$9 sm:$0xff] %v2497_v0  ;;  %v2515_v5 = vld [vmem:[%s3395_s0 + $0x3] sm:$0x1]  ;;  %v2521_v7 = vld [vmem:[%s3395_s0 + $0x4] sm:$0x1] }
   0x3   :  { %v2527_v9 = vld [vmem:[%s3395_s0 + $0x5] sm:$0x1]  ;;  %v2533_v11 = vld [vmem:[%s3395_s0 + $0x6] sm:$0x1]  ;;  %v2539_v13 = vld [vmem:[%s3395_s0 + $0x7] sm:$0x1] }
   0x4   :  { %s2472_s0 = smov 88   ;;  %s2473_s24 = smov 120   ;;  %vm2165_vm4 = vcmask 130048   ;;  %vm2174_vm5 = vcmask 195584   ;;  %vm2191_vm6 = vcmask 253952  }
   0x5   :  { %s2474_s25 = smov 56   ;;  %s2475_s26 = smov 80  }
   0x6   :  { %s2476_s27 = smov 112   ;;  %s2477_s28 = smov 48  }
   0x7   :  { %s2478_s29 = smov 104   ;;  %s2479_s30 = smov 72  }
   0x8   :  { %s2480_s2 = smov 40   ;;  %s2481_s3 = smov 8  }
   0x9   :  { %v19_v2 = vld [vmem:[#allocation1] sm:$0xff]  ;;  %s2482_s4 = smov 16   ;;  %s2483_s5 = smov 24  }
   0xa   :  { %21 = vrot.lane.b32.xlu2 %v19_v2, %s2470_s10  ;;  %43 = vst [vmem:[#allocation1] ss:$9 sm:$0xff] %v2503_v1 }
  0x11   :  { %v44_v4 = vld [vmem:[#allocation1] sm:$0xff] }
  0x12   :  { %46 = vrot.lane.b32.xlu2 %v44_v4, %s2470_s10  ;;  %67 = vst [vmem:[#allocation1] ss:$9 sm:$0xff] %v2509_v3 }
  0x19   :  { %v68_v6 = vld [vmem:[#allocation1] sm:$0xff] }
  0x1a   :  { %70 = vrot.lane.b32.xlu0 %v68_v6, %s2470_s10  ;;  %91 = vst [vmem:[#allocation1] ss:$9 sm:$0xff] %v2515_v5 }
  0x21   :  { %v92_v8 = vld [vmem:[#allocation1] sm:$0xff] }
  0x22   :  { %94 = vrot.lane.b32.xlu0 %v92_v8, %s2470_s10  ;;  %115 = vst [vmem:[#allocation1] ss:$9 sm:$0xff] %v2521_v7 }
  0x29   :  { %v116_v10 = vld [vmem:[#allocation1] sm:$0xff] }
  0x2a   :  { %118 = vrot.lane.b32.xlu0 %v116_v10, %s2470_s10  ;;  %139 = vst [vmem:[#allocation1] ss:$9 sm:$0xff] %v2527_v9 }
  0x31   :  { %v140_v12 = vld [vmem:[#allocation1] sm:$0xff] }
  0x32   :  { %163 = vst [vmem:[#allocation1] ss:$9 sm:$0xff] %v2533_v11 }
  0x39   :  { %v164_v14 = vld [vmem:[#allocation1] sm:$0xff] }
  0x3a   :  { %166 = vrot.lane.b32.xlu1 %v164_v14, %s2470_s10  ;;  %187 = vst [vmem:[#allocation1] ss:$9 sm:$0xff] %v2539_v13 }
  0x41   :  { %v188_v15 = vld [vmem:[#allocation1] sm:$0xff] }
  0x42   :  { %190 = vrot.lane.b32.xlu1 %v188_v15, %s2470_s10  ;;  %307 = vst [vmem:[#allocation1] ss:$9 sm:$0xff] %v2497_v0 }
  0x49   :  { %v308_v16 = vld [vmem:[#allocation1] sm:$0xff] }
  0x4a   :  { %142 = vrot.lane.b32.xlu1 %v140_v12, %s2470_s10  ;;  %310 = vrot.lane.b32.xlu2 %v308_v16, %s2471_s23  ;;  %333 = vst [vmem:[#allocation1] ss:$9 sm:$0xff] %v2503_v1 }
  0x51   :  { %v334_v17 = vld [vmem:[#allocation1] sm:$0xff] }
  0x52   :  { %336 = vrot.lane.b32.xlu2 %v334_v17, %s2471_s23  ;;  %357 = vst [vmem:[#allocation1] ss:$9 sm:$0xff] %v2509_v3 }
  0x59   :  { %v358_v18 = vld [vmem:[#allocation1] sm:$0xff] }
  0x5a   :  { %360 = vrot.lane.b32.xlu2 %v358_v18, %s2471_s23  ;;  %381 = vst [vmem:[#allocation1] ss:$9 sm:$0xff] %v2515_v5 }
  0x61   :  { %v382_v19 = vld [vmem:[#allocation1] sm:$0xff] }
  0x62   :  { %405 = vst [vmem:[#allocation1] ss:$9 sm:$0xff] %v2521_v7  ;;  %384 = vrot.lane.b32.xlu0 %v382_v19, %s2471_s23 }
  0x64   :  { %v22_v20 = vpop.permute.xlu2 %21 }
  0x65   :  { %v27_v21 = vsel %vm23_vm0, %v22_v20, 0 }
  0x66   :  { %36 = vmatpush.bf16.xpose.msra.mxu0 %v27_v21 }
  0x69   :  { %v2552_v22 = vld [vmem:[#allocation1] sm:$0xff] }
  0x6a   :  { %429 = vst [vmem:[#allocation1] ss:$9 sm:$0xff] %v2527_v9 }
  0x6c   :  { %v47_v23 = vpop.permute.xlu2 %46 }
  0x6d   :  { %2204 = vmatmul.msk.bf16.vlgmr.msra.gmra.mxu0 %vm23_vm0, %v2497_v0  ;;  %v51_v24 = vsel %vm23_vm0, %v47_v23, 0 }
  0x6e   :  { %60 = vmatpush.bf16.xpose.msra.mxu1 %v51_v24 }
  0x71   :  { %v2558_v25 = vld [vmem:[#allocation1] sm:$0xff] }
  0x72   :  { %453 = vst [vmem:[#allocation1] ss:$9 sm:$0xff] %v2533_v11 }
  0x75   :  { %2205 = vmatmul.msk.bf16.vlgmr.msra.gmra.mxu1 %vm23_vm0, %v2503_v1 }
  0x79   :  { %v454_v26 = vld [vmem:[#allocation1] sm:$0xff] }
  0x7a   :  { %456 = vrot.lane.b32.xlu2 %v454_v26, %s2471_s23  ;;  %477 = vst [vmem:[#allocation1] ss:$9 sm:$0xff] %v2539_v13 }
  0x81   :  { %v478_v27 = vld [vmem:[#allocation1] sm:$0xff] }
  0x82   :  { %501 = vst [vmem:[#allocation1] ss:$9 sm:$0xff] %v2497_v0  ;;  %480 = vrot.lane.b32.xlu1 %v478_v27, %s2471_s23 }
  0x89   :  { %v2567_v28 = vld [vmem:[#allocation1] sm:$0xff] }
  0x8a   :  { %506 = vst [vmem:[#allocation1] ss:$9 sm:$0xff] %v2497_v0 }
  0x8c   :  { %v71_v29 = vpop.permute.xlu0 %70 }
  0x8d   :  { %v75_v30 = vsel %vm23_vm0, %v71_v29, 0 }
  0x8e   :  { %84 = vmatpush.bf16.xpose.msra.mxu2 %v75_v30 }
  0x91   :  { %v2571_v31 = vld [vmem:[#allocation1] sm:$0xff] }
  0x92   :  { %530 = vst [vmem:[#allocation1] ss:$9 sm:$0xff] %v2503_v1 }
  0x94   :  { %v95_v32 = vpop.permute.xlu0 %94 }
  0x95   :  { %2206 = vmatmul.msk.bf16.vlgmr.msra.gmra.mxu2 %vm23_vm0, %v2509_v3  ;;  %v99_v33 = vsel %vm23_vm0, %v95_v32, 0 }
  0x96   :  { %108 = vmatpush.bf16.xpose.msra.mxu3 %v99_v33 }
  0x99   :  { %v2577_v34 = vld [vmem:[#allocation1] sm:$0xff] }
  0x9a   :  { %535 = vst [vmem:[#allocation1] ss:$9 sm:$0xff] %v2503_v1 }
  0x9c   :  { %v119_v35 = vpop.permute.xlu0 %118 }
  0x9d   :  { %2207 = vmatmul.msk.bf16.vlgmr.msra.gmra.mxu3 %vm23_vm0, %v2515_v5  ;;  %v123_v36 = vsel %vm23_vm0, %v119_v35, 0 }
  0x9e   :  { %132 = vmatpush.bf16.xpose.msrb.mxu0 %v123_v36 }
  0xa1   :  { %v2583_v37 = vld [vmem:[#allocation1] sm:$0xff] }
  0xa2   :  { %559 = vst [vmem:[#allocation1] ss:$9 sm:$0xff] %v2509_v3 }
  0xa4   :  { %v311_v52 = vpop.permute.xlu2 %310 }
  0xa5   :  { %2208 = vmatmul.msk.bf16.vlgmr.msrb.gmra.mxu0 %vm23_vm0, %v2521_v7  ;;  %v318_v53 = vsel %vm316_vm2, %v311_v52, 0 }
  0xa6   :  { %327 = vmatpush.bf16.msra.mxu0 %v318_v53 }
  0xa9   :  { %v560_v38 = vld [vmem:[#allocation1] sm:$0xff] }
  0xaa   :  { %564 = vst [vmem:[#allocation1] ss:$9 sm:$0xff] %v2509_v3 }
  0xac   :  { %v167_v39 = vpop.permute.xlu1 %166  ;;  %v337_v56 = vpop.permute.xlu2 %336 }
  0xad   :  { %v171_v40 = vsel %vm23_vm0, %v167_v39, 0  ;;  %v342_v57 = vsel %vm316_vm2, %v337_v56, 0 }
  0xae   :  { %180 = vmatpush.bf16.xpose.msrb.mxu2 %v171_v40 }
  0xb1   :  { %v565_v41 = vld [vmem:[#allocation1] sm:$0xff] }
  0xb2   :  { %567 = vrot.lane.b32.xlu2 %v565_v41, %s2472_s0  ;;  %588 = vst [vmem:[#allocation1] ss:$9 sm:$0xff] %v2515_v5 }
  0xb4   :  { %v191_v42 = vpop.permute.xlu1 %190  ;;  %v361_v2 = vpop.permute.xlu2 %360 }
  0xb5   :  { %2210 = vmatmul.msk.bf16.vlgmr.msrb.gmra.mxu2 %vm23_vm0, %v2533_v11  ;;  %v195_v43 = vsel %vm23_vm0, %v191_v42, 0  ;;  %v366_v4 = vsel %vm316_vm2, %v361_v2, 0 }
  0xb6   :  { %204 = vmatpush.bf16.xpose.msrb.mxu3 %v195_v43  ;;  %375 = vmatpush.bf16.msra.mxu2 %v366_v4 }
  0xb9   :  { %v589_v61 = vld [vmem:[#allocation1] sm:$0xff] }
  0xba   :  { %593 = vst [vmem:[#allocation1] ss:$9 sm:$0xff] %v2515_v5 }
  0xbc   :  { %v143_v44 = vpop.permute.xlu1 %142 }
  0xbd   :  { %v147_v45 = vsel %vm23_vm0, %v143_v44, 0  ;;  %2211 = vmatmul.msk.bf16.vlgmr.msrb.gmra.mxu3 %vm23_vm0, %v2539_v13 }
  0xbe   :  { %156 = vmatpush.bf16.xpose.msrb.mxu1 %v147_v45 }
  0xc1   :  { %v594_v12 = vld [vmem:[#allocation1] sm:$0xff] }
  0xc2   :  { %617 = vst [vmem:[#allocation1] ss:$9 sm:$0xff] %v2521_v7 }
  0xc5   :  { %2209 = vmatmul.msk.bf16.vlgmr.msrb.gmra.mxu1 %vm23_vm0, %v2527_v9 }
  0xc6   :  { %351 = vmatpush.bf16.msra.mxu1 %v342_v57 }
  0xc9   :  { %v2626_v16 = vld [vmem:[#allocation1] sm:$0xff] }
  0xca   :  { %622 = vst [vmem:[#allocation1] ss:$9 sm:$0xff] %v2521_v7 }
  0xd1   :  { %v2635_v20 = vld [vmem:[#allocation1] sm:$0xff] }
  0xd2   :  { %646 = vst [vmem:[#allocation1] ss:$9 sm:$0xff] %v2527_v9 }
  0xd4   :  { %v457_v10 = vpop.permute.xlu2 %456  ;;  %v385_v15 = vpop.permute.xlu0 %384 }
  0xd5   :  { %v462_v14 = vsel %vm316_vm2, %v457_v10, 0  ;;  %v390_v17 = vsel %vm316_vm2, %v385_v15, 0 }
  0xd6   :  { %471 = vmatpush.bf16.msrb.mxu2 %v462_v14  ;;  %399 = vmatpush.bf16.msra.mxu3 %v390_v17 }
  0xea   :  { %v2600_v46 = vpop.f32.mrf.mxu0 }
  0xeb   :  { %v211_v47 = vsel %vm210_vm1, %v2600_v46, -inf }
  0xec   :  { %212 = vmax.xlane.f32.xlu2 %v211_v47 }
  0xf2   :  { %v2604_v48 = vpop.f32.mrf.mxu1  ;;  %v40_v49 = vpop.f32.mrf.mxu0 }
  0xf3   :  { %v214_v50 = vsel %vm210_vm1, %v2604_v48, -inf }
  0xf4   :  { %215 = vmax.xlane.f32.xlu0 %v214_v50  ;;  %v481_v32 = vpop.permute.xlu1 %480 }
  0xf5   :  { %v486_v35 = vsel %vm316_vm2, %v481_v32, 0 }
  0xf6   :  { %495 = vmatpush.bf16.msrb.mxu3 %v486_v35 }
  0xfa   :  { %v64_v51 = vpop.f32.mrf.mxu1 }
 0x10c   :  { %v2650_v33 = vpop.permute.xlu2 %567 }
 0x118   :  { %v2609_v54 = vpop.f32.mrf.mxu2 }
 0x119   :  { %v217_v55 = vsel %vm210_vm1, %v2609_v54, -inf }
 0x11a   :  { %218 = vmax.xlane.f32.xlu2 %v217_v55 }
 0x120   :  { %v2614_v58 = vpop.f32.mrf.mxu3  ;;  %v88_v59 = vpop.f32.mrf.mxu2 }
 0x121   :  { %v220_v60 = vsel %vm210_vm1, %v2614_v58, -inf }
 0x122   :  { %v2618_v62 = vpop.f32.mrf.mxu0  ;;  %221 = vmax.xlane.f32.xlu0 %v220_v60 }
 0x123   :  { %v223_v63 = vsel %vm210_vm1, %v2618_v62, -inf }
 0x124   :  { %224 = vmax.xlane.f32.xlu1 %v223_v63 }
 0x128   :  { %v112_v6 = vpop.f32.mrf.mxu3 }
 0x12a   :  { %v136_v8 = vpop.f32.mrf.mxu0 }
 0x136   :  { %562 = vrot.lane.b32.xlu0 %v560_v38, %s2473_s24 }
 0x138   :  { %v2631_v18 = vpop.f32.mrf.mxu2 }
 0x139   :  { %v229_v19 = vsel %vm210_vm1, %v2631_v18, -inf }
 0x13a   :  { %230 = vmax.xlane.f32.xlu1 %v229_v19 }
 0x13e   :  { %591 = vrot.lane.b32.xlu0 %v589_v61, %s2473_s24 }
 0x140   :  { %v184_v21 = vpop.f32.mrf.mxu2  ;;  %v2639_v23 = vpop.f32.mrf.mxu3 }
 0x141   :  { %v232_v29 = vsel %vm210_vm1, %v2639_v23, -inf }
 0x142   :  { %v2641_v24 = vpop.f32.mrf.mxu1 }
 0x143   :  { %v226_v26 = vsel %vm210_vm1, %v2641_v24, -inf }
 0x144   :  { %227 = vmax.xlane.f32.xlu2 %v226_v26 }
 0x146   :  { %408 = vrot.lane.b32.xlu0 %v2552_v22, %s2471_s23 }
 0x148   :  { %v208_v27 = vpop.f32.mrf.mxu3 }
 0x14a   :  { %v160_v30 = vpop.f32.mrf.mxu1 }
 0x14c   :  { %233 = vmax.xlane.f32.xlu2 %v232_v29 }
 0x153   :  { %596 = vrot.lane.b32.xlu1 %v594_v12, %s2472_s0 }
 0x15f   :  { %v213_v38 = vpop.xlane.xlu2 %212 }
 0x160   :  { %v235_v40 = vsub.f32 %v2600_v46, %v213_v38 }
 0x162   :  { %v243_v41 = vmul.f32 1.442695, %v235_v40 }
 0x164   :  { %432 = vrot.lane.b32.xlu2 %v2558_v25, %s2471_s23 }
 0x167   :  { %v216_v36 = vpop.xlane.xlu0 %215 }
 0x168   :  { %v236_v22 = vsub.f32 %v2604_v48, %v216_v36  ;;  %v2666_v48 = vld [vmem:[#allocation1] sm:$0xff] }
 0x169   :  { %651 = vst [vmem:[#allocation1] ss:$9 sm:$0xff] %v2527_v9 }
 0x16a   :  { %v245_v39 = vmul.f32 1.442695, %v236_v22 }
 0x16c   :  { %2342 = vpow2.f32 %v245_v39 }
 0x16d   :  { %2344 = vpow2.f32 %v243_v41 }
 0x170   :  { %v2670_v52 = vld [vmem:[#allocation1] sm:$0xff] }
 0x171   :  { %675 = vst [vmem:[#allocation1] ss:$9 sm:$0xff] %v2533_v11 }
 0x172   :  { %v2657_v42 = vpop.eup %2342 }
 0x173   :  { %v262_v43 = vsel %vm210_vm1, %v2657_v42, 0.0  ;;  %v2661_v44 = vpop.eup %2344 }
 0x174   :  { %263 = vadd.xlane.f32.xlu0 %v262_v43  ;;  %v259_v25 = vsel %vm210_vm1, %v2661_v44, 0.0 }
 0x178   :  { %v676_v59 = vld [vmem:[#allocation1] sm:$0xff] }
 0x179   :  { %680 = vst [vmem:[#allocation1] ss:$9 sm:$0xff] %v2533_v11 }
 0x17d   :  { %260 = vadd.xlane.f32.xlu1 %v259_v25 }
 0x180   :  { %v681_v63 = vld [vmem:[#allocation1] sm:$0xff] }
 0x181   :  { %704 = vst [vmem:[#allocation1] ss:$9 sm:$0xff] %v2539_v13 }
 0x188   :  { %v705_v26 = vld [vmem:[#allocation1] sm:$0xff] }
 0x189   :  { %709 = vst [vmem:[#allocation1] ss:$9 sm:$0xff] %v2539_v13 }
 0x18d   :  { %v219_v45 = vpop.xlane.xlu2 %218 }
 0x18e   :  { %v237_v47 = vsub.f32 %v2609_v54, %v219_v45 }
 0x190   :  { %v247_v46 = vmul.f32 1.442695, %v237_v47 }
 0x192   :  { %2346 = vpow2.f32 %v247_v46 }
 0x195   :  { %v222_v49 = vpop.xlane.xlu0 %221 }
 0x196   :  { %v238_v50 = vsub.f32 %v2614_v58, %v222_v49 }
 0x197   :  { %v225_v51 = vpop.xlane.xlu1 %224 }
 0x198   :  { %v2672_v53 = vpop.eup %2346  ;;  %v249_v55 = vmul.f32 1.442695, %v238_v50  ;;  %v239_v56 = vsub.f32 %v2618_v62, %v225_v51 }
 0x199   :  { %v265_v54 = vsel %vm210_vm1, %v2672_v53, 0.0 }
 0x19a   :  { %2348 = vpow2.f32 %v249_v55  ;;  %v251_v57 = vmul.f32 1.442695, %v239_v56  ;;  %266 = vadd.xlane.f32.xlu0 %v265_v54 }
 0x19c   :  { %2350 = vpow2.f32 %v251_v57 }
 0x1a0   :  { %v2678_v60 = vpop.eup %2348 }
 0x1a1   :  { %v268_v58 = vsel %vm210_vm1, %v2678_v60, 0.0 }
 0x1a2   :  { %v2683_v61 = vpop.eup %2350  ;;  %269 = vadd.xlane.f32.xlu1 %v268_v58 }
 0x1a3   :  { %v271_v62 = vsel %vm210_vm1, %v2683_v61, 0.0 }
 0x1a4   :  { %272 = vadd.xlane.f32.xlu2 %v271_v62 }
 0x1a8   :  { %v2688_v2 = vpop.permute.xlu0 %562 }
 0x1ad   :  { %v231_v6 = vpop.xlane.xlu1 %230 }
 0x1ae   :  { %683 = vrot.lane.b32.xlu0 %v681_v63, %s2472_s0  ;;  %v241_v12 = vsub.f32 %v2631_v18, %v231_v6 }
 0x1b0   :  { %v2691_v4 = vpop.permute.xlu0 %591  ;;  %v255_v19 = vmul.f32 1.442695, %v241_v12 }
 0x1b6   :  { %509 = vrot.lane.b32.xlu0 %v2571_v31, %s2472_s0 }
 0x1b7   :  { %v228_v8 = vpop.xlane.xlu2 %227 }
 0x1b8   :  { %v240_v10 = vsub.f32 %v2641_v24, %v228_v8  ;;  %v409_v15 = vpop.permute.xlu0 %408 }
 0x1b9   :  { %v414_v17 = vsel %vm316_vm2, %v409_v15, 0 }
 0x1ba   :  { %v253_v14 = vmul.f32 1.442695, %v240_v10  ;;  %423 = vmatpush.bf16.msrb.mxu0 %v414_v17 }
 0x1bc   :  { %2352 = vpow2.f32 %v253_v14  ;;  %678 = vrot.lane.b32.xlu2 %v676_v59, %s2473_s24 }
 0x1bd   :  { %2354 = vpow2.f32 %v255_v19 }
 0x1be   :  { %538 = vrot.lane.b32.xlu0 %v2583_v37, %s2472_s0 }
 0x1bf   :  { %v234_v21 = vpop.xlane.xlu2 %233 }
 0x1c0   :  { %v242_v24 = vsub.f32 %v2639_v23, %v234_v21  ;;  %v710_v23 = vld [vmem:[#allocation1] sm:$0xff] }
 0x1c1   :  { %829 = vst [vmem:[#allocation1] ss:$9 sm:$0xff] %v2497_v0 }
 0x1c2   :  { %v2701_v31 = vpop.eup %2352  ;;  %v257_v27 = vmul.f32 1.442695, %v242_v24 }
 0x1c3   :  { %v274_v18 = vsel %vm210_vm1, %v2701_v31, 0.0  ;;  %v2710_v37 = vpop.eup %2354 }
 0x1c4   :  { %275 = vadd.xlane.f32.xlu1 %v274_v18  ;;  %533 = vrot.lane.b32.xlu2 %v2577_v34, %s2473_s24  ;;  %2356 = vpow2.f32 %v257_v27  ;;  %v277_v29 = vsel %vm210_vm1, %v2710_v37, 0.0 }
 0x1c5   :  { %v597_v35 = vpop.permute.xlu1 %596 }
 0x1c6   :  { %707 = vrot.lane.b32.xlu0 %v705_v26, %s2473_s24  ;;  %v602_v57 = vsel %vm23_vm0, %v597_v35, 0 }
 0x1c7   :  { %v433_v38 = vpop.permute.xlu2 %432 }
 0x1c8   :  { %v2723_v32 = vld [vmem:[#allocation1] sm:$0xff]  ;;  %v438_v39 = vsel %vm316_vm2, %v433_v38, 0 }
 0x1c9   :  { %853 = vst [vmem:[#allocation1] ss:$9 sm:$0xff] %v2503_v1  ;;  %447 = vmatpush.bf16.msrb.mxu1 %v438_v39 }
 0x1ca   :  { %v2719_v34 = vpop.eup %2356 }
 0x1cb   :  { %v280_v30 = vsel %vm210_vm1, %v2719_v34, 0.0 }
 0x1cc   :  { %278 = vadd.xlane.f32.xlu1 %v277_v29  ;;  %620 = vrot.lane.b32.xlu2 %v2626_v16, %s2473_s24 }
 0x1ce   :  { %625 = vrot.lane.b32.xlu0 %v2635_v20, %s2472_s0 }
 0x1d4   :  { %281 = vadd.xlane.f32.xlu1 %v280_v30 }
 0x1d6   :  { %649 = vrot.lane.b32.xlu0 %v2666_v48, %s2473_s24 }
 0x1e7   :  { %v264_v16 = vpop.xlane.xlu0 %263 }
 0x1e8   :  { %2358 = vrcp.f32 %v264_v16 }
 0x1ed   :  { %712 = vrot.lane.b32.xlu1 %v710_v23, %s2472_s0 }
 0x1ee   :  { %v2359_v36 = vpop.eup %2358 }
 0x1ef   :  { %v292_v20 = vmul.f32 %v2359_v36, %v2657_v42 }
 0x1f0   :  { %v261_v22 = vpop.xlane.xlu1 %260 }
 0x1f1   :  { %v300_v40 = vpack.c.bf16 %v292_v20, %v292_v20  ;;  %2360 = vrcp.f32 %v261_v22 }
 0x1f3   :  { %2213 = vmatmul.msk.bf16.vlgmr.msra.gmra.mxu1 %vm312_vm3, %v300_v40 }
 0x1f5   :  { %504 = vrot.lane.b32.xlu1 %v2567_v28, %s2473_s24  ;;  %v2739_v28 = vld [vmem:[#allocation1] sm:$0xff] }
 0x1f6   :  { %877 = vst [vmem:[#allocation1] ss:$9 sm:$0xff] %v2509_v3 }
 0x1f7   :  { %v2361_v41 = vpop.eup %2360 }
 0x1f8   :  { %v291_v43 = vmul.f32 %v2361_v41, %v2661_v44  ;;  %v573_v44 = vsel %vm23_vm0, %v2650_v33, 0 }
 0x1fa   :  { %v299_v25 = vpack.c.bf16 %v291_v43, %v291_v43 }
 0x1fc   :  { %2212 = vmatmul.msk.bf16.vlgmr.msra.gmra.mxu0 %vm312_vm3, %v299_v25 }
 0x1fd   :  { %654 = vrot.lane.b32.xlu1 %v2670_v52, %s2472_s0  ;;  %v878_v54 = vld [vmem:[#allocation1] sm:$0xff] }
 0x1fe   :  { %901 = vst [vmem:[#allocation1] ss:$9 sm:$0xff] %v2515_v5  ;;  %880 = vrot.lane.b32.xlu2 %v878_v54, %s2474_s25 }
 0x20d   :  { %v267_v42 = vpop.xlane.xlu0 %266 }
 0x20e   :  { %2362 = vrcp.f32 %v267_v42 }
 0x214   :  { %v2363_v45 = vpop.eup %2362 }
 0x215   :  { %v293_v47 = vmul.f32 %v2363_v45, %v2672_v53  ;;  %v270_v48 = vpop.xlane.xlu1 %269 }
 0x216   :  { %2364 = vrcp.f32 %v270_v48 }
 0x217   :  { %v301_v46 = vpack.c.bf16 %v293_v47, %v293_v47  ;;  %v273_v49 = vpop.xlane.xlu2 %272 }
 0x218   :  { %2366 = vrcp.f32 %v273_v49 }
 0x219   :  { %2214 = vmatmul.msk.bf16.vlgmr.msra.gmra.mxu2 %vm312_vm3, %v301_v46 }
 0x21a   :  { %582 = vmatpush.bf16.xpose.msra.mxu2 %v573_v44 }
 0x21c   :  { %v2365_v50 = vpop.eup %2364 }
 0x21d   :  { %v294_v51 = vmul.f32 %v2365_v50, %v2678_v60  ;;  %v902_v60 = vld [vmem:[#allocation1] sm:$0xff] }
 0x21e   :  { %v2367_v52 = vpop.eup %2366  ;;  %904 = vrot.lane.b32.xlu0 %v902_v60, %s2474_s25  ;;  %925 = vst [vmem:[#allocation1] ss:$9 sm:$0xff] %v2521_v7 }
 0x21f   :  { %v302_v53 = vpack.c.bf16 %v294_v51, %v294_v51  ;;  %v295_v55 = vmul.f32 %v2367_v52, %v2683_v61  ;;  %v679_v24 = vpop.permute.xlu2 %678 }
 0x220   :  { %v684_v56 = vpop.permute.xlu0 %683 }
 0x221   :  { %v303_v59 = vpack.c.bf16 %v295_v55, %v295_v55  ;;  %2215 = vmatmul.msk.bf16.vlgmr.msra.gmra.mxu3 %vm312_vm3, %v302_v53 }
 0x222   :  { %611 = vmatpush.bf16.xpose.msra.mxu3 %v602_v57 }
 0x223   :  { %2216 = vmatmul.msk.bf16.vlgmr.msrb.gmra.mxu0 %vm312_vm3, %v303_v59 }
 0x225   :  { %v2755_v62 = vld [vmem:[#allocation1] sm:$0xff] }
 0x226   :  { %949 = vst [vmem:[#allocation1] ss:$9 sm:$0xff] %v2527_v9 }
 0x227   :  { %v534_v16 = vpop.permute.xlu2 %533 }
 0x228   :  { %v510_v33 = vpop.permute.xlu0 %509 }
 0x229   :  { %v515_v58 = vsel %vm23_vm0, %v510_v33, 0 }
 0x22a   :  { %524 = vmatpush.bf16.xpose.msra.mxu0 %v515_v58 }
 0x22d   :  { %v2759_v8 = vld [vmem:[#allocation1] sm:$0xff] }
 0x22e   :  { %973 = vst [vmem:[#allocation1] ss:$9 sm:$0xff] %v2533_v11 }
 0x230   :  { %v539_v61 = vpop.permute.xlu0 %538 }
 0x231   :  { %v544_v63 = vsel %vm23_vm0, %v539_v61, 0 }
 0x232   :  { %553 = vmatpush.bf16.xpose.msra.mxu1 %v544_v63 }
 0x235   :  { %v974_v15 = vld [vmem:[#allocation1] sm:$0xff] }
 0x236   :  { %997 = vst [vmem:[#allocation1] ss:$9 sm:$0xff] %v2539_v13  ;;  %976 = vrot.lane.b32.xlu2 %v974_v15, %s2474_s25 }
 0x237   :  { %v276_v6 = vpop.xlane.xlu1 %275 }
 0x238   :  { %2368 = vrcp.f32 %v276_v6  ;;  %v708_v19 = vpop.permute.xlu0 %707 }
 0x23d   :  { %v998_v27 = vld [vmem:[#allocation1] sm:$0xff] }
 0x23e   :  { %v2369_v10 = vpop.eup %2368  ;;  %1021 = vst [vmem:[#allocation1] ss:$9 sm:$0xff] %v2497_v0  ;;  %832 = vrot.lane.b32.xlu2 %v2723_v32, %s2474_s25  ;;  %1000 = vrot.lane.b32.xlu1 %v998_v27, %s2474_s25 }
 0x23f   :  { %v296_v12 = vmul.f32 %v2369_v10, %v2701_v31  ;;  %v279_v14 = vpop.xlane.xlu1 %278  ;;  %v689_v31 = vsel %vm23_vm0, %v684_v56, 0 }
 0x240   :  { %2370 = vrcp.f32 %v279_v14  ;;  %v626_v23 = vpop.permute.xlu0 %625 }
 0x241   :  { %v304_v17 = vpack.c.bf16 %v296_v12, %v296_v12  ;;  %v631_v30 = vsel %vm23_vm0, %v626_v23, 0 }
 0x242   :  { %640 = vmatpush.bf16.xpose.msrb.mxu0 %v631_v30 }
 0x243   :  { %2217 = vmatmul.msk.bf16.vlgmr.msrb.gmra.mxu1 %vm312_vm3, %v304_v17 }
 0x245   :  { %v2775_v36 = vld [vmem:[#allocation1] sm:$0xff] }
 0x246   :  { %v2371_v21 = vpop.eup %2370  ;;  %1026 = vst [vmem:[#allocation1] ss:$9 sm:$0xff] %v2497_v0  ;;  %856 = vrot.lane.b32.xlu2 %v2739_v28, %s2474_s25 }
 0x247   :  { %v297_v18 = vmul.f32 %v2371_v21, %v2710_v37  ;;  %v282_v26 = vpop.xlane.xlu1 %281 }
 0x248   :  { %2372 = vrcp.f32 %v282_v26  ;;  %v650_v42 = vpop.permute.xlu0 %649 }
 0x249   :  { %v305_v29 = vpack.c.bf16 %v297_v18, %v297_v18 }
 0x24b   :  { %2218 = vmatmul.msk.bf16.vlgmr.msrb.gmra.mxu2 %vm312_vm3, %v305_v29 }
 0x24c   :  { %698 = vmatpush.bf16.xpose.msrb.mxu2 %v689_v31 }
 0x24d   :  { %v2782_v32 = vld [vmem:[#allocation1] sm:$0xff] }
 0x24e   :  { %v2373_v37 = vpop.eup %2372  ;;  %1050 = vst [vmem:[#allocation1] ss:$9 sm:$0xff] %v2503_v1 }
 0x24f   :  { %v298_v35 = vmul.f32 %v2373_v37, %v2719_v34 }
 0x251   :  { %v306_v20 = vpack.c.bf16 %v298_v35, %v298_v35 }
 0x253   :  { %2219 = vmatmul.msk.bf16.vlgmr.msrb.gmra.mxu3 %vm312_vm3, %v306_v20  ;;  %2221 = vmatmul.msk.bf16.vlgmr.msra.gmra.mxu1 %vm23_vm0, %v534_v16 }
 0x255   :  { %v2788_v22 = vld [vmem:[#allocation1] sm:$0xff] }
 0x256   :  { %1055 = vst [vmem:[#allocation1] ss:$9 sm:$0xff] %v2503_v1 }
 0x25b   :  { %2222 = vmatmul.msk.bf16.vlgmr.msra.gmra.mxu2 %vm23_vm0, %v2688_v2 }
 0x25d   :  { %v2794_v40 = vld [vmem:[#allocation1] sm:$0xff] }
 0x25e   :  { %1079 = vst [vmem:[#allocation1] ss:$9 sm:$0xff] %v2509_v3 }
 0x25f   :  { %v713_v34 = vpop.permute.xlu1 %712 }
 0x260   :  { %v718_v38 = vsel %vm23_vm0, %v713_v34, 0 }
 0x261   :  { %727 = vmatpush.bf16.xpose.msrb.mxu3 %v718_v38 }
 0x263   :  { %2223 = vmatmul.msk.bf16.vlgmr.msra.gmra.mxu3 %vm23_vm0, %v2691_v4  ;;  %v621_v4 = vpop.permute.xlu2 %620 }
 0x265   :  { %v2801_v25 = vld [vmem:[#allocation1] sm:$0xff] }
 0x266   :  { %1084 = vst [vmem:[#allocation1] ss:$9 sm:$0xff] %v2509_v3 }
 0x267   :  { %v505_v39 = vpop.permute.xlu1 %504 }
 0x268   :  { %2220 = vmatmul.msk.bf16.vlgmr.msra.gmra.mxu0 %vm23_vm0, %v505_v39 }
 0x26b   :  { %2226 = vmatmul.msk.bf16.vlgmr.msrb.gmra.mxu2 %vm23_vm0, %v679_v24  ;;  %v881_v17 = vpop.permute.xlu2 %880 }
 0x26c   :  { %v886_v21 = vsel %vm316_vm2, %v881_v17, 0 }
 0x26d   :  { %v1085_v47 = vld [vmem:[#allocation1] sm:$0xff]  ;;  %895 = vmatpush.bf16.msra.mxu2 %v886_v21 }
 0x26e   :  { %1087 = vrot.lane.b32.xlu0 %v1085_v47, %s2475_s26  ;;  %1108 = vst [vmem:[#allocation1] ss:$9 sm:$0xff] %v2515_v5 }
 0x26f   :  { %v655_v2 = vpop.permute.xlu1 %654 }
 0x270   :  { %v660_v41 = vsel %vm23_vm0, %v655_v2, 0  ;;  %v2799_v43 = vpop.f32.mrf.mxu1 }
 0x271   :  { %669 = vmatpush.bf16.xpose.msrb.mxu1 %v660_v41 }
 0x273   :  { %2227 = vmatmul.msk.bf16.vlgmr.msrb.gmra.mxu3 %vm23_vm0, %v708_v19 }
 0x275   :  { %v2811_v46 = vld [vmem:[#allocation1] sm:$0xff] }
 0x276   :  { %1113 = vst [vmem:[#allocation1] ss:$9 sm:$0xff] %v2515_v5 }
 0x278   :  { %v355_v45 = vpop.f32.mrf.mxu1  ;;  %2224 = vmatmul.msk.bf16.vlgmr.msrb.gmra.mxu0 %vm23_vm0, %v621_v4  ;;  %2225 = vmatmul.msk.bf16.vlgmr.msrb.gmra.mxu1 %vm23_vm0, %v650_v42 }
 0x279   :  { %v2807_v48 = vpop.f32.mrf.mxu0 }
 0x27d   :  { %v1114_v28 = vld [vmem:[#allocation1] sm:$0xff] }
 0x27e   :  { %1116 = vrot.lane.b32.xlu0 %v1114_v28, %s2475_s26  ;;  %1137 = vst [vmem:[#allocation1] ss:$9 sm:$0xff] %v2521_v7 }
 0x281   :  { %v331_v49 = vpop.f32.mrf.mxu0 }
 0x290   :  { %v905_v19 = vpop.permute.xlu0 %904  ;;  %v977_v29 = vpop.permute.xlu2 %976 }
 0x291   :  { %v910_v24 = vsel %vm316_vm2, %v905_v19, 0  ;;  %v982_v23 = vsel %vm316_vm2, %v977_v29, 0 }
 0x292   :  { %919 = vmatpush.bf16.msra.mxu3 %v910_v24  ;;  %991 = vmatpush.bf16.msrb.mxu2 %v982_v23 }
 0x298   :  { %v833_v38 = vpop.permute.xlu2 %832 }
 0x299   :  { %v838_v39 = vsel %vm316_vm2, %v833_v38, 0 }
 0x29a   :  { %847 = vmatpush.bf16.msra.mxu0 %v838_v39 }
 0x29c   :  { %v2816_v44 = vpop.f32.mrf.mxu2 }
 0x2a0   :  { %v2818_v50 = vpop.f32.mrf.mxu0  ;;  %v857_v47 = vpop.permute.xlu2 %856 }
 0x2a1   :  { %v862_v49 = vsel %vm316_vm2, %v857_v47, 0 }
 0x2a2   :  { %871 = vmatpush.bf16.msra.mxu1 %v862_v49 }
 0x2a4   :  { %v379_v51 = vpop.f32.mrf.mxu2  ;;  %v2820_v52 = vpop.f32.mrf.mxu3 }
 0x2a8   :  { %v427_v53 = vpop.f32.mrf.mxu0 }
 0x2ac   :  { %v403_v55 = vpop.f32.mrf.mxu3 }
 0x2b0   :  { %v1001_v28 = vpop.permute.xlu1 %1000 }
 0x2b1   :  { %v1006_v51 = vsel %vm316_vm2, %v1001_v28, 0 }
 0x2b2   :  { %1015 = vmatpush.bf16.msrb.mxu3 %v1006_v51 }
 0x2c0   :  { %v2822_v56 = vpop.f32.mrf.mxu1 }
 0x2c8   :  { %v451_v54 = vpop.f32.mrf.mxu1 }
 0x2ce   :  { %v2824_v57 = vpop.f32.mrf.mxu2 }
 0x2d0   :  { %v555_v59 = vpop.f32.mrf.mxu1 }
 0x2d1   :  { %v736_v33 = vsel %vm210_vm1, %v555_v59, -inf }
 0x2d2   :  { %737 = vmax.xlane.f32.xlu0 %v736_v33 }
 0x2d6   :  { %v475_v60 = vpop.f32.mrf.mxu2  ;;  %v2827_v58 = vpop.f32.mrf.mxu3 }
 0x2d8   :  { %v557_v61 = vpop.f32.mrf.mxu1 }
 0x2de   :  { %v499_v63 = vpop.f32.mrf.mxu3  ;;  %v2829_v6 = vpop.f32.mrf.mxu2 }
 0x2df   :  { %v739_v45 = vsel %vm210_vm1, %v2829_v6, -inf }
 0x2e0   :  { %v2860_v55 = vpop.permute.xlu0 %1087 }
 0x2e5   :  { %v526_v10 = vpop.f32.mrf.mxu0 }
 0x2e6   :  { %v586_v12 = vpop.f32.mrf.mxu2  ;;  %v2831_v14 = vpop.f32.mrf.mxu3  ;;  %v733_v15 = vsel %vm210_vm1, %v526_v10, -inf }
 0x2e7   :  { %734 = vmax.xlane.f32.xlu2 %v733_v15  ;;  %v742_v42 = vsel %vm210_vm1, %v2831_v14, -inf  ;;  %v2868_v12 = vld [vmem:[#allocation1] sm:$0xff] }
 0x2e8   :  { %1142 = vst [vmem:[#allocation1] ss:$9 sm:$0xff] %v2521_v7 }
 0x2ed   :  { %v528_v18 = vpop.f32.mrf.mxu0 }
 0x2ee   :  { %v615_v26 = vpop.f32.mrf.mxu3  ;;  %v2836_v27 = vpop.f32.mrf.mxu2 }
 0x2ef   :  { %v751_v31 = vsel %vm210_vm1, %v2836_v27, -inf  ;;  %v2871_v17 = vld [vmem:[#allocation1] sm:$0xff] }
 0x2f0   :  { %752 = vmax.xlane.f32.xlu0 %v751_v31  ;;  %v2862_v54 = vpop.permute.xlu0 %1116  ;;  %1166 = vst [vmem:[#allocation1] ss:$9 sm:$0xff] %v2527_v9 }
 0x2f5   :  { %v642_v30 = vpop.f32.mrf.mxu0  ;;  %v671_v37 = vpop.f32.mrf.mxu1 }
 0x2f6   :  { %v702_v35 = vpop.f32.mrf.mxu2  ;;  %v2841_v16 = vpop.f32.mrf.mxu3  ;;  %v748_v20 = vsel %vm210_vm1, %v671_v37, -inf  ;;  %v745_v34 = vsel %vm210_vm1, %v642_v30, -inf }
 0x2f7   :  { %749 = vmax.xlane.f32.xlu2 %v748_v20  ;;  %746 = vmax.xlane.f32.xlu1 %v745_v34  ;;  %v754_v53 = vsel %vm210_vm1, %v2841_v16, -inf  ;;  %v2878_v21 = vld [vmem:[#allocation1] sm:$0xff] }
 0x2f8   :  { %1171 = vst [vmem:[#allocation1] ss:$9 sm:$0xff] %v2527_v9 }
 0x2fd   :  { %v644_v2 = vpop.f32.mrf.mxu0  ;;  %v673_v41 = vpop.f32.mrf.mxu1 }
 0x2fe   :  { %v731_v4 = vpop.f32.mrf.mxu3 }
 0x2ff   :  { %743 = vmax.xlane.f32.xlu2 %v742_v42  ;;  %740 = vmax.xlane.f32.xlu1 %v739_v45  ;;  %v1172_v23 = vld [vmem:[#allocation1] sm:$0xff] }
 0x300   :  { %1195 = vst [vmem:[#allocation1] ss:$9 sm:$0xff] %v2533_v11 }
 0x304   :  { %952 = vrot.lane.b32.xlu0 %v2759_v8, %s2474_s25 }
 0x307   :  { %755 = vmax.xlane.f32.xlu1 %v754_v53 }
 0x317   :  { %928 = vrot.lane.b32.xlu2 %v2755_v62, %s2474_s25 }
 0x320   :  { %1082 = vrot.lane.b32.xlu1 %v2801_v25, %s2476_s27 }
 0x345   :  { %v738_v33 = vpop.xlane.xlu0 %737 }
 0x346   :  { %v758_v60 = vsub.f32 %v555_v59, %v738_v33 }
 0x348   :  { %v767_v61 = vmul.f32 1.442695, %v758_v60 }
 0x34a   :  { %2374 = vpow2.f32 %v767_v61 }
 0x350   :  { %v2864_v8 = vpop.eup %2374 }
 0x351   :  { %v784_v63 = vsel %vm210_vm1, %v2864_v8, 0.0 }
 0x352   :  { %785 = vadd.xlane.f32.xlu0 %v784_v63 }
 0x35a   :  { %v735_v62 = vpop.xlane.xlu2 %734 }
 0x35b   :  { %v757_v25 = vsub.f32 %v526_v10, %v735_v62 }
 0x35d   :  { %v765_v15 = vmul.f32 1.442695, %v757_v25 }
 0x35f   :  { %2376 = vpow2.f32 %v765_v15 }
 0x363   :  { %v753_v35 = vpop.xlane.xlu0 %752 }
 0x364   :  { %v763_v41 = vsub.f32 %v2836_v27, %v753_v35 }
 0x365   :  { %v2874_v59 = vpop.eup %2376 }
 0x366   :  { %v781_v19 = vsel %vm210_vm1, %v2874_v59, 0.0 }
 0x367   :  { %782 = vadd.xlane.f32.xlu1 %v781_v19 }
 0x36a   :  { %v750_v24 = vpop.xlane.xlu2 %749  ;;  %v747_v18 = vpop.xlane.xlu1 %746 }
 0x36b   :  { %v762_v26 = vsub.f32 %v671_v37, %v750_v24  ;;  %v761_v10 = vsub.f32 %v642_v30, %v747_v18 }
 0x36d   :  { %v775_v31 = vmul.f32 1.442695, %v762_v26  ;;  %v773_v29 = vmul.f32 1.442695, %v761_v10 }
 0x36f   :  { %2378 = vpow2.f32 %v775_v31 }
 0x370   :  { %2380 = vpow2.f32 %v773_v29 }
 0x372   :  { %v744_v20 = vpop.xlane.xlu2 %743  ;;  %v741_v34 = vpop.xlane.xlu1 %740 }
 0x373   :  { %v760_v38 = vsub.f32 %v2831_v14, %v744_v20  ;;  %v759_v39 = vsub.f32 %v2829_v6, %v741_v34  ;;  %v1196_v14 = vld [vmem:[#allocation1] sm:$0xff]  ;;  %v777_v6 = vmul.f32 1.442695, %v763_v41 }
 0x374   :  { %1200 = vst [vmem:[#allocation1] ss:$9 sm:$0xff] %v2533_v11 }
 0x375   :  { %v2884_v2 = vpop.eup %2378  ;;  %v771_v37 = vmul.f32 1.442695, %v760_v38  ;;  %v769_v30 = vmul.f32 1.442695, %v759_v39 }
 0x376   :  { %v2887_v4 = vpop.eup %2380  ;;  %v796_v42 = vsel %vm210_vm1, %v2884_v2, 0.0  ;;  %v953_v19 = vpop.permute.xlu0 %952 }
 0x377   :  { %2382 = vpow2.f32 %v771_v37  ;;  %v793_v45 = vsel %vm210_vm1, %v2887_v4, 0.0  ;;  %797 = vadd.xlane.f32.xlu1 %v796_v42  ;;  %v958_v24 = vsel %vm316_vm2, %v953_v19, 0 }
 0x378   :  { %2384 = vpow2.f32 %v769_v30  ;;  %794 = vadd.xlane.f32.xlu2 %v793_v45  ;;  %967 = vmatpush.bf16.msrb.mxu1 %v958_v24 }
 0x379   :  { %2386 = vpow2.f32 %v777_v6 }
 0x37a   :  { %v756_v47 = vpop.xlane.xlu1 %755 }
 0x37b   :  { %v764_v49 = vsub.f32 %v2841_v16, %v756_v47  ;;  %v1201_v33 = vld [vmem:[#allocation1] sm:$0xff] }
 0x37c   :  { %1224 = vst [vmem:[#allocation1] ss:$9 sm:$0xff] %v2539_v13 }
 0x37d   :  { %v2894_v27 = vpop.eup %2382  ;;  %v779_v60 = vmul.f32 1.442695, %v764_v49 }
 0x37e   :  { %v2897_v28 = vpop.eup %2384  ;;  %v790_v51 = vsel %vm210_vm1, %v2894_v27, 0.0 }
 0x37f   :  { %791 = vadd.xlane.f32.xlu1 %v790_v51  ;;  %v787_v53 = vsel %vm210_vm1, %v2897_v28, 0.0  ;;  %v2904_v61 = vpop.eup %2386  ;;  %2388 = vpow2.f32 %v779_v60  ;;  %v1093_v60 = vsel %vm23_vm0, %v2860_v55, 0 }
 0x380   :  { %788 = vadd.xlane.f32.xlu0 %v787_v53  ;;  %v799_v16 = vsel %vm210_vm1, %v2904_v61, 0.0 }
 0x383   :  { %v1225_v25 = vld [vmem:[#allocation1] sm:$0xff] }
 0x384   :  { %1229 = vst [vmem:[#allocation1] ss:$9 sm:$0xff] %v2539_v13 }
 0x385   :  { %v2908_v63 = vpop.eup %2388 }
 0x386   :  { %v802_v62 = vsel %vm210_vm1, %v2908_v63, 0.0 }
 0x387   :  { %800 = vadd.xlane.f32.xlu1 %v799_v16 }
 0x38b   :  { %v1230_v15 = vld [vmem:[#allocation1] sm:$0xff] }
 0x38c   :  { %1349 = vst [vmem:[#allocation1] ss:$9 sm:$0xff] %v2497_v0 }
 0x38f   :  { %803 = vadd.xlane.f32.xlu1 %v802_v62 }
 0x390   :  { %1232 = vrot.lane.b32.xlu2 %v1230_v15, %s2475_s26 }
 0x392   :  { %v2939_v10 = vpop.permute.xlu1 %1082 }
 0x394   :  { %1111 = vrot.lane.b32.xlu0 %v2811_v46, %s2476_s27  ;;  %v929_v46 = vpop.permute.xlu2 %928 }
 0x395   :  { %v934_v18 = vsel %vm316_vm2, %v929_v46, 0 }
 0x396   :  { %943 = vmatpush.bf16.msrb.mxu0 %v934_v18 }
 0x398   :  { %1198 = vrot.lane.b32.xlu2 %v1196_v14, %s2476_s27 }
 0x39c   :  { %1203 = vrot.lane.b32.xlu0 %v1201_v33, %s2475_s26  ;;  %v1122_v33 = vsel %vm23_vm0, %v2862_v54, 0 }
 0x3a0   :  { %1053 = vrot.lane.b32.xlu2 %v2788_v22, %s2476_s27 }
 0x3a4   :  { %1029 = vrot.lane.b32.xlu0 %v2782_v32, %s2475_s26 }
 0x3a8   :  { %1058 = vrot.lane.b32.xlu1 %v2794_v40, %s2475_s26  ;;  %1140 = vrot.lane.b32.xlu2 %v2868_v12, %s2476_s27 }
 0x3ac   :  { %1227 = vrot.lane.b32.xlu0 %v1225_v25, %s2476_s27 }
 0x3b0   :  { %1024 = vrot.lane.b32.xlu1 %v2775_v36, %s2476_s27  ;;  %v1350_v36 = vld [vmem:[#allocation1] sm:$0xff] }
 0x3b1   :  { %1373 = vst [vmem:[#allocation1] ss:$9 sm:$0xff] %v2503_v1 }
 0x3b4   :  { %1145 = vrot.lane.b32.xlu0 %v2871_v17, %s2475_s26 }
 0x3b8   :  { %1174 = vrot.lane.b32.xlu1 %v1172_v23, %s2475_s26  ;;  %v1374_v12 = vld [vmem:[#allocation1] sm:$0xff] }
 0x3b9   :  { %1397 = vst [vmem:[#allocation1] ss:$9 sm:$0xff] %v2509_v3  ;;  %1376 = vrot.lane.b32.xlu2 %v1374_v12, %s2477_s28 }
 0x3bc   :  { %1169 = vrot.lane.b32.xlu0 %v2878_v21, %s2476_s27 }
 0x3c0   :  { %v1398_v31 = vld [vmem:[#allocation1] sm:$0xff] }
 0x3c1   :  { %1421 = vst [vmem:[#allocation1] ss:$9 sm:$0xff] %v2515_v5  ;;  %1400 = vrot.lane.b32.xlu1 %v1398_v31, %s2477_s28 }
 0x3c5   :  { %v786_v32 = vpop.xlane.xlu0 %785 }
 0x3c6   :  { %2390 = vrcp.f32 %v786_v32 }
 0x3c8   :  { %v1422_v23 = vld [vmem:[#allocation1] sm:$0xff] }
 0x3c9   :  { %1424 = vrot.lane.b32.xlu0 %v1422_v23, %s2477_s28  ;;  %1445 = vst [vmem:[#allocation1] ss:$9 sm:$0xff] %v2521_v7  ;;  %1352 = vrot.lane.b32.xlu1 %v1350_v36, %s2477_s28 }
 0x3cc   :  { %v2391_v22 = vpop.eup %2390 }
 0x3cd   :  { %v814_v40 = vmul.f32 %v2391_v22, %v2864_v8 }
 0x3cf   :  { %v822_v26 = vpack.c.bf16 %v814_v40, %v814_v40 }
 0x3d1   :  { %2229 = vmatmul.msk.bf16.vlgmr.msra.gmra.mxu1 %vm312_vm3, %v822_v26 }
 0x3da   :  { %v783_v17 = vpop.xlane.xlu1 %782 }
 0x3db   :  { %2392 = vrcp.f32 %v783_v17 }
 0x3e1   :  { %v2393_v21 = vpop.eup %2392 }
 0x3e2   :  { %v813_v8 = vmul.f32 %v2393_v21, %v2874_v59  ;;  %v1446_v59 = vld [vmem:[#allocation1] sm:$0xff] }
 0x3e3   :  { %1448 = vrot.lane.b32.xlu0 %v1446_v59, %s2477_s28  ;;  %1469 = vst [vmem:[#allocation1] ss:$9 sm:$0xff] %v2527_v9 }
 0x3e4   :  { %v821_v29 = vpack.c.bf16 %v813_v8, %v813_v8 }
 0x3e6   :  { %2228 = vmatmul.msk.bf16.vlgmr.msra.gmra.mxu0 %vm312_vm3, %v821_v29 }
 0x3ea   :  { %v798_v35 = vpop.xlane.xlu1 %797  ;;  %v1470_v6 = vld [vmem:[#allocation1] sm:$0xff] }
 0x3eb   :  { %v795_v20 = vpop.xlane.xlu2 %794  ;;  %2394 = vrcp.f32 %v798_v35  ;;  %1472 = vrot.lane.b32.xlu0 %v1470_v6, %s2477_s28  ;;  %1493 = vst [vmem:[#allocation1] ss:$9 sm:$0xff] %v2533_v11 }
 0x3ec   :  { %2396 = vrcp.f32 %v795_v20 }
 0x3f1   :  { %v2395_v34 = vpop.eup %2394 }
 0x3f2   :  { %v2397_v38 = vpop.eup %2396  ;;  %v818_v39 = vmul.f32 %v2395_v34, %v2884_v2  ;;  %v792_v41 = vpop.xlane.xlu1 %791 }
 0x3f3   :  { %v817_v37 = vmul.f32 %v2397_v38, %v2887_v4  ;;  %2398 = vrcp.f32 %v792_v41  ;;  %v789_v30 = vpop.xlane.xlu0 %788  ;;  %v1233_v15 = vpop.permute.xlu2 %1232 }
 0x3f4   :  { %v826_v42 = vpack.c.bf16 %v818_v39, %v818_v39  ;;  %2400 = vrcp.f32 %v789_v30  ;;  %v1238_v46 = vsel %vm23_vm0, %v1233_v15, 0 }
 0x3f5   :  { %v825_v45 = vpack.c.bf16 %v817_v37, %v817_v37 }
 0x3f6   :  { %2233 = vmatmul.msk.bf16.vlgmr.msrb.gmra.mxu1 %vm312_vm3, %v826_v42 }
 0x3f7   :  { %2232 = vmatmul.msk.bf16.vlgmr.msrb.gmra.mxu0 %vm312_vm3, %v825_v45 }
 0x3f9   :  { %v2399_v14 = vpop.eup %2398 }
 0x3fa   :  { %v2401_v47 = vpop.eup %2400  ;;  %v816_v2 = vmul.f32 %v2399_v14, %v2894_v27  ;;  %v801_v49 = vpop.xlane.xlu1 %800  ;;  %v1494_v27 = vld [vmem:[#allocation1] sm:$0xff] }
 0x3fb   :  { %v815_v4 = vmul.f32 %v2401_v47, %v2897_v28  ;;  %2402 = vrcp.f32 %v801_v49  ;;  %1517 = vst [vmem:[#allocation1] ss:$9 sm:$0xff] %v2539_v13  ;;  %1496 = vrot.lane.b32.xlu1 %v1494_v27, %s2477_s28  ;;  %v1199_v40 = vpop.permute.xlu2 %1198 }
 0x3fc   :  { %v824_v51 = vpack.c.bf16 %v816_v2, %v816_v2 }
 0x3fd   :  { %v823_v53 = vpack.c.bf16 %v815_v4, %v815_v4 }
 0x3fe   :  { %2231 = vmatmul.msk.bf16.vlgmr.msra.gmra.mxu3 %vm312_vm3, %v824_v51 }
 0x3ff   :  { %2230 = vmatmul.msk.bf16.vlgmr.msra.gmra.mxu2 %vm312_vm3, %v823_v53  ;;  %1131 = vmatpush.bf16.xpose.msra.mxu3 %v1122_v33 }
 0x400   :  { %1102 = vmatpush.bf16.xpose.msra.mxu2 %v1093_v60 }
 0x401   :  { %v2403_v28 = vpop.eup %2402 }
 0x402   :  { %v804_v16 = vpop.xlane.xlu1 %803  ;;  %v819_v25 = vmul.f32 %v2403_v28, %v2904_v61  ;;  %v1518_v19 = vld [vmem:[#allocation1] sm:$0xff] }
 0x403   :  { %2404 = vrcp.f32 %v804_v16  ;;  %1541 = vst [vmem:[#allocation1] ss:$9 sm:$0xff] %v2497_v0  ;;  %1520 = vrot.lane.b32.xlu1 %v1518_v19, %s2477_s28  ;;  %v1054_v31 = vpop.permute.xlu2 %1053 }
 0x404   :  { %v827_v18 = vpack.c.bf16 %v819_v25, %v819_v25 }
 0x406   :  { %v1112_v62 = vpop.permute.xlu0 %1111 }
 0x409   :  { %v2405_v54 = vpop.eup %2404 }
 0x40a   :  { %v820_v55 = vmul.f32 %v2405_v54, %v2908_v63  ;;  %v2977_v61 = vld [vmem:[#allocation1] sm:$0xff] }
 0x40b   :  { %1546 = vst [vmem:[#allocation1] ss:$9 sm:$0xff] %v2497_v0  ;;  %v1141_v38 = vpop.permute.xlu2 %1140 }
 0x40c   :  { %v828_v24 = vpack.c.bf16 %v820_v55, %v820_v55 }
 0x40e   :  { %2235 = vmatmul.msk.bf16.vlgmr.msrb.gmra.mxu3 %vm312_vm3, %v828_v24  ;;  %v1204_v32 = vpop.permute.xlu0 %1203 }
 0x40f   :  { %2234 = vmatmul.msk.bf16.vlgmr.msrb.gmra.mxu2 %vm312_vm3, %v827_v18  ;;  %v1209_v22 = vsel %vm23_vm0, %v1204_v32, 0  ;;  %1247 = vmatpush.bf16.xpose.msrb.mxu3 %v1238_v46 }
 0x410   :  { %1218 = vmatpush.bf16.xpose.msrb.mxu2 %v1209_v22 }
 0x412   :  { %v1547_v36 = vld [vmem:[#allocation1] sm:$0xff] }
 0x413   :  { %1570 = vst [vmem:[#allocation1] ss:$9 sm:$0xff] %v2503_v1 }
 0x416   :  { %v1030_v63 = vpop.permute.xlu0 %1029 }
 0x417   :  { %v1035_v26 = vsel %vm23_vm0, %v1030_v63, 0 }
 0x418   :  { %1044 = vmatpush.bf16.xpose.msra.mxu0 %v1035_v26 }
 0x41a   :  { %v1059_v12 = vpop.permute.xlu1 %1058  ;;  %v2986_v8 = vld [vmem:[#allocation1] sm:$0xff] }
 0x41b   :  { %v1064_v17 = vsel %vm23_vm0, %v1059_v12, 0  ;;  %1575 = vst [vmem:[#allocation1] ss:$9 sm:$0xff] %v2503_v1 }
 0x41c   :  { %1073 = vmatpush.bf16.xpose.msra.mxu1 %v1064_v17 }
 0x41e   :  { %2239 = vmatmul.msk.bf16.vlgmr.msra.gmra.mxu3 %vm23_vm0, %v1112_v62  ;;  %v1228_v21 = vpop.permute.xlu0 %1227 }
 0x41f   :  { %2238 = vmatmul.msk.bf16.vlgmr.msra.gmra.mxu2 %vm23_vm0, %v2939_v10 }
 0x422   :  { %v1025_v29 = vpop.permute.xlu1 %1024  ;;  %v2992_v20 = vld [vmem:[#allocation1] sm:$0xff] }
 0x423   :  { %2236 = vmatmul.msk.bf16.vlgmr.msra.gmra.mxu0 %vm23_vm0, %v1025_v29  ;;  %2237 = vmatmul.msk.bf16.vlgmr.msra.gmra.mxu1 %vm23_vm0, %v1054_v31  ;;  %1599 = vst [vmem:[#allocation1] ss:$9 sm:$0xff] %v2509_v3  ;;  %v1377_v31 = vpop.permute.xlu2 %1376 }
 0x426   :  { %v1146_v23 = vpop.permute.xlu0 %1145 }
 0x427   :  { %v1151_v35 = vsel %vm23_vm0, %v1146_v23, 0  ;;  %v1382_v23 = vsel %vm316_vm2, %v1377_v31, 0 }
 0x428   :  { %1160 = vmatpush.bf16.xpose.msrb.mxu0 %v1151_v35 }
 0x42a   :  { %v1175_v34 = vpop.permute.xlu1 %1174  ;;  %v1600_v39 = vld [vmem:[#allocation1] sm:$0xff] }
 0x42b   :  { %v1180_v10 = vsel %vm23_vm0, %v1175_v34, 0  ;;  %1604 = vst [vmem:[#allocation1] ss:$9 sm:$0xff] %v2509_v3  ;;  %1602 = vrot.lane.b32.xlu2 %v1600_v39, %s2478_s29 }
 0x42c   :  { %1189 = vmatpush.bf16.xpose.msrb.mxu1 %v1180_v10 }
 0x42e   :  { %2243 = vmatmul.msk.bf16.vlgmr.msrb.gmra.mxu3 %vm23_vm0, %v1228_v21  ;;  %v1170_v59 = vpop.permute.xlu0 %1169 }
 0x42f   :  { %2242 = vmatmul.msk.bf16.vlgmr.msrb.gmra.mxu2 %vm23_vm0, %v1199_v40 }
 0x432   :  { %v1605_v41 = vld [vmem:[#allocation1] sm:$0xff] }
 0x433   :  { %2240 = vmatmul.msk.bf16.vlgmr.msrb.gmra.mxu0 %vm23_vm0, %v1141_v38  ;;  %2241 = vmatmul.msk.bf16.vlgmr.msrb.gmra.mxu1 %vm23_vm0, %v1170_v59  ;;  %1628 = vst [vmem:[#allocation1] ss:$9 sm:$0xff] %v2515_v5  ;;  %v1401_v12 = vpop.permute.xlu1 %1400 }
 0x434   :  { %1607 = vrot.lane.b32.xlu1 %v1605_v41, %s2479_s30  ;;  %v1406_v17 = vsel %vm316_vm2, %v1401_v12, 0  ;;  %1391 = vmatpush.bf16.msra.mxu1 %v1382_v23 }
 0x435   :  { %1415 = vmatpush.bf16.msra.mxu2 %v1406_v17 }
 0x43a   :  { %v1629_v37 = vld [vmem:[#allocation1] sm:$0xff] }
 0x43b   :  { %1633 = vst [vmem:[#allocation1] ss:$9 sm:$0xff] %v2515_v5  ;;  %v1425_v21 = vpop.permute.xlu0 %1424  ;;  %v1353_v38 = vpop.permute.xlu1 %1352 }
 0x43c   :  { %v1430_v29 = vsel %vm316_vm2, %v1425_v21, 0  ;;  %v1358_v39 = vsel %vm316_vm2, %v1353_v38, 0 }
 0x43d   :  { %1439 = vmatpush.bf16.msra.mxu3 %v1430_v29  ;;  %1367 = vmatpush.bf16.msra.mxu0 %v1358_v39 }
 0x442   :  { %v1634_v30 = vld [vmem:[#allocation1] sm:$0xff] }
 0x443   :  { %1636 = vrot.lane.b32.xlu0 %v1634_v30, %s2479_s30  ;;  %1657 = vst [vmem:[#allocation1] ss:$9 sm:$0xff] %v2521_v7 }
 0x44a   :  { %v3009_v45 = vld [vmem:[#allocation1] sm:$0xff] }
 0x44b   :  { %1662 = vst [vmem:[#allocation1] ss:$9 sm:$0xff] %v2521_v7  ;;  %1631 = vrot.lane.b32.xlu0 %v1629_v37, %s2478_s29 }
 0x44e   :  { %v3007_v42 = vpop.f32.mrf.mxu1 }
 0x452   :  { %v3013_v6 = vld [vmem:[#allocation1] sm:$0xff] }
 0x453   :  { %1686 = vst [vmem:[#allocation1] ss:$9 sm:$0xff] %v2527_v9  ;;  %1549 = vrot.lane.b32.xlu0 %v1547_v36, %s2479_s30 }
 0x455   :  { %v1449_v41 = vpop.permute.xlu0 %1448 }
 0x456   :  { %v875_v14 = vpop.f32.mrf.mxu1  ;;  %v1454_v37 = vsel %vm316_vm2, %v1449_v41, 0 }
 0x457   :  { %1463 = vmatpush.bf16.msrb.mxu0 %v1454_v37 }
 0x45a   :  { %v3017_v47 = vld [vmem:[#allocation1] sm:$0xff] }
 0x45b   :  { %1691 = vst [vmem:[#allocation1] ss:$9 sm:$0xff] %v2527_v9 }
 0x462   :  { %v3024_v4 = vld [vmem:[#allocation1] sm:$0xff] }
 0x463   :  { %v3020_v2 = vpop.f32.mrf.mxu0  ;;  %1715 = vst [vmem:[#allocation1] ss:$9 sm:$0xff] %v2533_v11 }
 0x464   :  { %v2282_v49 = vpack.i.bf16 %v3007_v42, %v3020_v2 }
 0x46b   :  { %v851_v51 = vpop.f32.mrf.mxu0 }
 0x473   :  { %v3027_v53 = vpop.f32.mrf.mxu1 }
 0x474   :  { %v3029_v33 = vpop.f32.mrf.mxu0 }
 0x475   :  { %v2292_v60 = vpack.i.bf16 %v3027_v53, %v3029_v33 }
 0x47b   :  { %v971_v27 = vpop.f32.mrf.mxu1 }
 0x47c   :  { %v947_v16 = vpop.f32.mrf.mxu0 }
 0x481   :  { %v3033_v28 = vpop.f32.mrf.mxu3 }
 0x482   :  { %v3035_v62 = vpop.f32.mrf.mxu2 }
 0x483   :  { %v2287_v54 = vpack.i.bf16 %v3033_v28, %v3035_v62 }
 0x485   :  { %v3087_v41 = vpop.permute.xlu2 %1602 }
 0x489   :  { %v923_v25 = vpop.f32.mrf.mxu3 }
 0x48a   :  { %v899_v15 = vpop.f32.mrf.mxu2 }
 0x491   :  { %v3039_v19 = vpop.f32.mrf.mxu3 }
 0x492   :  { %v3041_v55 = vpop.f32.mrf.mxu2 }
 0x493   :  { %v2297_v24 = vpack.i.bf16 %v3039_v19, %v3041_v55 }
 0x499   :  { %v1019_v46 = vpop.f32.mrf.mxu3 }
 0x49a   :  { %v995_v18 = vpop.f32.mrf.mxu2  ;;  %v1497_v46 = vpop.permute.xlu1 %1496 }
 0x49b   :  { %v1473_v18 = vpop.permute.xlu0 %1472 }
 0x4a0   :  { %v3045_v32 = vpop.f32.mrf.mxu0  ;;  %v3047_v22 = vpop.f32.mrf.mxu1 }
 0x4a1   :  { %v3049_v63 = vpop.f32.mrf.mxu3  ;;  %v1256_v40 = vsel %vm210_vm1, %v3047_v22, -inf  ;;  %v1253_v26 = vsel %vm210_vm1, %v3045_v32, -inf }
 0x4a2   :  { %v3055_v36 = vpop.f32.mrf.mxu2  ;;  %1257 = vmax.xlane.f32.xlu2 %v1256_v40  ;;  %1254 = vmax.xlane.f32.xlu0 %v1253_v26  ;;  %v1502_v40 = vsel %vm316_vm2, %v1497_v46, 0  ;;  %v1478_v26 = vsel %vm316_vm2, %v1473_v18, 0  ;;  %v1262_v31 = vsel %vm210_vm1, %v3049_v63, -inf  ;;  %v3091_v18 = vld [vmem:[#allocation1] sm:$0xff] }
 0x4a3   :  { %1511 = vmatpush.bf16.msrb.mxu2 %v1502_v40  ;;  %1487 = vmatpush.bf16.msrb.mxu1 %v1478_v26  ;;  %v1259_v29 = vsel %vm210_vm1, %v3055_v36, -inf  ;;  %1720 = vst [vmem:[#allocation1] ss:$9 sm:$0xff] %v2533_v11 }
 0x4a8   :  { %v1048_v35 = vpop.f32.mrf.mxu0  ;;  %v1077_v34 = vpop.f32.mrf.mxu1 }
 0x4a9   :  { %v1135_v10 = vpop.f32.mrf.mxu3  ;;  %v1521_v35 = vpop.permute.xlu1 %1520 }
 0x4aa   :  { %v1106_v59 = vpop.f32.mrf.mxu2  ;;  %v1526_v34 = vsel %vm316_vm2, %v1521_v35, 0 }
 0x4ab   :  { %1535 = vmatpush.bf16.msrb.mxu3 %v1526_v34 }
 0x4b0   :  { %v1162_v30 = vpop.f32.mrf.mxu0  ;;  %v1191_v14 = vpop.f32.mrf.mxu1 }
 0x4b1   :  { %v3062_v51 = vpop.f32.mrf.mxu3  ;;  %v1265_v27 = vsel %vm210_vm1, %v1162_v30, -inf  ;;  %v1268_v16 = vsel %vm210_vm1, %v1191_v14, -inf }
 0x4b2   :  { %v3066_v25 = vpop.f32.mrf.mxu2  ;;  %1266 = vmax.xlane.f32.xlu2 %v1265_v27  ;;  %1269 = vmax.xlane.f32.xlu1 %v1268_v16  ;;  %v1274_v15 = vsel %vm210_vm1, %v3062_v51, -inf }
 0x4b3   :  { %1275 = vmax.xlane.f32.xlu0 %v1274_v15  ;;  %v1271_v10 = vsel %vm210_vm1, %v3066_v25, -inf }
 0x4b5   :  { %v3081_v59 = vpop.permute.xlu0 %1636 }
 0x4b8   :  { %v1193_v12 = vpop.f32.mrf.mxu1  ;;  %v1164_v17 = vpop.f32.mrf.mxu0 }
 0x4b9   :  { %v1251_v21 = vpop.f32.mrf.mxu3  ;;  %v1721_v17 = vld [vmem:[#allocation1] sm:$0xff] }
 0x4ba   :  { %v1222_v23 = vpop.f32.mrf.mxu2  ;;  %1263 = vmax.xlane.f32.xlu2 %v1262_v31  ;;  %1260 = vmax.xlane.f32.xlu1 %v1259_v29  ;;  %1744 = vst [vmem:[#allocation1] ss:$9 sm:$0xff] %v2539_v13 }
 0x4bd   :  { %v3083_v38 = vpop.permute.xlu0 %1631 }
 0x4c2   :  { %1272 = vmax.xlane.f32.xlu1 %v1271_v10  ;;  %v1745_v10 = vld [vmem:[#allocation1] sm:$0xff] }
 0x4c3   :  { %1749 = vst [vmem:[#allocation1] ss:$9 sm:$0xff] %v2539_v13 }
 0x4c5   :  { %v3085_v39 = vpop.permute.xlu0 %1549 }
 0x4db   :  { %1578 = vrot.lane.b32.xlu1 %v2992_v20, %s2479_s30  ;;  %v3094_v20 = vpop.permute.xlu1 %1607 }
 0x515   :  { %v1255_v37 = vpop.xlane.xlu0 %1254  ;;  %v1258_v27 = vpop.xlane.xlu2 %1257 }
 0x516   :  { %v1277_v16 = vsub.f32 %v3045_v32, %v1255_v37  ;;  %v1278_v46 = vsub.f32 %v3047_v22, %v1258_v27 }
 0x518   :  { %v1285_v15 = vmul.f32 1.442695, %v1277_v16  ;;  %v1287_v40 = vmul.f32 1.442695, %v1278_v46 }
 0x51a   :  { %2406 = vpow2.f32 %v1285_v15 }
 0x51b   :  { %2408 = vpow2.f32 %v1287_v40 }
 0x520   :  { %v3096_v26 = vpop.eup %2406 }
 0x521   :  { %v1301_v12 = vsel %vm210_vm1, %v3096_v26, 0.0  ;;  %v3101_v29 = vpop.eup %2408 }
 0x522   :  { %1302 = vadd.xlane.f32.xlu2 %v1301_v12  ;;  %v1304_v34 = vsel %vm210_vm1, %v3101_v29, 0.0 }
 0x525   :  { %v1267_v32 = vpop.xlane.xlu2 %1266  ;;  %v1270_v22 = vpop.xlane.xlu1 %1269 }
 0x526   :  { %v1281_v21 = vsub.f32 %v1162_v30, %v1267_v32  ;;  %v1282_v31 = vsub.f32 %v1191_v14, %v1270_v22  ;;  %v1750_v22 = vld [vmem:[#allocation1] sm:$0xff] }
 0x527   :  { %1869 = vst [vmem:[#allocation1] ss:$9 sm:$0xff] %v2497_v0  ;;  %v1276_v0 = vpop.xlane.xlu0 %1275 }
 0x528   :  { %v1293_v23 = vmul.f32 1.442695, %v1281_v21  ;;  %v1295_v35 = vmul.f32 1.442695, %v1282_v31 }
 0x52a   :  { %2410 = vpow2.f32 %v1293_v23  ;;  %1305 = vadd.xlane.f32.xlu2 %v1304_v34  ;;  %v1284_v34 = vsub.f32 %v3062_v51, %v1276_v0 }
 0x52b   :  { %2412 = vpow2.f32 %v1295_v35 }
 0x52d   :  { %v1264_v37 = vpop.xlane.xlu2 %1263  ;;  %v1261_v27 = vpop.xlane.xlu1 %1260 }
 0x52e   :  { %v1280_v16 = vsub.f32 %v3049_v63, %v1264_v37  ;;  %v1279_v30 = vsub.f32 %v3055_v36, %v1261_v27  ;;  %v3125_v23 = vld [vmem:[#allocation1] sm:$0xff]  ;;  %v1299_v27 = vmul.f32 1.442695, %v1284_v34 }
 0x52f   :  { %1893 = vst [vmem:[#allocation1] ss:$9 sm:$0xff] %v2503_v1 }
 0x530   :  { %v3108_v14 = vpop.eup %2410  ;;  %v1291_v15 = vmul.f32 1.442695, %v1280_v16  ;;  %v1289_v46 = vmul.f32 1.442695, %v1279_v30 }
 0x531   :  { %v3110_v40 = vpop.eup %2412  ;;  %v1313_v12 = vsel %vm210_vm1, %v3108_v14, 0.0 }
 0x532   :  { %2414 = vpow2.f32 %v1291_v15  ;;  %1314 = vadd.xlane.f32.xlu1 %v1313_v12  ;;  %v1316_v32 = vsel %vm210_vm1, %v3110_v40, 0.0 }
 0x533   :  { %2416 = vpow2.f32 %v1289_v46  ;;  %1317 = vadd.xlane.f32.xlu2 %v1316_v32 }
 0x534   :  { %2418 = vpow2.f32 %v1299_v27 }
 0x535   :  { %v1273_v1 = vpop.xlane.xlu1 %1272 }
 0x536   :  { %v3128_v35 = vld [vmem:[#allocation1] sm:$0xff]  ;;  %v1283_v37 = vsub.f32 %v3066_v25, %v1273_v1 }
 0x537   :  { %1917 = vst [vmem:[#allocation1] ss:$9 sm:$0xff] %v2509_v3 }
 0x538   :  { %v3117_v63 = vpop.eup %2414  ;;  %v1297_v3 = vmul.f32 1.442695, %v1283_v37 }
 0x539   :  { %v3119_v36 = vpop.eup %2416  ;;  %v1310_v21 = vsel %vm210_vm1, %v3117_v63, 0.0 }
 0x53a   :  { %v1307_v31 = vsel %vm210_vm1, %v3119_v36, 0.0  ;;  %2420 = vpow2.f32 %v1297_v3 }
 0x53b   :  { %1308 = vadd.xlane.f32.xlu0 %v1307_v31  ;;  %1311 = vadd.xlane.f32.xlu2 %v1310_v21 }
 0x54b   :  { %1544 = vrot.lane.b32.xlu1 %v2977_v61, %s2478_s29  ;;  %v3140_v61 = vpop.eup %2418 }
 0x54d   :  { %v1579_v16 = vpop.permute.xlu1 %1578 }
 0x54f   :  { %1723 = vrot.lane.b32.xlu0 %v1721_v17, %s2479_s30  ;;  %v3142_v17 = vpop.eup %2420 }
 0x553   :  { %1752 = vrot.lane.b32.xlu2 %v1750_v22, %s2479_s30  ;;  %1747 = vrot.lane.b32.xlu1 %v1745_v10, %s2478_s29  ;;  %v1322_v10 = vsel %vm210_vm1, %v3140_v61, 0.0 }
 0x55b   :  { %1660 = vrot.lane.b32.xlu1 %v3009_v45, %s2478_s29  ;;  %v1319_v45 = vsel %vm210_vm1, %v3142_v17, 0.0 }
 0x579   :  { %1323 = vadd.xlane.f32.xlu0 %v1322_v10 }
 0x57c   :  { %1320 = vadd.xlane.f32.xlu2 %v1319_v45 }
 0x58d   :  { %1573 = vrot.lane.b32.xlu0 %v2986_v8, %s2478_s29 }
 0x594   :  { %1718 = vrot.lane.b32.xlu2 %v3091_v18, %s2478_s29  ;;  %v1555_v18 = vsel %vm23_vm0, %v3085_v39, 0 }
 0x595   :  { %1665 = vrot.lane.b32.xlu0 %v3013_v6, %s2479_s30  ;;  %v1303_v51 = vpop.xlane.xlu2 %1302 }
 0x596   :  { %2422 = vrcp.f32 %v1303_v51  ;;  %v1613_v51 = vsel %vm23_vm0, %v3094_v20, 0 }
 0x59c   :  { %1694 = vrot.lane.b32.xlu2 %v3024_v4, %s2479_s30  ;;  %v2423_v25 = vpop.eup %2422 }
 0x59d   :  { %1689 = vrot.lane.b32.xlu0 %v3017_v47, %s2478_s29  ;;  %v1333_v30 = vmul.f32 %v2423_v25, %v3096_v26  ;;  %v1306_v15 = vpop.xlane.xlu2 %1305  ;;  %v1584_v47 = vsel %vm23_vm0, %v1579_v16, 0 }
 0x59e   :  { %2424 = vrcp.f32 %v1306_v15 }
 0x59f   :  { %v1341_v8 = vpack.c.bf16 %v1333_v30, %v1333_v30 }
 0x5a1   :  { %2244 = vmatmul.msk.bf16.vlgmr.msra.gmra.mxu0 %vm312_vm3, %v1341_v8 }
 0x5a2   :  { %1564 = vmatpush.bf16.xpose.msra.mxu0 %v1555_v18 }
 0x5a4   :  { %v2425_v6 = vpop.eup %2424 }
 0x5a5   :  { %v1315_v46 = vpop.xlane.xlu1 %1314  ;;  %v1334_v4 = vmul.f32 %v2425_v6, %v3101_v29 }
 0x5a6   :  { %2426 = vrcp.f32 %v1315_v46  ;;  %v1318_v12 = vpop.xlane.xlu2 %1317 }
 0x5a7   :  { %v1342_v32 = vpack.c.bf16 %v1334_v4, %v1334_v4  ;;  %2428 = vrcp.f32 %v1318_v12 }
 0x5a9   :  { %2245 = vmatmul.msk.bf16.vlgmr.msra.gmra.mxu1 %vm312_vm3, %v1342_v32 }
 0x5aa   :  { %1593 = vmatpush.bf16.xpose.msra.mxu1 %v1584_v47 }
 0x5ac   :  { %v2427_v26 = vpop.eup %2426 }
 0x5ad   :  { %v1337_v22 = vmul.f32 %v2427_v26, %v3108_v14  ;;  %v2429_v0 = vpop.eup %2428  ;;  %v1642_v14 = vsel %vm23_vm0, %v3081_v59, 0 }
 0x5ae   :  { %v1312_v39 = vpop.xlane.xlu2 %1311  ;;  %v1309_v21 = vpop.xlane.xlu0 %1308  ;;  %v1338_v29 = vmul.f32 %v2429_v0, %v3110_v40 }
 0x5af   :  { %v1345_v31 = vpack.c.bf16 %v1337_v22, %v1337_v22  ;;  %2430 = vrcp.f32 %v1312_v39 }
 0x5b0   :  { %2432 = vrcp.f32 %v1309_v21  ;;  %v1346_v3 = vpack.c.bf16 %v1338_v29, %v1338_v29 }
 0x5b1   :  { %2248 = vmatmul.msk.bf16.vlgmr.msrb.gmra.mxu0 %vm312_vm3, %v1345_v31  ;;  %v1918_v31 = vld [vmem:[#allocation1] sm:$0xff] }
 0x5b2   :  { %1920 = vrot.lane.b32.xlu2 %v1918_v31, %s2480_s2  ;;  %1941 = vst [vmem:[#allocation1] ss:$9 sm:$0xff] %v2515_v5 }
 0x5b5   :  { %v2431_v34 = vpop.eup %2430 }
 0x5b6   :  { %v2433_v1 = vpop.eup %2432  ;;  %v1336_v37 = vmul.f32 %v2431_v34, %v3117_v63 }
 0x5b7   :  { %v1335_v27 = vmul.f32 %v2433_v1, %v3119_v36  ;;  %v1753_v36 = vpop.permute.xlu2 %1752 }
 0x5b8   :  { %v1344_v10 = vpack.c.bf16 %v1336_v37, %v1336_v37  ;;  %v1758_v6 = vsel %vm23_vm0, %v1753_v36, 0 }
 0x5b9   :  { %v1343_v45 = vpack.c.bf16 %v1335_v27, %v1335_v27  ;;  %2249 = vmatmul.msk.bf16.vlgmr.msrb.gmra.mxu1 %vm312_vm3, %v1346_v3  ;;  %v1942_v31 = vld [vmem:[#allocation1] sm:$0xff] }
 0x5ba   :  { %2247 = vmatmul.msk.bf16.vlgmr.msra.gmra.mxu3 %vm312_vm3, %v1344_v10  ;;  %1965 = vst [vmem:[#allocation1] ss:$9 sm:$0xff] %v2521_v7 }
 0x5bb   :  { %2246 = vmatmul.msk.bf16.vlgmr.msra.gmra.mxu2 %vm312_vm3, %v1343_v45  ;;  %1651 = vmatpush.bf16.xpose.msra.mxu3 %v1642_v14 }
 0x5bc   :  { %1622 = vmatpush.bf16.xpose.msra.mxu2 %v1613_v51 }
 0x5bd   :  { %v1545_v40 = vpop.permute.xlu1 %1544 }
 0x5c1   :  { %2252 = vmatmul.msk.bf16.vlgmr.msra.gmra.mxu0 %vm23_vm0, %v1545_v40  ;;  %v1724_v63 = vpop.permute.xlu0 %1723 }
 0x5c2   :  { %v1729_v4 = vsel %vm23_vm0, %v1724_v63, 0 }
 0x5ec   :  { %v1324_v25 = vpop.xlane.xlu0 %1323 }
 0x5ed   :  { %2434 = vrcp.f32 %v1324_v25 }
 0x5ef   :  { %v1321_v16 = vpop.xlane.xlu2 %1320 }
 0x5f0   :  { %2436 = vrcp.f32 %v1321_v16 }
 0x5f3   :  { %v2435_v59 = vpop.eup %2434 }
 0x5f4   :  { %v1340_v30 = vmul.f32 %v2435_v59, %v3140_v61 }
 0x5f6   :  { %v2437_v15 = vpop.eup %2436  ;;  %v1348_v8 = vpack.c.bf16 %v1340_v30, %v1340_v30 }
 0x5f7   :  { %v1339_v20 = vmul.f32 %v2437_v15, %v3142_v17  ;;  %v1719_v18 = vpop.permute.xlu2 %1718  ;;  %v1748_v17 = vpop.permute.xlu1 %1747 }
 0x5f8   :  { %2251 = vmatmul.msk.bf16.vlgmr.msrb.gmra.mxu3 %vm312_vm3, %v1348_v8 }
 0x5f9   :  { %v1347_v46 = vpack.c.bf16 %v1339_v20, %v1339_v20  ;;  %1767 = vmatpush.bf16.xpose.msrb.mxu3 %v1758_v6 }
 0x5fb   :  { %2250 = vmatmul.msk.bf16.vlgmr.msrb.gmra.mxu2 %vm312_vm3, %v1347_v46 }
 0x5fc   :  { %1738 = vmatpush.bf16.xpose.msrb.mxu2 %v1729_v4 }
 0x5ff   :  { %v1574_v12 = vpop.permute.xlu0 %1573  ;;  %v1695_v32 = vpop.permute.xlu2 %1694 }
 0x600   :  { %2253 = vmatmul.msk.bf16.vlgmr.msra.gmra.mxu1 %vm23_vm0, %v1574_v12  ;;  %v1700_v61 = vsel %vm23_vm0, %v1695_v32, 0  ;;  %v1661_v22 = vpop.permute.xlu1 %1660 }
 0x601   :  { %1709 = vmatpush.bf16.xpose.msrb.mxu1 %v1700_v61 }
 0x607   :  { %v1666_v47 = vpop.permute.xlu0 %1665 }
 0x608   :  { %v1671_v26 = vsel %vm23_vm0, %v1666_v47, 0  ;;  %2255 = vmatmul.msk.bf16.vlgmr.msra.gmra.mxu3 %vm23_vm0, %v3083_v38 }
 0x609   :  { %1680 = vmatpush.bf16.xpose.msrb.mxu0 %v1671_v26 }
 0x60b   :  { %2254 = vmatmul.msk.bf16.vlgmr.msra.gmra.mxu2 %vm23_vm0, %v3087_v41 }
 0x60f   :  { %v1690_v39 = vpop.permute.xlu0 %1689 }
 0x610   :  { %2256 = vmatmul.msk.bf16.vlgmr.msrb.gmra.mxu0 %vm23_vm0, %v1661_v22  ;;  %2257 = vmatmul.msk.bf16.vlgmr.msrb.gmra.mxu1 %vm23_vm0, %v1690_v39 }
 0x618   :  { %2259 = vmatmul.msk.bf16.vlgmr.msrb.gmra.mxu3 %vm23_vm0, %v1748_v17 }
 0x61b   :  { %2258 = vmatmul.msk.bf16.vlgmr.msrb.gmra.mxu2 %vm23_vm0, %v1719_v18 }
 0x61e   :  { %v3195_v21 = vpop.f32.mrf.mxu0 }
 0x626   :  { %v1371_v0 = vpop.f32.mrf.mxu0  ;;  %v3197_v29 = vpop.f32.mrf.mxu1 }
 0x627   :  { %v2302_v38 = vpack.i.bf16 %v3197_v29, %v3195_v21  ;;  %v1921_v0 = vpop.permute.xlu2 %1920 }
 0x62e   :  { %v1395_v41 = vpop.f32.mrf.mxu1  ;;  %v3203_v34 = vpop.f32.mrf.mxu0 }
 0x62f   :  { %v1926_v41 = vsel %vm316_vm2, %v1921_v0, 0 }
 0x630   :  { %1935 = vmatpush.bf16.msra.mxu2 %v1926_v41 }
 0x636   :  { %v1467_v1 = vpop.f32.mrf.mxu0  ;;  %v3205_v37 = vpop.f32.mrf.mxu1 }
 0x637   :  { %v2312_v27 = vpack.i.bf16 %v3205_v37, %v3203_v34 }
 0x63d   :  { %v3209_v3 = vpop.f32.mrf.mxu3 }
 0x63e   :  { %v3211_v10 = vpop.f32.mrf.mxu2  ;;  %v1491_v5 = vpop.f32.mrf.mxu1 }
 0x63f   :  { %v2307_v45 = vpack.i.bf16 %v3209_v3, %v3211_v10  ;;  %v1566_v14 = vpop.f32.mrf.mxu0 }
 0x640   :  { %v1773_v51 = vsel %vm210_vm1, %v1566_v14, -inf }
 0x641   :  { %1774 = vmax.xlane.f32.xlu0 %v1773_v51 }
 0x645   :  { %v1443_v40 = vpop.f32.mrf.mxu3 }
 0x646   :  { %v1419_v63 = vpop.f32.mrf.mxu2 }
 0x647   :  { %v1568_v36 = vpop.f32.mrf.mxu0  ;;  %v3239_v63 = vld [vmem:[#allocation1] sm:$0xff] }
 0x648   :  { %1989 = vst [vmem:[#allocation1] ss:$9 sm:$0xff] %v2527_v9 }
 0x655   :  { %1872 = vrot.lane.b32.xlu0 %v3125_v23, %s2480_s2 }
 0x67b   :  { %v3218_v25 = vpop.f32.mrf.mxu3 }
 0x67d   :  { %v1595_v16 = vpop.f32.mrf.mxu1 }
 0x67e   :  { %v3220_v59 = vpop.f32.mrf.mxu2  ;;  %v1776_v30 = vsel %vm210_vm1, %v1595_v16, -inf }
 0x67f   :  { %v2317_v15 = vpack.i.bf16 %v3218_v25, %v3220_v59  ;;  %1777 = vmax.xlane.f32.xlu2 %v1776_v30 }
 0x683   :  { %v1539_v8 = vpop.f32.mrf.mxu3 }
 0x684   :  { %v3242_v8 = vld [vmem:[#allocation1] sm:$0xff] }
 0x685   :  { %v1597_v20 = vpop.f32.mrf.mxu1  ;;  %2013 = vst [vmem:[#allocation1] ss:$9 sm:$0xff] %v2533_v11 }
 0x686   :  { %v1515_v18 = vpop.f32.mrf.mxu2 }
 0x68b   :  { %v3225_v6 = vpop.f32.mrf.mxu3 }
 0x68c   :  { %v1782_v22 = vsel %vm210_vm1, %v3225_v6, -inf  ;;  %v3247_v7 = vld [vmem:[#allocation1] sm:$0xff] }
 0x68d   :  { %v1682_v46 = vpop.f32.mrf.mxu0  ;;  %v1711_v4 = vpop.f32.mrf.mxu1  ;;  %2037 = vst [vmem:[#allocation1] ss:$9 sm:$0xff] %v2539_v13 }
 0x68e   :  { %v3227_v12 = vpop.f32.mrf.mxu2  ;;  %v1788_v23 = vsel %vm210_vm1, %v1711_v4, -inf  ;;  %v1785_v32 = vsel %vm210_vm1, %v1682_v46, -inf }
 0x68f   :  { %1789 = vmax.xlane.f32.xlu1 %v1788_v23  ;;  %1786 = vmax.xlane.f32.xlu2 %v1785_v32  ;;  %v1779_v39 = vsel %vm210_vm1, %v3227_v12, -inf }
 0x693   :  { %v1655_v61 = vpop.f32.mrf.mxu3 }
 0x695   :  { %v1684_v17 = vpop.f32.mrf.mxu0  ;;  %v1713_v47 = vpop.f32.mrf.mxu1 }
 0x696   :  { %v1626_v26 = vpop.f32.mrf.mxu2 }
 0x697   :  { %1783 = vmax.xlane.f32.xlu1 %v1782_v22  ;;  %1780 = vmax.xlane.f32.xlu2 %v1779_v39 }
 0x69b   :  { %v1769_v1 = vpop.f32.mrf.mxu3 }
 0x69c   :  { %v1794_v5 = vsel %vm210_vm1, %v1769_v1, -inf }
 0x69d   :  { %1795 = vmax.xlane.f32.xlu0 %v1794_v5 }
 0x69e   :  { %v1740_v51 = vpop.f32.mrf.mxu2 }
 0x69f   :  { %v1791_v40 = vsel %vm210_vm1, %v1740_v51, -inf }
 0x6a0   :  { %1792 = vmax.xlane.f32.xlu1 %v1791_v40 }
 0x6a3   :  { %v1771_v36 = vpop.f32.mrf.mxu3 }
 0x6a6   :  { %v1742_v30 = vpop.f32.mrf.mxu2 }
 0x6af   :  { %1896 = vrot.lane.b32.xlu2 %v3128_v35, %s2480_s2 }
 0x6b4   :  { %v1775_v20 = vpop.xlane.xlu0 %1774 }
 0x6b5   :  { %v1797_v9 = vsub.f32 %v1566_v14, %v1775_v20 }
 0x6b7   :  { %v1805_v32 = vmul.f32 1.442695, %v1797_v9 }
 0x6b9   :  { %1944 = vrot.lane.b32.xlu1 %v1942_v31, %s2480_s2  ;;  %2438 = vpow2.f32 %v1805_v32 }
 0x6bf   :  { %v3252_v61 = vpop.eup %2438 }
 0x6c0   :  { %v1821_v11 = vsel %vm210_vm1, %v3252_v61, 0.0 }
 0x6c7   :  { %v1873_v18 = vpop.permute.xlu0 %1872 }
 0x6c8   :  { %v1878_v23 = vsel %vm316_vm2, %v1873_v18, 0 }
 0x6c9   :  { %1887 = vmatpush.bf16.msra.mxu0 %v1878_v23 }
 0x6e3   :  { %1822 = vadd.xlane.f32.xlu1 %v1821_v11 }
 0x6f2   :  { %v1778_v35 = vpop.xlane.xlu2 %1777 }
 0x6f3   :  { %v1798_v17 = vsub.f32 %v1595_v16, %v1778_v35 }
 0x6f5   :  { %v1807_v47 = vmul.f32 1.442695, %v1798_v17 }
 0x6f7   :  { %2440 = vpow2.f32 %v1807_v47 }
 0x6fd   :  { %v3256_v13 = vpop.eup %2440 }
 0x6fe   :  { %v1824_v26 = vsel %vm210_vm1, %v3256_v13, 0.0 }
 0x6ff   :  { %1825 = vadd.xlane.f32.xlu0 %v1824_v26 }
 0x702   :  { %v1790_v22 = vpop.xlane.xlu1 %1789  ;;  %v1787_v14 = vpop.xlane.xlu2 %1786 }
 0x703   :  { %v1802_v39 = vsub.f32 %v1711_v4, %v1790_v22  ;;  %v1801_v31 = vsub.f32 %v1682_v46, %v1787_v14 }
 0x705   :  { %v1815_v0 = vmul.f32 1.442695, %v1802_v39  ;;  %v1813_v41 = vmul.f32 1.442695, %v1801_v31 }
 0x707   :  { %2442 = vpow2.f32 %v1815_v0 }
 0x708   :  { %2444 = vpow2.f32 %v1813_v41 }
 0x70a   :  { %v1784_v5 = vpop.xlane.xlu1 %1783  ;;  %v1781_v40 = vpop.xlane.xlu2 %1780 }
 0x70b   :  { %v1800_v16 = vsub.f32 %v3225_v6, %v1784_v5  ;;  %v1799_v36 = vsub.f32 %v3227_v12, %v1781_v40  ;;  %v2038_v5 = vld [vmem:[#allocation1] sm:$0xff] }
 0x70d   :  { %v3262_v30 = vpop.eup %2442  ;;  %v1811_v20 = vmul.f32 1.442695, %v1800_v16  ;;  %v1809_v18 = vmul.f32 1.442695, %v1799_v36 }
 0x70e   :  { %v3264_v23 = vpop.eup %2444  ;;  %v1836_v4 = vsel %vm210_vm1, %v3262_v30, 0.0 }
 0x70f   :  { %2446 = vpow2.f32 %v1811_v20  ;;  %1837 = vadd.xlane.f32.xlu0 %v1836_v4  ;;  %v1833_v46 = vsel %vm210_vm1, %v3264_v23, 0.0 }
 0x710   :  { %2448 = vpow2.f32 %v1809_v18  ;;  %1834 = vadd.xlane.f32.xlu2 %v1833_v46  ;;  %v1796_v9 = vpop.xlane.xlu0 %1795 }
 0x711   :  { %v1804_v6 = vsub.f32 %v1769_v1, %v1796_v9 }
 0x712   :  { %v1897_v31 = vpop.permute.xlu2 %1896 }
 0x713   :  { %v1819_v32 = vmul.f32 1.442695, %v1804_v6  ;;  %v1793_v12 = vpop.xlane.xlu1 %1792  ;;  %v1902_v0 = vsel %vm316_vm2, %v1897_v31, 0 }
 0x714   :  { %v1803_v11 = vsub.f32 %v1740_v51, %v1793_v12  ;;  %1911 = vmatpush.bf16.msra.mxu1 %v1902_v0 }
 0x715   :  { %v2447_v35 = vpop.eup %2446  ;;  %2450 = vpow2.f32 %v1819_v32 }
 0x716   :  { %v2449_v17 = vpop.eup %2448  ;;  %v1817_v47 = vmul.f32 1.442695, %v1803_v11  ;;  %v1830_v26 = vsel %vm210_vm1, %v2447_v35, 0.0 }
 0x717   :  { %v1827_v22 = vsel %vm210_vm1, %v2449_v17, 0.0 }
 0x718   :  { %2452 = vpow2.f32 %v1817_v47  ;;  %1831 = vadd.xlane.f32.xlu2 %v1830_v26  ;;  %1828 = vadd.xlane.f32.xlu0 %v1827_v22 }
 0x71b   :  { %v3272_v14 = vpop.eup %2450 }
 0x71c   :  { %v1842_v39 = vsel %vm210_vm1, %v3272_v14, 0.0 }
 0x71d   :  { %1843 = vadd.xlane.f32.xlu1 %v1842_v39 }
 0x71e   :  { %v3276_v1 = vpop.eup %2452 }
 0x71f   :  { %v1839_v51 = vsel %vm210_vm1, %v3276_v1, 0.0 }
 0x720   :  { %1840 = vadd.xlane.f32.xlu0 %v1839_v51 }
 0x72b   :  { %v1945_v41 = vpop.permute.xlu1 %1944 }
 0x72c   :  { %v1950_v40 = vsel %vm316_vm2, %v1945_v41, 0 }
 0x72d   :  { %1959 = vmatpush.bf16.msra.mxu3 %v1950_v40 }
 0x730   :  { %2040 = vrot.lane.b32.xlu2 %v2038_v5, %s2480_s2 }
 0x734   :  { %1968 = vrot.lane.b32.xlu0 %v3239_v63, %s2480_s2 }
 0x736   :  { %2016 = vrot.lane.b32.xlu1 %v3247_v7, %s2480_s2 }
 0x738   :  { %2288 = vrot.lane.b32.xlu2 %v2287_v54, %s2481_s3 }
 0x73c   :  { %1992 = vrot.lane.b32.xlu0 %v3242_v8, %s2480_s2 }
 0x73e   :  { %2283 = vrot.lane.b32.xlu1 %v2282_v49, %s2481_s3 }
 0x740   :  { %2303 = vrot.lane.b32.xlu2 %v2302_v38, %s2482_s4 }
 0x744   :  { %2293 = vrot.lane.b32.xlu0 %v2292_v60, %s2481_s3 }
 0x746   :  { %2298 = vrot.lane.b32.xlu1 %v2297_v24, %s2481_s3 }
 0x748   :  { %2318 = vrot.lane.b32.xlu2 %v2317_v15, %s2482_s4 }
 0x74c   :  { %2308 = vrot.lane.b32.xlu0 %v2307_v45, %s2482_s4 }
 0x74e   :  { %2313 = vrot.lane.b32.xlu1 %v2312_v27, %s2482_s4 }
 0x756   :  { %v1823_v42 = vpop.xlane.xlu1 %1822 }
 0x757   :  { %2454 = vrcp.f32 %v1823_v42 }
 0x75d   :  { %v2455_v2 = vpop.eup %2454 }
 0x75e   :  { %v1853_v49 = vmul.f32 %v2455_v2, %v3252_v61 }
 0x760   :  { %v1861_v53 = vpack.c.bf16 %v1853_v49, %v1853_v49 }
 0x762   :  { %2260 = vmatmul.msk.bf16.vlgmr.msra.gmra.mxu0 %vm312_vm3, %v1861_v53 }
 0x772   :  { %v1826_v33 = vpop.xlane.xlu0 %1825 }
 0x773   :  { %2456 = vrcp.f32 %v1826_v33 }
 0x779   :  { %v2457_v60 = vpop.eup %2456 }
 0x77a   :  { %v1854_v28 = vmul.f32 %v2457_v60, %v3256_v13 }
 0x77c   :  { %v1862_v62 = vpack.c.bf16 %v1854_v28, %v1854_v28 }
 0x77e   :  { %2261 = vmatmul.msk.bf16.vlgmr.msra.gmra.mxu1 %vm312_vm3, %v1862_v62 }
 0x782   :  { %v1838_v54 = vpop.xlane.xlu0 %1837 }
 0x783   :  { %v1835_v19 = vpop.xlane.xlu2 %1834 }
 0x78b   :  { %v1829_v55 = vpop.xlane.xlu0 %1828  ;;  %v1832_v24 = vpop.xlane.xlu2 %1831 }
 0x78c   :  { %2458 = vrcp.f32 %v1829_v55 }
 0x78d   :  { %2460 = vrcp.f32 %v1832_v24 }
 0x790   :  { %v1844_v45 = vpop.xlane.xlu1 %1843 }
 0x791   :  { %2462 = vrcp.f32 %v1844_v45 }
 0x792   :  { %v2459_v21 = vpop.eup %2458  ;;  %2464 = vrcp.f32 %v1835_v19 }
 0x793   :  { %v2461_v29 = vpop.eup %2460  ;;  %v1855_v38 = vmul.f32 %v2459_v21, %v2449_v17  ;;  %v2041_v34 = vpop.permute.xlu2 %2040 }
 0x794   :  { %v1856_v37 = vmul.f32 %v2461_v29, %v2447_v35  ;;  %v2046_v27 = vsel %vm316_vm2, %v2041_v34, 0  ;;  %v1841_v25 = vpop.xlane.xlu0 %1840 }
 0x795   :  { %v1863_v3 = vpack.c.bf16 %v1855_v38, %v1855_v38  ;;  %2055 = vmatpush.bf16.msrb.mxu3 %v2046_v27  ;;  %2466 = vrcp.f32 %v1841_v25 }
 0x796   :  { %v1864_v10 = vpack.c.bf16 %v1856_v37, %v1856_v37  ;;  %2468 = vrcp.f32 %v1838_v54 }
 0x797   :  { %2262 = vmatmul.msk.bf16.vlgmr.msra.gmra.mxu2 %vm312_vm3, %v1863_v3  ;;  %v2463_v59 = vpop.eup %2462 }
 0x798   :  { %2263 = vmatmul.msk.bf16.vlgmr.msra.gmra.mxu3 %vm312_vm3, %v1864_v10  ;;  %v2465_v15 = vpop.eup %2464  ;;  %v1860_v63 = vmul.f32 %v2463_v59, %v3272_v14 }
 0x799   :  { %v1857_v7 = vmul.f32 %v2465_v15, %v3264_v23 }
 0x79a   :  { %v1868_v61 = vpack.c.bf16 %v1860_v63, %v1860_v63 }
 0x79b   :  { %v2467_v8 = vpop.eup %2466  ;;  %v1865_v18 = vpack.c.bf16 %v1857_v7, %v1857_v7  ;;  %v2289_v60 = vpop.permute.xlu2 %2288 }
 0x79c   :  { %v1859_v16 = vmul.f32 %v2467_v8, %v3276_v1  ;;  %v2469_v46 = vpop.eup %2468 }
 0x79d   :  { %v1858_v23 = vmul.f32 %v2469_v46, %v3262_v30 }
 0x79e   :  { %v1867_v9 = vpack.c.bf16 %v1859_v16, %v1859_v16  ;;  %v2291_v16 = vunpack.i.h.bf16 %v2289_v60 }
 0x79f   :  { %v1866_v12 = vpack.c.bf16 %v1858_v23, %v1858_v23 }
 0x7a3   :  { %v2304_v55 = vpop.permute.xlu2 %2303 }
 0x7a4   :  { %v2306_v29 = vunpack.i.h.bf16 %v2304_v55  ;;  %v2305_v38 = vunpack.i.l.bf16 %v2304_v55 }
 0x7a6   :  { %v1969_v13 = vpop.permute.xlu0 %1968 }
 0x7a7   :  { %v1974_v36 = vsel %vm316_vm2, %v1969_v13, 0 }
 0x7a8   :  { %2267 = vmatmul.msk.bf16.vlgmr.msrb.gmra.mxu3 %vm312_vm3, %v1868_v61  ;;  %1983 = vmatpush.bf16.msrb.mxu0 %v1974_v36  ;;  %v2017_v20 = vpop.permute.xlu1 %2016  ;;  %v2290_v36 = vunpack.i.l.bf16 %v2289_v60 }
 0x7a9   :  { %v2022_v4 = vsel %vm316_vm2, %v2017_v20, 0 }
 0x7aa   :  { %2031 = vmatpush.bf16.msrb.mxu2 %v2022_v4 }
 0x7ab   :  { %2264 = vmatmul.msk.bf16.vlgmr.msrb.gmra.mxu0 %vm312_vm3, %v1865_v18  ;;  %v2319_v15 = vpop.permute.xlu2 %2318 }
 0x7ad   :  { %2266 = vmatmul.msk.bf16.vlgmr.msrb.gmra.mxu2 %vm312_vm3, %v1867_v9 }
 0x7ae   :  { %v1993_v6 = vpop.permute.xlu0 %1992 }
 0x7af   :  { %v1998_v32 = vsel %vm316_vm2, %v1993_v6, 0 }
 0x7b0   :  { %2007 = vmatpush.bf16.msrb.mxu1 %v1998_v32  ;;  %v2284_v28 = vpop.permute.xlu1 %2283 }
 0x7b1   :  { %v2286_v54 = vunpack.i.h.bf16 %v2284_v28  ;;  %v2285_v19 = vunpack.i.l.bf16 %v2284_v28 }
 0x7b3   :  { %2265 = vmatmul.msk.bf16.vlgmr.msrb.gmra.mxu1 %vm312_vm3, %v1866_v12  ;;  %v2158_v24 = vsel %vm23_vm0, %v2799_v43, %v2286_v54  ;;  %v2157_v21 = vsel %vm23_vm0, %v2807_v48, %v2285_v19 }
 0x7b4   :  { %v2166_v3 = vsel %vm2165_vm4, %v2157_v21, %v2305_v38  ;;  %v2167_v10 = vsel %vm2165_vm4, %v2158_v24, %v2306_v29 }
 0x7b6   :  { %v2294_v33 = vpop.permute.xlu0 %2293 }
 0x7b7   :  { %v2296_v8 = vunpack.i.h.bf16 %v2294_v33  ;;  %v2295_v7 = vunpack.i.l.bf16 %v2294_v33 }
 0x7b8   :  { %v2299_v48 = vpop.permute.xlu1 %2298 }
 0x7b9   :  { %v2162_v20 = vsel %vm23_vm0, %v2822_v56, %v2296_v8  ;;  %v2161_v18 = vsel %vm23_vm0, %v2818_v50, %v2295_v7 }
 0x7be   :  { %v2309_v62 = vpop.permute.xlu0 %2308 }
 0x7bf   :  { %v2311_v46 = vunpack.i.h.bf16 %v2309_v62  ;;  %v2310_v9 = vunpack.i.l.bf16 %v2309_v62 }
 0x7c0   :  { %v2314_v63 = vpop.permute.xlu1 %2313 }
 0x7c1   :  { %v2316_v61 = vunpack.i.h.bf16 %v2314_v63  ;;  %v2315_v13 = vunpack.i.l.bf16 %v2314_v63 }
 0x7c3   :  { %v2171_v32 = vsel %vm2165_vm4, %v2162_v20, %v2316_v61  ;;  %v2170_v12 = vsel %vm2165_vm4, %v2161_v18, %v2315_v13 }
 0x7df   :  { %v1889_v11 = vpop.f32.mrf.mxu0 }
 0x7e7   :  { %v1891_v35 = vpop.f32.mrf.mxu0 }
 0x7e8   :  { %v2159_v35 = vsel %vm23_vm0, %v2816_v44, %v2290_v36 }
 0x7fb   :  { %v1913_v17 = vpop.f32.mrf.mxu1 }
 0x7fc   :  { %v2322_v47 = vpack.i.bf16 %v1913_v17, %v1889_v11  ;;  %v2160_v11 = vsel %vm23_vm0, %v2820_v52, %v2291_v16 }
 0x7fe   :  { %2323 = vrot.lane.b32.xlu0 %v2322_v47, %s2483_s5 }
 0x803   :  { %v1915_v26 = vpop.f32.mrf.mxu1 }
 0x81a   :  { %v1937_v22 = vpop.f32.mrf.mxu2 }
 0x81b   :  { %v1961_v14 = vpop.f32.mrf.mxu3 }
 0x81c   :  { %v2327_v39 = vpack.i.bf16 %v1961_v14, %v1937_v22 }
 0x81e   :  { %2328 = vrot.lane.b32.xlu1 %v2327_v39, %s2483_s5  ;;  %v2168_v39 = vsel %vm2165_vm4, %v2159_v35, %v2310_v9 }
 0x822   :  { %v1939_v30 = vpop.f32.mrf.mxu2 }
 0x823   :  { %v1963_v1 = vpop.f32.mrf.mxu3  ;;  %v2169_v30 = vsel %vm2165_vm4, %v2160_v11, %v2311_v46 }
 0x828   :  { %v1985_v51 = vpop.f32.mrf.mxu0 }
 0x82b   :  { %v2057_v31 = vpop.f32.mrf.mxu3 }
 0x830   :  { %v1987_v0 = vpop.f32.mrf.mxu0  ;;  %v2009_v41 = vpop.f32.mrf.mxu1 }
 0x831   :  { %v2332_v5 = vpack.i.bf16 %v2009_v41, %v1985_v51  ;;  %v2033_v40 = vpop.f32.mrf.mxu2  ;;  %v2300_v0 = vunpack.i.l.bf16 %v2299_v48 }
 0x832   :  { %v2337_v42 = vpack.i.bf16 %v2057_v31, %v2033_v40  ;;  %v2301_v31 = vunpack.i.h.bf16 %v2299_v48  ;;  %v2321_v40 = vunpack.i.h.bf16 %v2319_v15 }
 0x833   :  { %v2059_v2 = vpop.f32.mrf.mxu3  ;;  %2333 = vrot.lane.b32.xlu2 %v2332_v5, %s2483_s5  ;;  %v2163_v5 = vsel %vm23_vm0, %v2824_v57, %v2300_v0 }
 0x834   :  { %2338 = vrot.lane.b32.xlu0 %v2337_v42, %s2483_s5  ;;  %v2164_v41 = vsel %vm23_vm0, %v2827_v58, %v2301_v31  ;;  %v2320_v42 = vunpack.i.l.bf16 %v2319_v15 }
 0x835   :  { %v2173_v60 = vsel %vm2165_vm4, %v2164_v41, %v2321_v40 }
 0x836   :  { %v2172_v33 = vsel %vm2165_vm4, %v2163_v5, %v2320_v42 }
 0x838   :  { %v2011_v49 = vpop.f32.mrf.mxu1 }
 0x839   :  { %v2035_v53 = vpop.f32.mrf.mxu2 }
 0x870   :  { %v2324_v34 = vpop.permute.xlu0 %2323 }
 0x871   :  { %v2326_v37 = vunpack.i.h.bf16 %v2324_v34  ;;  %v2325_v27 = vunpack.i.l.bf16 %v2324_v34 }
 0x873   :  { %v2175_v45 = vsel %vm2174_vm5, %v2166_v3, %v2325_v27  ;;  %v2176_v25 = vsel %vm2174_vm5, %v2167_v10, %v2326_v37 }
 0x874   :  { %v2183_v43 = vpack.c.bf16 %v2175_v45, %v2175_v45  ;;  %v2184_v59 = vpack.c.bf16 %v2176_v25, %v2176_v25 }
 0x876   :  { %2192 = vst.msk [vmem:[%s3396_s1] sm:$0x1] %vm2191_vm6, %v2183_v43 }
 0x877   :  { %2193 = vst.msk [vmem:[%s3396_s1 + $0x1] sm:$0x1] %vm2191_vm6, %v2184_v59 }
 0x88d   :  { %v2334_v4 = vpop.permute.xlu2 %2333 }
 0x88e   :  { %v2336_v23 = vunpack.i.h.bf16 %v2334_v4  ;;  %v2335_v6 = vunpack.i.l.bf16 %v2334_v4 }
 0x890   :  { %v2180_v56 = vsel %vm2174_vm5, %v2171_v32, %v2336_v23  ;;  %v2179_v17 = vsel %vm2174_vm5, %v2170_v12, %v2335_v6  ;;  %v2329_v50 = vpop.permute.xlu1 %2328 }
 0x891   :  { %v2188_v47 = vpack.c.bf16 %v2180_v56, %v2180_v56  ;;  %v2187_v26 = vpack.c.bf16 %v2179_v17, %v2179_v17  ;;  %v2331_v22 = vunpack.i.h.bf16 %v2329_v50  ;;  %v2330_v14 = vunpack.i.l.bf16 %v2329_v50 }
 0x893   :  { %2197 = vst.msk [vmem:[%s3396_s1 + $0x5] sm:$0x1] %vm2191_vm6, %v2188_v47  ;;  %v2177_v44 = vsel %vm2174_vm5, %v2168_v39, %v2330_v14  ;;  %v2178_v52 = vsel %vm2174_vm5, %v2169_v30, %v2331_v22 }
 0x894   :  { %2196 = vst.msk [vmem:[%s3396_s1 + $0x4] sm:$0x1] %vm2191_vm6, %v2187_v26  ;;  %v2185_v1 = vpack.c.bf16 %v2177_v44, %v2177_v44  ;;  %v2186_v51 = vpack.c.bf16 %v2178_v52, %v2178_v52 }
 0x896   :  { %2194 = vst.msk [vmem:[%s3396_s1 + $0x2] sm:$0x1] %vm2191_vm6, %v2185_v1 }
 0x897   :  { %2195 = vst.msk [vmem:[%s3396_s1 + $0x3] sm:$0x1] %vm2191_vm6, %v2186_v51 }
 0x8a6   :  { %v2339_v2 = vpop.permute.xlu0 %2338 }
 0x8a7   :  { %v2341_v49 = vunpack.i.h.bf16 %v2339_v2  ;;  %v2340_v53 = vunpack.i.l.bf16 %v2339_v2 }
 0x8a9   :  { %v2181_v28 = vsel %vm2174_vm5, %v2172_v33, %v2340_v53  ;;  %v2182_v62 = vsel %vm2174_vm5, %v2173_v60, %v2341_v49 }
 0x8aa   :  { %v2189_v54 = vpack.c.bf16 %v2181_v28, %v2181_v28  ;;  %v2190_v19 = vpack.c.bf16 %v2182_v62, %v2182_v62 }
 0x8ac   :  { %2198 = vst.msk [vmem:[%s3396_s1 + $0x6] sm:$0x1] %vm2191_vm6, %v2189_v54 }
 0x8ad   :  { %2199 = vst.msk [vmem:[%s3396_s1 + $0x7] sm:$0x1] %vm2191_vm6, %v2190_v19 }

// kernel: timesformer_forward.21
= control target key start
LH: loop header
LB: loop body
LE: loop exit
PB: predicated region body
PF: predicated region fallthrough
CT: control target
= control target key end

     0   :  { %s1146_s14 = smov 96   ;;  %s1147_s15 = smov 64   ;;  %vm18_vm0 = vcmask 64512   ;;  %vm165_vm1 = vcmask 1041408   ;;  %vm166_vm2 = vcmask 1042432   ;;  %v1148_v21 = vmov 65535   ;;  %s1456_s0 = inlined_call_operand.vmem [shape: bf16[4,5,96], index: 0, kind: input, shape index: {}]   ;;  %s1457_s1 = inlined_call_operand.vmem [shape: bf16[4,5,32], index: 1, kind: output, shape index: {}]  }
   0x1   :  { %v11_v0 = vld [vmem:[%s1456_s0 + $0x8] sm:$0x7]  ;;  %v9_v1 = vld [vmem:[%s1456_s0] sm:$0x7]  ;;  %v12_v4 = vld [vmem:[%s1456_s0 + $0xc] sm:$0x7] }
   0x2   :  { %v63_v2 = vunpack.c.l.b16 %v11_v0  ;;  %v14_v3 = vunpack.c.l.b16 %v9_v1  ;;  %v10_v5 = vld [vmem:[%s1456_s0 + $0x4] sm:$0x7]  ;;  %v87_v8 = vunpack.c.l.b16 %v12_v4  ;;  %v167_v22 = vsel %vm165_vm1, 4294967295, %v1148_v21  ;;  %s1149_s0 = smov 88   ;;  %s1150_s16 = smov 120  }
   0x3   :  { %v39_v9 = vunpack.c.l.b16 %v10_v5  ;;  %v1205_v23 = vsel %vm166_vm2, %v167_v22, 0  ;;  %vm110_vm3 = vcmask 36864   ;;  %vm161_vm4 = vcmask 39936   ;;  %s1151_s17 = smov 56   ;;  %s1152_s18 = smov 80  }
   0x4   :  { %v1183_v6 = vpack.c.b16 %v63_v2, %v63_v2  ;;  %v1185_v7 = vpack.c.b16 %v14_v3, %v14_v3  ;;  %v1189_v10 = vpack.c.b16 %v87_v8, %v87_v8  ;;  %s1153_s19 = smov 112   ;;  %s1154_s20 = smov 48   ;;  %vm977_vm5 = vcmask 195584  }
   0x5   :  { %v1191_v11 = vpack.c.b16 %v39_v9, %v39_v9  ;;  %s1155_s21 = smov 72   ;;  %s1156_s22 = smov 104   ;;  %vm986_vm6 = vcmask 256000   ;;  %vm987_vm7 = vsmask.f32 2304  ;;  %vm972_vm8 = vcmask 130048  }
   0x6   :  { %65 = vrot.lane.b32.xlu0 %v1183_v6, %s1146_s14  ;;  %16 = vrot.lane.b32.xlu1 %v1185_v7, %s1146_s14  ;;  %s1157_s23 = smov 40   ;;  %s1158_s24 = smov 8   ;;  %vm1410_vm9 = vmand %vm986_vm6, %vm987_vm7 }
   0x7   :  { %206 = vrot.lane.b32.xlu2 %v1183_v6, %s1147_s15  ;;  %s1159_s25 = smov 16   ;;  %s1160_s26 = smov 24  }
   0xe   :  { %89 = vrot.lane.b32.xlu0 %v1189_v10, %s1146_s14  ;;  %41 = vrot.lane.b32.xlu1 %v1191_v11, %s1146_s14 }
  0x61   :  { %v207_v20 = vpop.permute.xlu2 %206 }
  0x62   :  { %v212_v24 = vand.u32 %v207_v20, %v1205_v23 }
  0x78   :  { %v66_v12 = vpop.permute.xlu0 %65  ;;  %v17_v13 = vpop.permute.xlu1 %16 }
  0x79   :  { %v23_v14 = vsel %vm18_vm0, %v17_v13, 0  ;;  %v71_v15 = vsel %vm18_vm0, %v66_v12, 0 }
  0x7a   :  { %32 = vmatpush.bf16.xpose.msra.mxu0 %v23_v14  ;;  %80 = vmatpush.bf16.xpose.msra.mxu2 %v71_v15 }
  0x80   :  { %v90_v16 = vpop.permute.xlu0 %89  ;;  %v42_v17 = vpop.permute.xlu1 %41 }
  0x81   :  { %1005 = vmatmul.msk.bf16.vlgmr.msra.gmra.mxu0 %vm18_vm0, %v9_v1  ;;  %1007 = vmatmul.msk.bf16.vlgmr.msra.gmra.mxu2 %vm18_vm0, %v11_v0  ;;  %v47_v18 = vsel %vm18_vm0, %v42_v17, 0  ;;  %v95_v19 = vsel %vm18_vm0, %v90_v16, 0 }
  0x82   :  { %56 = vmatpush.bf16.xpose.msra.mxu1 %v47_v18  ;;  %104 = vmatpush.bf16.xpose.msra.mxu3 %v95_v19 }
  0x83   :  { %221 = vmatpush.bf16.msrb.mxu2 %v212_v24 }
  0x89   :  { %1006 = vmatmul.msk.bf16.vlgmr.msra.gmra.mxu1 %vm18_vm0, %v10_v5  ;;  %1008 = vmatmul.msk.bf16.vlgmr.msra.gmra.mxu3 %vm18_vm0, %v12_v4 }
  0xfe   :  { %v34_v25 = vpop.f32.mrf.mxu0 }
  0xff   :  { %v111_v26 = vsel %vm110_vm3, %v34_v25, -inf }
 0x100   :  { %112 = vmax.xlane.f32.xlu0 %v111_v26 }
 0x104   :  { %v82_v27 = vpop.f32.mrf.mxu2 }
 0x105   :  { %v117_v28 = vsel %vm110_vm3, %v82_v27, -inf }
 0x106   :  { %118 = vmax.xlane.f32.xlu2 %v117_v28  ;;  %v36_v29 = vpop.f32.mrf.mxu0  ;;  %v58_v30 = vpop.f32.mrf.mxu1 }
 0x107   :  { %v114_v31 = vsel %vm110_vm3, %v58_v30, -inf }
 0x108   :  { %115 = vmax.xlane.f32.xlu1 %v114_v31 }
 0x10c   :  { %v84_v32 = vpop.f32.mrf.mxu2  ;;  %v106_v33 = vpop.f32.mrf.mxu3 }
 0x10d   :  { %v120_v34 = vsel %vm110_vm3, %v106_v33, -inf }
 0x10e   :  { %121 = vmax.xlane.f32.xlu2 %v120_v34  ;;  %v60_v35 = vpop.f32.mrf.mxu1 }
 0x114   :  { %v108_v36 = vpop.f32.mrf.mxu3  ;;  %296 = vrot.lane.b32.xlu0 %v1183_v6, %s1149_s0 }
 0x121   :  { %319 = vrot.lane.b32.xlu1 %v1189_v10, %s1149_s0 }
 0x126   :  { %227 = vrot.lane.b32.xlu2 %v1189_v10, %s1147_s15 }
 0x129   :  { %294 = vrot.lane.b32.xlu1 %v1183_v6, %s1150_s16 }
 0x131   :  { %317 = vrot.lane.b32.xlu1 %v1189_v10, %s1150_s16 }
 0x139   :  { %159 = vrot.lane.b32.xlu1 %v1185_v7, %s1147_s15 }
 0x141   :  { %250 = vrot.lane.b32.xlu1 %v1185_v7, %s1149_s0 }
 0x149   :  { %273 = vrot.lane.b32.xlu1 %v1191_v11, %s1149_s0 }
 0x151   :  { %271 = vrot.lane.b32.xlu1 %v1191_v11, %s1150_s16 }
 0x173   :  { %v113_v37 = vpop.xlane.xlu0 %112 }
 0x174   :  { %v123_v38 = vsub.f32 %v34_v25, %v113_v37 }
 0x176   :  { %v127_v39 = vmul.f32 1.442695, %v123_v38 }
 0x178   :  { %1082 = vpow2.f32 %v127_v39 }
 0x179   :  { %v119_v40 = vpop.xlane.xlu2 %118 }
 0x17a   :  { %v125_v41 = vsub.f32 %v82_v27, %v119_v40 }
 0x17b   :  { %v116_v42 = vpop.xlane.xlu1 %115 }
 0x17c   :  { %v131_v43 = vmul.f32 1.442695, %v125_v41  ;;  %v124_v44 = vsub.f32 %v58_v30, %v116_v42 }
 0x17e   :  { %v1083_v45 = vpop.eup %1082  ;;  %1084 = vpow2.f32 %v131_v43  ;;  %v129_v46 = vmul.f32 1.442695, %v124_v44 }
 0x17f   :  { %v135_v47 = vsel %vm110_vm3, %v1083_v45, 0.0 }
 0x180   :  { %1086 = vpow2.f32 %v129_v46  ;;  %136 = vadd.xlane.f32.xlu2 %v135_v47 }
 0x181   :  { %v122_v48 = vpop.xlane.xlu2 %121 }
 0x182   :  { %v126_v49 = vsub.f32 %v106_v33, %v122_v48 }
 0x184   :  { %v1085_v50 = vpop.eup %1084  ;;  %v133_v51 = vmul.f32 1.442695, %v126_v49 }
 0x185   :  { %v141_v53 = vsel %vm110_vm3, %v1085_v50, 0.0 }
 0x186   :  { %v1087_v52 = vpop.eup %1086  ;;  %1088 = vpow2.f32 %v133_v51  ;;  %v297_v55 = vpop.permute.xlu0 %296 }
 0x187   :  { %v138_v54 = vsel %vm110_vm3, %v1087_v52, 0.0  ;;  %v302_v57 = vsel %vm18_vm0, %v297_v55, 0 }
 0x188   :  { %142 = vadd.xlane.f32.xlu2 %v141_v53  ;;  %139 = vadd.xlane.f32.xlu0 %v138_v54 }
 0x189   :  { %v228_v56 = vpop.permute.xlu2 %227  ;;  %311 = vmatpush.bf16.xpose.msra.mxu2 %v302_v57 }
 0x18a   :  { %v233_v58 = vand.u32 %v228_v56, %v1205_v23 }
 0x18c   :  { %v1089_v59 = vpop.eup %1088  ;;  %242 = vmatpush.bf16.msrb.mxu3 %v233_v58 }
 0x18d   :  { %v144_v60 = vsel %vm110_vm3, %v1089_v59, 0.0 }
 0x190   :  { %145 = vadd.xlane.f32.xlu2 %v144_v60 }
 0x193   :  { %v320_v61 = vpop.permute.xlu1 %319 }
 0x194   :  { %v325_v62 = vsel %vm18_vm0, %v320_v61, 0 }
 0x195   :  { %334 = vmatpush.bf16.xpose.msra.mxu3 %v325_v62 }
 0x19b   :  { %v295_v63 = vpop.permute.xlu1 %294 }
 0x19c   :  { %248 = vrot.lane.b32.xlu0 %v1185_v7, %s1150_s16 }
 0x1a3   :  { %v318_v0 = vpop.permute.xlu1 %317 }
 0x1a8   :  { %185 = vrot.lane.b32.xlu2 %v1191_v11, %s1147_s15 }
 0x1ab   :  { %v160_v1 = vpop.permute.xlu1 %159 }
 0x1ac   :  { %v170_v2 = vand.u32 %v1205_v23, %v160_v1 }
 0x1ae   :  { %179 = vmatpush.bf16.msrb.mxu0 %v170_v2 }
 0x1b3   :  { %v251_v3 = vpop.permute.xlu1 %250 }
 0x1b4   :  { %v256_v4 = vsel %vm18_vm0, %v251_v3, 0 }
 0x1b5   :  { %265 = vmatpush.bf16.xpose.msra.mxu0 %v256_v4 }
 0x1bb   :  { %v274_v21 = vpop.permute.xlu1 %273 }
 0x1bc   :  { %v279_v28 = vsel %vm18_vm0, %v274_v21, 0 }
 0x1c3   :  { %v272_v31 = vpop.permute.xlu1 %271 }
 0x1f3   :  { %v137_v5 = vpop.xlane.xlu2 %136 }
 0x1f4   :  { %1090 = vrcp.f32 %v137_v5 }
 0x1fa   :  { %v1091_v8 = vpop.eup %1090 }
 0x1fb   :  { %v151_v9 = vmul.f32 %v1091_v8, %v1083_v45  ;;  %v143_v12 = vpop.xlane.xlu2 %142  ;;  %v140_v14 = vpop.xlane.xlu0 %139 }
 0x1fc   :  { %1092 = vrcp.f32 %v143_v12 }
 0x1fd   :  { %v155_v13 = vpack.c.bf16 %v151_v9, %v151_v9  ;;  %1094 = vrcp.f32 %v140_v14 }
 0x1ff   :  { %1009 = vmatmul.msk.bf16.vlgmr.msrb.gmra.mxu0 %vm161_vm4, %v155_v13 }
 0x202   :  { %v1093_v15 = vpop.eup %1092 }
 0x203   :  { %v153_v16 = vmul.f32 %v1093_v15, %v1085_v50  ;;  %v146_v17 = vpop.xlane.xlu2 %145  ;;  %v1095_v19 = vpop.eup %1094 }
 0x204   :  { %1096 = vrcp.f32 %v146_v17  ;;  %v152_v22 = vmul.f32 %v1095_v19, %v1087_v52 }
 0x205   :  { %v157_v18 = vpack.c.bf16 %v153_v16, %v153_v16 }
 0x206   :  { %v156_v30 = vpack.c.bf16 %v152_v22, %v152_v22 }
 0x207   :  { %1011 = vmatmul.msk.bf16.vlgmr.msrb.gmra.mxu2 %vm161_vm4, %v157_v18 }
 0x20a   :  { %v1097_v20 = vpop.eup %1096 }
 0x20b   :  { %v154_v24 = vmul.f32 %v1097_v20, %v1089_v59  ;;  %v186_v25 = vpop.permute.xlu2 %185 }
 0x20c   :  { %v191_v26 = vand.u32 %v186_v25, %v1205_v23 }
 0x20d   :  { %v158_v27 = vpack.c.bf16 %v154_v24, %v154_v24 }
 0x20e   :  { %200 = vmatpush.bf16.msrb.mxu1 %v191_v26  ;;  %v249_v29 = vpop.permute.xlu0 %248 }
 0x20f   :  { %1012 = vmatmul.msk.bf16.vlgmr.msrb.gmra.mxu3 %vm161_vm4, %v158_v27  ;;  %1013 = vmatmul.msk.bf16.vlgmr.msra.gmra.mxu0 %vm18_vm0, %v249_v29 }
 0x211   :  { %1010 = vmatmul.msk.bf16.vlgmr.msrb.gmra.mxu1 %vm161_vm4, %v156_v30 }
 0x212   :  { %288 = vmatpush.bf16.xpose.msra.mxu1 %v279_v28 }
 0x217   :  { %1015 = vmatmul.msk.bf16.vlgmr.msra.gmra.mxu2 %vm18_vm0, %v295_v63 }
 0x21f   :  { %1016 = vmatmul.msk.bf16.vlgmr.msra.gmra.mxu3 %vm18_vm0, %v318_v0 }
 0x221   :  { %1014 = vmatmul.msk.bf16.vlgmr.msra.gmra.mxu1 %vm18_vm0, %v272_v31 }
 0x27c   :  { %v1249_v32 = vpop.f32.mrf.mxu0 }
 0x284   :  { %v183_v33 = vpop.f32.mrf.mxu0 }
 0x28a   :  { %v1251_v34 = vpop.f32.mrf.mxu2 }
 0x28c   :  { %v267_v35 = vpop.f32.mrf.mxu0 }
 0x28d   :  { %v340_v36 = vsel %vm110_vm3, %v267_v35, -inf }
 0x28e   :  { %341 = vmax.xlane.f32.xlu0 %v340_v36  ;;  %v1254_v37 = vpop.f32.mrf.mxu1 }
 0x292   :  { %v225_v38 = vpop.f32.mrf.mxu2  ;;  %v1256_v39 = vpop.f32.mrf.mxu3 }
 0x294   :  { %v269_v40 = vpop.f32.mrf.mxu0 }
 0x296   :  { %v204_v41 = vpop.f32.mrf.mxu1 }
 0x29a   :  { %v246_v42 = vpop.f32.mrf.mxu3  ;;  %v313_v43 = vpop.f32.mrf.mxu2 }
 0x29b   :  { %v346_v44 = vsel %vm110_vm3, %v313_v43, -inf }
 0x29c   :  { %347 = vmax.xlane.f32.xlu2 %v346_v44 }
 0x29e   :  { %v290_v45 = vpop.f32.mrf.mxu1 }
 0x29f   :  { %v343_v46 = vsel %vm110_vm3, %v290_v45, -inf }
 0x2a2   :  { %v315_v47 = vpop.f32.mrf.mxu2  ;;  %v336_v48 = vpop.f32.mrf.mxu3  ;;  %451 = vrot.lane.b32.xlu0 %v1189_v10, %s1151_s17 }
 0x2a3   :  { %v349_v49 = vsel %vm110_vm3, %v336_v48, -inf }
 0x2a4   :  { %350 = vmax.xlane.f32.xlu1 %v349_v49  ;;  %344 = vmax.xlane.f32.xlu2 %v343_v46 }
 0x2a6   :  { %v292_v50 = vpop.f32.mrf.mxu1 }
 0x2aa   :  { %v338_v51 = vpop.f32.mrf.mxu3  ;;  %520 = vrot.lane.b32.xlu0 %v1183_v6, %s1152_s18 }
 0x2b2   :  { %409 = vrot.lane.b32.xlu0 %v1191_v11, %s1151_s17 }
 0x2ba   :  { %541 = vrot.lane.b32.xlu0 %v1189_v10, %s1153_s19 }
 0x2bd   :  { %430 = vrot.lane.b32.xlu1 %v1183_v6, %s1151_s17 }
 0x2c2   :  { %497 = vrot.lane.b32.xlu0 %v1191_v11, %s1152_s18 }
 0x301   :  { %v342_v52 = vpop.xlane.xlu0 %341 }
 0x302   :  { %v352_v53 = vsub.f32 %v267_v35, %v342_v52 }
 0x304   :  { %v356_v54 = vmul.f32 1.442695, %v352_v53 }
 0x306   :  { %1098 = vpow2.f32 %v356_v54 }
 0x30c   :  { %v1273_v55 = vpop.eup %1098 }
 0x30d   :  { %v364_v56 = vsel %vm110_vm3, %v1273_v55, 0.0 }
 0x30e   :  { %365 = vadd.xlane.f32.xlu2 %v364_v56 }
 0x30f   :  { %v348_v57 = vpop.xlane.xlu2 %347 }
 0x310   :  { %v354_v58 = vsub.f32 %v313_v43, %v348_v57 }
 0x312   :  { %v360_v59 = vmul.f32 1.442695, %v354_v58 }
 0x314   :  { %1100 = vpow2.f32 %v360_v59  ;;  %v452_v14 = vpop.permute.xlu0 %451 }
 0x315   :  { %v457_v15 = vand.u32 %v452_v14, %v1205_v23 }
 0x317   :  { %v345_v60 = vpop.xlane.xlu2 %344  ;;  %v351_v61 = vpop.xlane.xlu1 %350  ;;  %466 = vmatpush.bf16.msrb.mxu3 %v457_v15 }
 0x318   :  { %v353_v62 = vsub.f32 %v290_v45, %v345_v60  ;;  %v355_v1 = vsub.f32 %v336_v48, %v351_v61 }
 0x31a   :  { %v1101_v63 = vpop.eup %1100  ;;  %v358_v0 = vmul.f32 1.442695, %v353_v62  ;;  %v362_v3 = vmul.f32 1.442695, %v355_v1 }
 0x31b   :  { %v370_v2 = vsel %vm110_vm3, %v1101_v63, 0.0 }
 0x31c   :  { %371 = vadd.xlane.f32.xlu1 %v370_v2  ;;  %1102 = vpow2.f32 %v358_v0  ;;  %v521_v16 = vpop.permute.xlu0 %520 }
 0x31d   :  { %1104 = vpow2.f32 %v362_v3  ;;  %v526_v17 = vsel %vm18_vm0, %v521_v16, 0 }
 0x322   :  { %v1103_v4 = vpop.eup %1102 }
 0x323   :  { %v367_v5 = vsel %vm110_vm3, %v1103_v4, 0.0  ;;  %v1105_v8 = vpop.eup %1104 }
 0x324   :  { %368 = vadd.xlane.f32.xlu2 %v367_v5  ;;  %v373_v9 = vsel %vm110_vm3, %v1105_v8, 0.0  ;;  %v410_v18 = vpop.permute.xlu0 %409 }
 0x325   :  { %v415_v19 = vand.u32 %v410_v18, %v1205_v23 }
 0x327   :  { %424 = vmatpush.bf16.msrb.mxu1 %v415_v19 }
 0x32c   :  { %374 = vadd.xlane.f32.xlu2 %v373_v9  ;;  %v542_v21 = vpop.permute.xlu0 %541 }
 0x32f   :  { %v431_v12 = vpop.permute.xlu1 %430 }
 0x330   :  { %v436_v13 = vand.u32 %v431_v12, %v1205_v23 }
 0x332   :  { %445 = vmatpush.bf16.msrb.mxu2 %v436_v13 }
 0x334   :  { %v498_v27 = vpop.permute.xlu0 %497 }
 0x335   :  { %388 = vrot.lane.b32.xlu1 %v1185_v7, %s1151_s17  ;;  %v503_v29 = vsel %vm18_vm0, %v498_v27, 0 }
 0x336   :  { %535 = vmatpush.bf16.xpose.msra.mxu2 %v526_v17  ;;  %512 = vmatpush.bf16.xpose.msra.mxu1 %v503_v29 }
 0x33d   :  { %518 = vrot.lane.b32.xlu1 %v1183_v6, %s1153_s19 }
 0x344   :  { %543 = vrot.lane.b32.xlu2 %v1189_v10, %s1152_s18 }
 0x345   :  { %474 = vrot.lane.b32.xlu1 %v1185_v7, %s1152_s18 }
 0x34c   :  { %472 = vrot.lane.b32.xlu2 %v1185_v7, %s1153_s19 }
 0x34d   :  { %495 = vrot.lane.b32.xlu1 %v1191_v11, %s1153_s19 }
 0x381   :  { %v366_v22 = vpop.xlane.xlu2 %365 }
 0x38f   :  { %v372_v20 = vpop.xlane.xlu1 %371 }
 0x390   :  { %1106 = vrcp.f32 %v372_v20 }
 0x396   :  { %v1107_v24 = vpop.eup %1106 }
 0x397   :  { %v382_v25 = vmul.f32 %v1107_v24, %v1101_v63  ;;  %v369_v26 = vpop.xlane.xlu2 %368 }
 0x398   :  { %1108 = vrcp.f32 %v369_v26 }
 0x399   :  { %v386_v28 = vpack.c.bf16 %v382_v25, %v382_v25  ;;  %1110 = vrcp.f32 %v366_v22 }
 0x39b   :  { %1019 = vmatmul.msk.bf16.vlgmr.msrb.gmra.mxu2 %vm161_vm4, %v386_v28 }
 0x39e   :  { %v1109_v30 = vpop.eup %1108 }
 0x39f   :  { %v381_v31 = vmul.f32 %v1109_v30, %v1103_v4  ;;  %v375_v33 = vpop.xlane.xlu2 %374  ;;  %v1111_v36 = vpop.eup %1110 }
 0x3a0   :  { %1112 = vrcp.f32 %v375_v33  ;;  %v380_v40 = vmul.f32 %v1111_v36, %v1273_v55 }
 0x3a1   :  { %v385_v35 = vpack.c.bf16 %v381_v31, %v381_v31 }
 0x3a2   :  { %v384_v47 = vpack.c.bf16 %v380_v40, %v380_v40 }
 0x3a3   :  { %1018 = vmatmul.msk.bf16.vlgmr.msrb.gmra.mxu1 %vm161_vm4, %v385_v35 }
 0x3a6   :  { %v1113_v38 = vpop.eup %1112 }
 0x3a7   :  { %v389_v41 = vpop.permute.xlu1 %388  ;;  %v383_v42 = vmul.f32 %v1113_v38, %v1105_v8  ;;  %v544_v44 = vpop.permute.xlu2 %543 }
 0x3a8   :  { %v394_v43 = vand.u32 %v389_v41, %v1205_v23  ;;  %v549_v45 = vsel %vm18_vm0, %v544_v44, 0 }
 0x3a9   :  { %v387_v46 = vpack.c.bf16 %v383_v42, %v383_v42  ;;  %558 = vmatpush.bf16.xpose.msra.mxu3 %v549_v45 }
 0x3aa   :  { %403 = vmatpush.bf16.msrb.mxu0 %v394_v43 }
 0x3ab   :  { %1020 = vmatmul.msk.bf16.vlgmr.msrb.gmra.mxu3 %vm161_vm4, %v387_v46 }
 0x3ad   :  { %1017 = vmatmul.msk.bf16.vlgmr.msrb.gmra.mxu0 %vm161_vm4, %v384_v47 }
 0x3af   :  { %v519_v48 = vpop.permute.xlu1 %518  ;;  %v473_v51 = vpop.permute.xlu2 %472 }
 0x3b0   :  { %1023 = vmatmul.msk.bf16.vlgmr.msra.gmra.mxu2 %vm18_vm0, %v519_v48 }
 0x3b7   :  { %v475_v49 = vpop.permute.xlu1 %474 }
 0x3b8   :  { %v480_v50 = vsel %vm18_vm0, %v475_v49, 0 }
 0x3b9   :  { %489 = vmatpush.bf16.xpose.msra.mxu0 %v480_v50 }
 0x3bb   :  { %1024 = vmatmul.msk.bf16.vlgmr.msra.gmra.mxu3 %vm18_vm0, %v542_v21 }
 0x3bf   :  { %v496_v52 = vpop.permute.xlu1 %495 }
 0x3c0   :  { %1021 = vmatmul.msk.bf16.vlgmr.msra.gmra.mxu0 %vm18_vm0, %v473_v51  ;;  %1022 = vmatmul.msk.bf16.vlgmr.msra.gmra.mxu1 %vm18_vm0, %v496_v52 }
 0x41e   :  { %v1309_v53 = vpop.f32.mrf.mxu2 }
 0x420   :  { %v1311_v54 = vpop.f32.mrf.mxu1 }
 0x426   :  { %v449_v55 = vpop.f32.mrf.mxu2 }
 0x428   :  { %v428_v56 = vpop.f32.mrf.mxu1 }
 0x42a   :  { %v1313_v57 = vpop.f32.mrf.mxu0 }
 0x42b   :  { %v1052_v58 = vpack.i.bf16 %v1311_v54, %v1313_v57 }
 0x42e   :  { %v1317_v59 = vpop.f32.mrf.mxu3 }
 0x42f   :  { %v1057_v60 = vpack.i.bf16 %v1317_v59, %v1309_v53 }
 0x432   :  { %v407_v61 = vpop.f32.mrf.mxu0 }
 0x433   :  { %v537_v62 = vpop.f32.mrf.mxu2 }
 0x434   :  { %v570_v63 = vsel %vm110_vm3, %v537_v62, -inf }
 0x435   :  { %571 = vmax.xlane.f32.xlu0 %v570_v63 }
 0x436   :  { %v470_v0 = vpop.f32.mrf.mxu3 }
 0x43b   :  { %v539_v1 = vpop.f32.mrf.mxu2 }
 0x43d   :  { %v491_v2 = vpop.f32.mrf.mxu0  ;;  %v514_v3 = vpop.f32.mrf.mxu1 }
 0x43e   :  { %v564_v4 = vsel %vm110_vm3, %v491_v2, -inf  ;;  %v560_v5 = vpop.f32.mrf.mxu3  ;;  %v567_v13 = vsel %vm110_vm3, %v514_v3, -inf }
 0x43f   :  { %565 = vmax.xlane.f32.xlu1 %v564_v4  ;;  %v573_v8 = vsel %vm110_vm3, %v560_v5, -inf }
 0x440   :  { %574 = vmax.xlane.f32.xlu2 %v573_v8 }
 0x445   :  { %v493_v9 = vpop.f32.mrf.mxu0  ;;  %v516_v12 = vpop.f32.mrf.mxu1 }
 0x446   :  { %v562_v14 = vpop.f32.mrf.mxu3 }
 0x448   :  { %568 = vmax.xlane.f32.xlu2 %v567_v13 }
 0x449   :  { %675 = vrot.lane.b32.xlu0 %v1189_v10, %s1154_s20 }
 0x451   :  { %612 = vrot.lane.b32.xlu0 %v1185_v7, %s1154_s20 }
 0x458   :  { %633 = vrot.lane.b32.xlu1 %v1191_v11, %s1154_s20 }
 0x459   :  { %767 = vrot.lane.b32.xlu0 %v1189_v10, %s1155_s21 }
 0x460   :  { %654 = vrot.lane.b32.xlu2 %v1183_v6, %s1154_s20 }
 0x461   :  { %765 = vrot.lane.b32.xlu0 %v1189_v10, %s1156_s22 }
 0x468   :  { %744 = vrot.lane.b32.xlu2 %v1183_v6, %s1155_s21 }
 0x470   :  { %742 = vrot.lane.b32.xlu2 %v1183_v6, %s1156_s22 }
 0x478   :  { %698 = vrot.lane.b32.xlu2 %v1185_v7, %s1155_s21 }
 0x480   :  { %719 = vrot.lane.b32.xlu2 %v1191_v11, %s1156_s22 }
 0x4a8   :  { %v572_v15 = vpop.xlane.xlu0 %571 }
 0x4a9   :  { %v578_v16 = vsub.f32 %v537_v62, %v572_v15 }
 0x4ab   :  { %v584_v17 = vmul.f32 1.442695, %v578_v16 }
 0x4ad   :  { %1114 = vpow2.f32 %v584_v17 }
 0x4b2   :  { %v566_v18 = vpop.xlane.xlu1 %565 }
 0x4b3   :  { %v1115_v19 = vpop.eup %1114  ;;  %v576_v20 = vsub.f32 %v491_v2, %v566_v18  ;;  %v575_v21 = vpop.xlane.xlu2 %574 }
 0x4b4   :  { %v594_v22 = vsel %vm110_vm3, %v1115_v19, 0.0  ;;  %v579_v29 = vsub.f32 %v560_v5, %v575_v21 }
 0x4b5   :  { %v580_v24 = vmul.f32 1.442695, %v576_v20  ;;  %595 = vadd.xlane.f32.xlu0 %v594_v22 }
 0x4b6   :  { %v586_v31 = vmul.f32 1.442695, %v579_v29 }
 0x4b7   :  { %1116 = vpow2.f32 %v580_v24 }
 0x4bb   :  { %v569_v25 = vpop.xlane.xlu2 %568  ;;  %v676_v36 = vpop.permute.xlu0 %675 }
 0x4bc   :  { %v577_v27 = vsub.f32 %v514_v3, %v569_v25  ;;  %v681_v40 = vand.u32 %v676_v36, %v1205_v23 }
 0x4bd   :  { %v1117_v26 = vpop.eup %1116 }
 0x4be   :  { %v588_v28 = vsel %vm110_vm3, %v1117_v26, 0.0  ;;  %v582_v30 = vmul.f32 1.442695, %v577_v27  ;;  %690 = vmatpush.bf16.msrb.mxu3 %v681_v40 }
 0x4bf   :  { %589 = vadd.xlane.f32.xlu1 %v588_v28 }
 0x4c0   :  { %1118 = vpow2.f32 %v582_v30 }
 0x4c1   :  { %1120 = vpow2.f32 %v586_v31 }
 0x4c3   :  { %v613_v44 = vpop.permute.xlu0 %612  ;;  %v655_v48 = vpop.permute.xlu2 %654 }
 0x4c4   :  { %v618_v45 = vand.u32 %v613_v44, %v1205_v23  ;;  %v660_v49 = vand.u32 %v655_v48, %v1205_v23 }
 0x4c6   :  { %v1119_v33 = vpop.eup %1118  ;;  %627 = vmatpush.bf16.msrb.mxu0 %v618_v45  ;;  %669 = vmatpush.bf16.msrb.mxu2 %v660_v49 }
 0x4c7   :  { %v591_v35 = vsel %vm110_vm3, %v1119_v33, 0.0  ;;  %v1121_v42 = vpop.eup %1120 }
 0x4c8   :  { %592 = vadd.xlane.f32.xlu1 %v591_v35  ;;  %v597_v43 = vsel %vm110_vm3, %v1121_v42, 0.0 }
 0x4c9   :  { %721 = vrot.lane.b32.xlu0 %v1191_v11, %s1155_s21 }
 0x4ca   :  { %v634_v38 = vpop.permute.xlu1 %633 }
 0x4cb   :  { %v639_v41 = vand.u32 %v634_v38, %v1205_v23  ;;  %v768_v46 = vpop.permute.xlu0 %767  ;;  %v745_v50 = vpop.permute.xlu2 %744 }
 0x4cc   :  { %v773_v47 = vsel %vm18_vm0, %v768_v46, 0  ;;  %v750_v51 = vsel %vm18_vm0, %v745_v50, 0 }
 0x4cd   :  { %648 = vmatpush.bf16.msrb.mxu1 %v639_v41  ;;  %782 = vmatpush.bf16.xpose.msra.mxu3 %v773_v47 }
 0x4ce   :  { %759 = vmatpush.bf16.xpose.msra.mxu2 %v750_v51 }
 0x4d0   :  { %598 = vadd.xlane.f32.xlu1 %v597_v43 }
 0x4d3   :  { %v766_v52 = vpop.permute.xlu0 %765  ;;  %v743_v55 = vpop.permute.xlu2 %742 }
 0x4db   :  { %v699_v61 = vpop.permute.xlu2 %698 }
 0x4dc   :  { %v704_v63 = vsel %vm18_vm0, %v699_v61, 0 }
 0x4dd   :  { %713 = vmatpush.bf16.xpose.msra.mxu0 %v704_v63 }
 0x4e3   :  { %v720_v20 = vpop.permute.xlu2 %719 }
 0x4e9   :  { %696 = vrot.lane.b32.xlu1 %v1185_v7, %s1156_s22 }
 0x528   :  { %v596_v56 = vpop.xlane.xlu0 %595 }
 0x529   :  { %1122 = vrcp.f32 %v596_v56 }
 0x52f   :  { %v1123_v62 = vpop.eup %1122 }
 0x530   :  { %v606_v0 = vmul.f32 %v1123_v62, %v1115_v19 }
 0x532   :  { %v610_v1 = vpack.c.bf16 %v606_v0, %v606_v0  ;;  %v590_v2 = vpop.xlane.xlu1 %589 }
 0x533   :  { %1124 = vrcp.f32 %v590_v2 }
 0x534   :  { %1027 = vmatmul.msk.bf16.vlgmr.msrb.gmra.mxu2 %vm161_vm4, %v610_v1 }
 0x539   :  { %v1125_v3 = vpop.eup %1124 }
 0x53a   :  { %v604_v4 = vmul.f32 %v1125_v3, %v1117_v26 }
 0x53b   :  { %v722_v5 = vpop.permute.xlu0 %721  ;;  %v593_v9 = vpop.xlane.xlu1 %592 }
 0x53c   :  { %v608_v8 = vpack.c.bf16 %v604_v4, %v604_v4  ;;  %v727_v12 = vsel %vm18_vm0, %v722_v5, 0  ;;  %1126 = vrcp.f32 %v593_v9 }
 0x53d   :  { %736 = vmatpush.bf16.xpose.msra.mxu1 %v727_v12 }
 0x53e   :  { %1025 = vmatmul.msk.bf16.vlgmr.msrb.gmra.mxu0 %vm161_vm4, %v608_v8 }
 0x542   :  { %v1127_v13 = vpop.eup %1126 }
 0x543   :  { %v605_v14 = vmul.f32 %v1127_v13, %v1119_v33  ;;  %v599_v15 = vpop.xlane.xlu1 %598 }
 0x544   :  { %1031 = vmatmul.msk.bf16.vlgmr.msra.gmra.mxu2 %vm18_vm0, %v743_v55  ;;  %1128 = vrcp.f32 %v599_v15 }
 0x545   :  { %v609_v16 = vpack.c.bf16 %v605_v14, %v605_v14 }
 0x547   :  { %1026 = vmatmul.msk.bf16.vlgmr.msrb.gmra.mxu1 %vm161_vm4, %v609_v16 }
 0x54a   :  { %v1129_v17 = vpop.eup %1128 }
 0x54b   :  { %v607_v18 = vmul.f32 %v1129_v17, %v1121_v42 }
 0x54d   :  { %v611_v19 = vpack.c.bf16 %v607_v18, %v607_v18 }
 0x54f   :  { %1028 = vmatmul.msk.bf16.vlgmr.msrb.gmra.mxu3 %vm161_vm4, %v611_v19 }
 0x557   :  { %1030 = vmatmul.msk.bf16.vlgmr.msra.gmra.mxu1 %vm18_vm0, %v720_v20 }
 0x55b   :  { %v697_v21 = vpop.permute.xlu1 %696 }
 0x55c   :  { %1029 = vmatmul.msk.bf16.vlgmr.msra.gmra.mxu0 %vm18_vm0, %v697_v21 }
 0x55f   :  { %1032 = vmatmul.msk.bf16.vlgmr.msra.gmra.mxu3 %vm18_vm0, %v766_v52 }
 0x5b7   :  { %v1365_v22 = vpop.f32.mrf.mxu2 }
 0x5bb   :  { %v1367_v24 = vpop.f32.mrf.mxu0 }
 0x5bf   :  { %v673_v25 = vpop.f32.mrf.mxu2 }
 0x5c3   :  { %v631_v26 = vpop.f32.mrf.mxu0 }
 0x5c4   :  { %v1369_v27 = vpop.f32.mrf.mxu1 }
 0x5c5   :  { %v1062_v28 = vpack.i.bf16 %v1369_v27, %v1367_v24 }
 0x5c7   :  { %v761_v29 = vpop.f32.mrf.mxu2 }
 0x5c8   :  { %v794_v30 = vsel %vm110_vm3, %v761_v29, -inf }
 0x5c9   :  { %795 = vmax.xlane.f32.xlu0 %v794_v30 }
 0x5cc   :  { %v652_v31 = vpop.f32.mrf.mxu1 }
 0x5cf   :  { %v763_v33 = vpop.f32.mrf.mxu2 }
 0x5d2   :  { %v692_v35 = vpop.f32.mrf.mxu3 }
 0x5d3   :  { %v1067_v36 = vpack.i.bf16 %v692_v35, %v1365_v22 }
 0x5d4   :  { %v738_v38 = vpop.f32.mrf.mxu1 }
 0x5d5   :  { %v791_v40 = vsel %vm110_vm3, %v738_v38, -inf }
 0x5d6   :  { %792 = vmax.xlane.f32.xlu0 %v791_v40 }
 0x5d9   :  { %v715_v41 = vpop.f32.mrf.mxu0 }
 0x5da   :  { %v694_v42 = vpop.f32.mrf.mxu3  ;;  %v788_v43 = vsel %vm110_vm3, %v715_v41, -inf }
 0x5db   :  { %789 = vmax.xlane.f32.xlu2 %v788_v43 }
 0x5dc   :  { %v740_v44 = vpop.f32.mrf.mxu1 }
 0x5e1   :  { %v717_v45 = vpop.f32.mrf.mxu0 }
 0x5e2   :  { %v784_v46 = vpop.f32.mrf.mxu3 }
 0x5e3   :  { %v797_v47 = vsel %vm110_vm3, %v784_v46, -inf }
 0x5e4   :  { %798 = vmax.xlane.f32.xlu1 %v797_v47 }
 0x5ea   :  { %v786_v48 = vpop.f32.mrf.mxu3 }
 0x5f3   :  { %878 = vrot.lane.b32.xlu2 %v1183_v6, %s1157_s23 }
 0x63c   :  { %v796_v49 = vpop.xlane.xlu0 %795 }
 0x63d   :  { %v802_v52 = vsub.f32 %v761_v29, %v796_v49 }
 0x63f   :  { %v808_v62 = vmul.f32 1.442695, %v802_v52 }
 0x649   :  { %v793_v50 = vpop.xlane.xlu0 %792 }
 0x64a   :  { %v801_v51 = vsub.f32 %v738_v38, %v793_v50 }
 0x64c   :  { %v806_v55 = vmul.f32 1.442695, %v801_v51 }
 0x64e   :  { %1130 = vpow2.f32 %v806_v55  ;;  %v790_v56 = vpop.xlane.xlu2 %789 }
 0x64f   :  { %v800_v61 = vsub.f32 %v715_v41, %v790_v56 }
 0x651   :  { %v804_v63 = vmul.f32 1.442695, %v800_v61 }
 0x653   :  { %1132 = vpow2.f32 %v804_v63 }
 0x654   :  { %v1131_v0 = vpop.eup %1130  ;;  %1134 = vpow2.f32 %v808_v62 }
 0x655   :  { %v815_v1 = vsel %vm110_vm3, %v1131_v0, 0.0 }
 0x656   :  { %816 = vadd.xlane.f32.xlu1 %v815_v1  ;;  %v879_v14 = vpop.permute.xlu2 %878 }
 0x657   :  { %v799_v2 = vpop.xlane.xlu1 %798  ;;  %v884_v15 = vand.u32 %v879_v14, %v1205_v23 }
 0x658   :  { %v803_v3 = vsub.f32 %v784_v46, %v799_v2 }
 0x659   :  { %v1133_v4 = vpop.eup %1132  ;;  %893 = vmatpush.bf16.msrb.mxu2 %v884_v15 }
 0x65a   :  { %v1135_v6 = vpop.eup %1134  ;;  %v810_v5 = vmul.f32 1.442695, %v803_v3  ;;  %v812_v8 = vsel %vm110_vm3, %v1133_v4, 0.0 }
 0x65b   :  { %813 = vadd.xlane.f32.xlu0 %v812_v8  ;;  %v818_v9 = vsel %vm110_vm3, %v1135_v6, 0.0 }
 0x65c   :  { %1136 = vpow2.f32 %v810_v5 }
 0x65e   :  { %819 = vadd.xlane.f32.xlu1 %v818_v9 }
 0x662   :  { %v1137_v12 = vpop.eup %1136 }
 0x663   :  { %v821_v13 = vsel %vm110_vm3, %v1137_v12, 0.0 }
 0x664   :  { %822 = vadd.xlane.f32.xlu2 %v821_v13 }
 0x66f   :  { %899 = vrot.lane.b32.xlu0 %v1189_v10, %s1157_s23 }
 0x677   :  { %1053 = vrot.lane.b32.xlu0 %v1052_v58, %s1158_s24  ;;  %836 = vrot.lane.b32.xlu1 %v1185_v7, %s1157_s23 }
 0x67c   :  { %857 = vrot.lane.b32.xlu2 %v1191_v11, %s1157_s23 }
 0x67f   :  { %1068 = vrot.lane.b32.xlu0 %v1067_v36, %s1159_s25  ;;  %1058 = vrot.lane.b32.xlu1 %v1057_v60, %s1158_s24 }
 0x684   :  { %1063 = vrot.lane.b32.xlu2 %v1062_v28, %s1159_s25 }
 0x6c9   :  { %v817_v16 = vpop.xlane.xlu1 %816 }
 0x6ce   :  { %v814_v57 = vpop.xlane.xlu0 %813 }
 0x6d1   :  { %v820_v10 = vpop.xlane.xlu1 %819 }
 0x6d2   :  { %1138 = vrcp.f32 %v820_v10 }
 0x6d3   :  { %1140 = vrcp.f32 %v817_v16 }
 0x6d7   :  { %v823_v17 = vpop.xlane.xlu2 %822 }
 0x6d8   :  { %v1139_v54 = vpop.eup %1138  ;;  %1142 = vrcp.f32 %v823_v17 }
 0x6d9   :  { %v830_v58 = vmul.f32 %v1139_v54, %v1135_v6  ;;  %v1141_v18 = vpop.eup %1140  ;;  %1144 = vrcp.f32 %v814_v57 }
 0x6da   :  { %v829_v19 = vmul.f32 %v1141_v18, %v1131_v0 }
 0x6db   :  { %v834_v7 = vpack.c.bf16 %v830_v58, %v830_v58  ;;  %v989_v58 = vld [vmem:[%s1457_s1] sm:$0x7] }
 0x6dc   :  { %v833_v22 = vpack.c.bf16 %v829_v19, %v829_v19 }
 0x6dd   :  { %1035 = vmatmul.msk.bf16.vlgmr.msrb.gmra.mxu2 %vm161_vm4, %v834_v7 }
 0x6de   :  { %v1143_v11 = vpop.eup %1142 }
 0x6df   :  { %v858_v20 = vpop.permute.xlu2 %857  ;;  %v831_v59 = vmul.f32 %v1143_v11, %v1137_v12  ;;  %v1145_v25 = vpop.eup %1144 }
 0x6e0   :  { %v863_v53 = vand.u32 %v858_v20, %v1205_v23  ;;  %v828_v26 = vmul.f32 %v1145_v25, %v1133_v4 }
 0x6e1   :  { %v900_v60 = vpop.permute.xlu0 %899  ;;  %v835_v24 = vpack.c.bf16 %v831_v59, %v831_v59 }
 0x6e2   :  { %v905_v21 = vand.u32 %v900_v60, %v1205_v23  ;;  %872 = vmatpush.bf16.msrb.mxu1 %v863_v53  ;;  %v832_v29 = vpack.c.bf16 %v828_v26, %v828_v26 }
 0x6e4   :  { %914 = vmatpush.bf16.msrb.mxu3 %v905_v21 }
 0x6e5   :  { %1034 = vmatmul.msk.bf16.vlgmr.msrb.gmra.mxu1 %vm161_vm4, %v833_v22 }
 0x6e7   :  { %1036 = vmatmul.msk.bf16.vlgmr.msrb.gmra.mxu3 %vm161_vm4, %v835_v24  ;;  %v1064_v45 = vpop.permute.xlu2 %1063 }
 0x6e8   :  { %v1066_v14 = vunpack.i.h.bf16 %v1064_v45  ;;  %v1065_v15 = vunpack.i.l.bf16 %v1064_v45 }
 0x6e9   :  { %v837_v27 = vpop.permute.xlu1 %836  ;;  %v1054_v44 = vpop.permute.xlu0 %1053 }
 0x6ea   :  { %v842_v28 = vand.u32 %v837_v27, %v1205_v23  ;;  %v1056_v8 = vunpack.i.h.bf16 %v1054_v44  ;;  %v1055_v9 = vunpack.i.l.bf16 %v1054_v44 }
 0x6ec   :  { %851 = vmatpush.bf16.msrb.mxu0 %v842_v28  ;;  %v969_v12 = vsel %vm18_vm0, %v1254_v37, %v1056_v8  ;;  %v968_v13 = vsel %vm18_vm0, %v1249_v32, %v1055_v9  ;;  %v992_v37 = vld [vmem:[%s1457_s1 + $0x4] sm:$0x7] }
 0x6ed   :  { %v973_v54 = vsel %vm972_vm8, %v968_v13, %v1065_v15  ;;  %v974_v57 = vsel %vm972_vm8, %v969_v12, %v1066_v14 }
 0x6ef   :  { %1033 = vmatmul.msk.bf16.vlgmr.msrb.gmra.mxu0 %vm161_vm4, %v832_v29 }
 0x6f1   :  { %v1059_v23 = vpop.permute.xlu1 %1058  ;;  %v1069_v48 = vpop.permute.xlu0 %1068 }
 0x6f2   :  { %v1061_v46 = vunpack.i.h.bf16 %v1059_v23  ;;  %v1060_v47 = vunpack.i.l.bf16 %v1059_v23  ;;  %v1071_v49 = vunpack.i.h.bf16 %v1069_v48  ;;  %v1070_v50 = vunpack.i.l.bf16 %v1069_v48 }
 0x6f4   :  { %v971_v51 = vsel %vm18_vm0, %v1256_v39, %v1061_v46  ;;  %v970_v52 = vsel %vm18_vm0, %v1251_v34, %v1060_v47  ;;  %v995_v39 = vld [vmem:[%s1457_s1 + $0x8] sm:$0x7]  ;;  %v998_v34 = vld [vmem:[%s1457_s1 + $0xc] sm:$0x7] }
 0x6f5   :  { %v976_v62 = vsel %vm972_vm8, %v971_v51, %v1071_v49  ;;  %v975_v63 = vsel %vm972_vm8, %v970_v52, %v1070_v50 }
 0x760   :  { %v895_v30 = vpop.f32.mrf.mxu2 }
 0x762   :  { %v874_v31 = vpop.f32.mrf.mxu1 }
 0x768   :  { %v897_v33 = vpop.f32.mrf.mxu2 }
 0x76a   :  { %v876_v35 = vpop.f32.mrf.mxu1  ;;  %v916_v36 = vpop.f32.mrf.mxu3 }
 0x76b   :  { %v1077_v38 = vpack.i.bf16 %v916_v36, %v895_v30 }
 0x76c   :  { %v853_v40 = vpop.f32.mrf.mxu0 }
 0x76d   :  { %v1072_v41 = vpack.i.bf16 %v874_v31, %v853_v40  ;;  %1078 = vrot.lane.b32.xlu2 %v1077_v38, %s1160_s26 }
 0x76f   :  { %1073 = vrot.lane.b32.xlu1 %v1072_v41, %s1160_s26 }
 0x772   :  { %v918_v42 = vpop.f32.mrf.mxu3 }
 0x774   :  { %v855_v43 = vpop.f32.mrf.mxu0 }
 0x7c7   :  { %v1079_v55 = vpop.permute.xlu2 %1078 }
 0x7c8   :  { %v1081_v56 = vunpack.i.h.bf16 %v1079_v55  ;;  %v1080_v61 = vunpack.i.l.bf16 %v1079_v55 }
 0x7ca   :  { %v980_v1 = vsel %vm977_vm5, %v975_v63, %v1080_v61  ;;  %v981_v2 = vsel %vm977_vm5, %v976_v62, %v1081_v56 }
 0x7cb   :  { %v984_v3 = vpack.c.bf16 %v980_v1, %v980_v1  ;;  %v985_v4 = vpack.c.bf16 %v981_v2, %v981_v2 }
 0x7cd   :  { %v996_v6 = vsel %vm1410_vm9, %v984_v3, %v995_v39  ;;  %v999_v5 = vsel %vm1410_vm9, %v985_v4, %v998_v34 }
 0x7ce   :  { %997 = vst [vmem:[%s1457_s1 + $0x8] sm:$0x7] %v996_v6 }
 0x7cf   :  { %1000 = vst [vmem:[%s1457_s1 + $0xc] sm:$0x7] %v999_v5 }
 0x7e1   :  { %v1074_v16 = vpop.permute.xlu1 %1073 }
 0x7e2   :  { %v1076_v10 = vunpack.i.h.bf16 %v1074_v16  ;;  %v1075_v17 = vunpack.i.l.bf16 %v1074_v16 }
 0x7e4   :  { %v979_v7 = vsel %vm977_vm5, %v974_v57, %v1076_v10  ;;  %v978_v32 = vsel %vm977_vm5, %v973_v54, %v1075_v17 }
 0x7e5   :  { %v983_v18 = vpack.c.bf16 %v979_v7, %v979_v7  ;;  %v982_v11 = vpack.c.bf16 %v978_v32, %v978_v32 }
 0x7e7   :  { %v993_v19 = vsel %vm1410_vm9, %v983_v18, %v992_v37  ;;  %v990_v20 = vsel %vm1410_vm9, %v982_v11, %v989_v58 }
 0x7e8   :  { %994 = vst [vmem:[%s1457_s1 + $0x4] sm:$0x7] %v993_v19 }
 0x7e9   :  { %991 = vst [vmem:[%s1457_s1] sm:$0x7] %v990_v20 }

// kernel: timesformer_forward.23
= control target key start
LH: loop header
LB: loop body
LE: loop exit
PB: predicated region body
PF: predicated region fallthrough
CT: control target
= control target key end

     0   :  { %vm41_vm0 = vcmask 261120   ;;  %vm48_vm1 = vcmask 254976   ;;  %v378_v12 = vmov 32.0   ;;  %s524_s0 = inlined_call_operand.vmem [shape: f32[18,32], index: 0, kind: input, shape index: {}]   ;;  %s525_s1 = inlined_call_operand.vmem [shape: f32[18,32], index: 1, kind: input, shape index: {}]   ;;  %s526_s2 = inlined_call_operand.vmem [shape: f32[1,32], index: 2, kind: input, shape index: {}]   ;;  %s527_s3 = inlined_call_operand.vmem [shape: f32[1,32], index: 3, kind: input, shape index: {}]   ;;  %s528_s5 = inlined_call_operand.vmem [shape: f32[1,128], index: 5, kind: input, shape index: {}]   ;;  %s529_s4 = inlined_call_operand.vmem [shape: bf16[32,128], index: 4, kind: input, shape index: {}]   ;;  %s530_s7 = inlined_call_operand.vmem [shape: f32[1,32], index: 7, kind: input, shape index: {}]   ;;  %s531_s6 = inlined_call_operand.vmem [shape: bf16[128,32], index: 6, kind: input, shape index: {}]   ;;  %s532_s8 = inlined_call_operand.vmem [shape: f32[18,32], index: 8, kind: output, shape index: {}]  }
   0x1   :  { %v30_v0 = vld [vmem:[%s524_s0] sm:$0xff]  ;;  %v32_v3 = vld [vmem:[%s524_s0 + $0x10] sm:$0x3]  ;;  %v31_v5 = vld [vmem:[%s524_s0 + $0x8] sm:$0xff]  ;;  %364 = vrcp.f32 %v378_v12 }
   0x2   :  { %v33_v1 = vld [vmem:[%s525_s1] sm:$0xff]  ;;  %v35_v4 = vld [vmem:[%s525_s1 + $0x10] sm:$0x3]  ;;  %v34_v6 = vld [vmem:[%s525_s1 + $0x8] sm:$0xff] }
   0x3   :  { %v430_v2 = vadd.f32 %v33_v1, %v30_v0  ;;  %v444_v7 = vadd.f32 %v35_v4, %v32_v3  ;;  %v450_v10 = vadd.f32 %v34_v6, %v31_v5  ;;  %v342_v34 = vld [vmem:[%s529_s4 + $0x8] sm:$0xff]  ;;  %v341_v37 = vld [vmem:[%s529_s4] sm:$0xff] }
   0x4   :  { %162 = vmatpush.bf16.msra.mxu0 %v342_v34  ;;  %v360_v59 = vld [vmem:[%s526_s2] ss:$0 sm:$0xff] }
   0x5   :  { %v42_v8 = vsel %vm41_vm0, %v430_v2, 0.0  ;;  %v49_v9 = vsel %vm48_vm1, %v444_v7, 0.0  ;;  %v45_v11 = vsel %vm41_vm0, %v450_v10, 0.0  ;;  %v361_v3 = vld [vmem:[%s527_s3] ss:$0 sm:$0xff] }
   0x6   :  { %43 = vadd.xlane.f32.xlu0 %v42_v8  ;;  %50 = vadd.xlane.f32.xlu1 %v49_v9 }
   0x7   :  { %v365_v13 = vpop.eup %364 }
   0x8   :  { %v53_v14 = vmul.f32 32.0, %v365_v13  ;;  %vm57_vm2 = vweird.f32 %v365_v13  ;;  %163 = vmatpush.bf16.msra.mxu0 %v341_v37 }
   0xa   :  { %v54_v15 = vsub.f32 1.0, %v53_v14 }
   0xc   :  { %v55_v16 = vmul.f32 %v365_v13, %v54_v15 }
   0xe   :  { %46 = vadd.xlane.f32.xlu0 %v45_v11  ;;  %v56_v17 = vadd.f32 %v365_v13, %v55_v16 }
  0x10   :  { %v58_v18 = vsel %vm57_vm2, %v365_v13, %v56_v17 }
  0x79   :  { %v44_v19 = vpop.xlane.xlu0 %43  ;;  %v51_v23 = vpop.xlane.xlu1 %50 }
  0x7a   :  { %v59_v20 = vmul.f32 %v58_v18, %v44_v19  ;;  %v61_v27 = vmul.f32 %v58_v18, %v51_v23  ;;  %v349_v19 = vld [vmem:[%s531_s6 + $0x30] sm:$0xff] }
  0x7b   :  { %v345_v23 = vld [vmem:[%s531_s6 + $0x10] sm:$0xff] }
  0x7c   :  { %v62_v21 = vsub.f32 %v430_v2, %v59_v20  ;;  %v458_v29 = vsub.f32 %v444_v7, %v61_v27  ;;  %v348_v20 = vld [vmem:[%s531_s6 + $0x28] sm:$0xff] }
  0x7e   :  { %v65_v22 = vmul.f32 %v62_v21, %v62_v21  ;;  %v67_v32 = vmul.f32 %v458_v29, %v458_v29 }
  0x80   :  { %v68_v24 = vsel %vm41_vm0, %v65_v22, 0.0  ;;  %v74_v33 = vsel %vm48_vm1, %v67_v32, 0.0  ;;  %v346_v22 = vld [vmem:[%s531_s6 + $0x18] sm:$0xff] }
  0x81   :  { %69 = vadd.xlane.f32.xlu1 %v68_v24  ;;  %v47_v25 = vpop.xlane.xlu0 %46  ;;  %v344_v24 = vld [vmem:[%s531_s6 + $0x8] sm:$0xff] }
  0x82   :  { %v60_v26 = vmul.f32 %v58_v18, %v47_v25  ;;  %v343_v25 = vld [vmem:[%s531_s6] sm:$0xff] }
  0x84   :  { %v63_v28 = vsub.f32 %v450_v10, %v60_v26  ;;  %v362_v26 = vld [vmem:[%s528_s5] ss:$0 sm:$0xff] }
  0x86   :  { %v66_v30 = vmul.f32 %v63_v28, %v63_v28 }
  0x88   :  { %v71_v31 = vsel %vm41_vm0, %v66_v30, 0.0 }
  0x89   :  { %72 = vadd.xlane.f32.xlu2 %v71_v31 }
  0x91   :  { %75 = vadd.xlane.f32.xlu2 %v74_v33 }
  0xf4   :  { %v70_v35 = vpop.xlane.xlu1 %69 }
  0xf5   :  { %v77_v36 = vmul.f32 %v70_v35, %v58_v18 }
  0xf7   :  { %v80_v38 = vadd.f32 1e-06, %v77_v36 }
  0xf9   :  { %366 = vrsqrt.f32 %v80_v38  ;;  %vm89_vm4 = vweird.f32 %v80_v38 }
  0xfc   :  { %v73_v39 = vpop.xlane.xlu2 %72 }
  0xfd   :  { %v78_v40 = vmul.f32 %v73_v39, %v58_v18 }
  0xff   :  { %v367_v41 = vpop.eup %366  ;;  %v81_v42 = vadd.f32 1e-06, %v78_v40 }
 0x100   :  { %v84_v43 = vmul.f32 %v367_v41, %v80_v38  ;;  %vm90_vm3 = vweird.f32 %v367_v41 }
 0x101   :  { %368 = vrsqrt.f32 %v81_v42  ;;  %vm91_vm5 = vmor %vm89_vm4, %vm90_vm3  ;;  %vm99_vm7 = vweird.f32 %v81_v42 }
 0x102   :  { %v85_v44 = vmul.f32 %v367_v41, %v84_v43 }
 0x104   :  { %v86_v45 = vmul.f32 0.5, %v85_v44  ;;  %v76_v46 = vpop.xlane.xlu2 %75 }
 0x105   :  { %v79_v47 = vmul.f32 %v76_v46, %v58_v18  ;;  %v350_v18 = vld [vmem:[%s531_s6 + $0x38] sm:$0xff] }
 0x106   :  { %v87_v48 = vsub.f32 1.5, %v86_v45  ;;  %271 = vmatpush.bf16.msra.mxu1 %v350_v18  ;;  %351 = vmatpush.bf16.msra.mxu2 %v350_v18 }
 0x107   :  { %v369_v49 = vpop.eup %368  ;;  %v82_v50 = vadd.f32 1e-06, %v79_v47 }
 0x108   :  { %v88_v51 = vmul.f32 %v367_v41, %v87_v48  ;;  %v94_v52 = vmul.f32 %v369_v49, %v81_v42  ;;  %vm100_vm6 = vweird.f32 %v369_v49 }
 0x109   :  { %370 = vrsqrt.f32 %v82_v50  ;;  %vm101_vm8 = vmor %vm99_vm7, %vm100_vm6  ;;  %vm109_vm9 = vweird.f32 %v82_v50 }
 0x10a   :  { %v95_v53 = vmul.f32 %v369_v49, %v94_v52  ;;  %v92_v54 = vsel %vm91_vm5, %v367_v41, %v88_v51  ;;  %272 = vmatpush.bf16.msra.mxu1 %v349_v19  ;;  %352 = vmatpush.bf16.msra.mxu2 %v349_v19 }
 0x10b   :  { %v113_v58 = vmul.f32 %v92_v54, %v62_v21  ;;  %v347_v21 = vld [vmem:[%s531_s6 + $0x20] sm:$0xff] }
 0x10c   :  { %v96_v55 = vmul.f32 0.5, %v95_v53 }
 0x10d   :  { %v119_v1 = vmul.f32 %v360_v59, %v113_v58 }
 0x10e   :  { %v97_v56 = vsub.f32 1.5, %v96_v55  ;;  %273 = vmatpush.bf16.msra.mxu1 %v348_v20  ;;  %353 = vmatpush.bf16.msra.mxu2 %v348_v20 }
 0x10f   :  { %v371_v57 = vpop.eup %370  ;;  %v125_v8 = vadd.f32 %v361_v3, %v119_v1 }
 0x110   :  { %v98_v60 = vmul.f32 %v369_v49, %v97_v56  ;;  %v104_v61 = vmul.f32 %v371_v57, %v82_v50  ;;  %vm110_vm10 = vweird.f32 %v371_v57 }
 0x111   :  { %vm111_vm11 = vmor %vm109_vm9, %vm110_vm10 }
 0x112   :  { %v102_v62 = vsel %vm101_vm8, %v369_v49, %v98_v60  ;;  %v105_v63 = vmul.f32 %v371_v57, %v104_v61  ;;  %274 = vmatpush.bf16.msra.mxu1 %v347_v21  ;;  %354 = vmatpush.bf16.msra.mxu2 %v347_v21 }
 0x113   :  { %v114_v0 = vmul.f32 %v102_v62, %v63_v28 }
 0x114   :  { %v106_v4 = vmul.f32 0.5, %v105_v63  ;;  %v363_v63 = vld [vmem:[%s530_s7] ss:$0 sm:$0xff] }
 0x115   :  { %v120_v5 = vmul.f32 %v360_v59, %v114_v0 }
 0x116   :  { %v107_v6 = vsub.f32 1.5, %v106_v4  ;;  %275 = vmatpush.bf16.msra.mxu1 %v346_v22  ;;  %355 = vmatpush.bf16.msra.mxu2 %v346_v22 }
 0x117   :  { %v126_v9 = vadd.f32 %v361_v3, %v120_v5 }
 0x118   :  { %v108_v11 = vmul.f32 %v371_v57, %v107_v6 }
 0x119   :  { %v128_v12 = vpack.c.bf16 %v126_v9, %v125_v8 }
 0x11a   :  { %v112_v13 = vsel %vm111_vm11, %v371_v57, %v108_v11  ;;  %276 = vmatpush.bf16.msra.mxu1 %v345_v23  ;;  %356 = vmatpush.bf16.msra.mxu2 %v345_v23 }
 0x11b   :  { %307 = vmatmul.msk.bf16.vlgmr.msra.gmra.mxu0 %vm41_vm0, %v128_v12  ;;  %v115_v14 = vmul.f32 %v112_v13, %v458_v29 }
 0x11d   :  { %v121_v15 = vmul.f32 %v360_v59, %v115_v14 }
 0x11e   :  { %277 = vmatpush.bf16.msra.mxu1 %v344_v24  ;;  %357 = vmatpush.bf16.msra.mxu2 %v344_v24 }
 0x11f   :  { %v127_v16 = vadd.f32 %v361_v3, %v121_v15 }
 0x121   :  { %v129_v17 = vpack.c.bf16 %v127_v16, %v127_v16 }
 0x122   :  { %278 = vmatpush.bf16.msra.mxu1 %v343_v25  ;;  %358 = vmatpush.bf16.msra.mxu2 %v343_v25 }
 0x12b   :  { %308 = vmatmul.msk.bf16.gmra.mxu0 %vm41_vm0, %v129_v17 }
 0x198   :  { %v165_v27 = vpop.f32.mrf.mxu0 }
 0x199   :  { %v166_v28 = vadd.f32 %v362_v26, %v165_v27 }
 0x19b   :  { %v177_v29 = vmul.f32 0.044715, %v166_v28  ;;  %v174_v52 = vmul.f32 0.5, %v166_v28 }
 0x19d   :  { %v180_v30 = vmul.f32 %v177_v29, %v166_v28 }
 0x19f   :  { %v183_v31 = vmul.f32 %v180_v30, %v166_v28 }
 0x1a0   :  { %v167_v32 = vpop.f32.mrf.mxu0 }
 0x1a1   :  { %v168_v33 = vadd.f32 %v362_v26, %v167_v32  ;;  %v186_v34 = vadd.f32 %v183_v31, %v166_v28 }
 0x1a3   :  { %v178_v35 = vmul.f32 0.044715, %v168_v33  ;;  %v189_v37 = vmul.f32 0.7978846, %v186_v34  ;;  %v175_v53 = vmul.f32 0.5, %v168_v33 }
 0x1a5   :  { %v181_v36 = vmul.f32 %v178_v35, %v168_v33  ;;  %372 = vtanh.f32 %v189_v37 }
 0x1a7   :  { %v184_v38 = vmul.f32 %v181_v36, %v168_v33 }
 0x1a8   :  { %v170_v39 = vpop.f32.mrf.mxu0 }
 0x1a9   :  { %v171_v40 = vadd.f32 %v362_v26, %v170_v39  ;;  %v187_v41 = vadd.f32 %v184_v38, %v168_v33 }
 0x1ab   :  { %v190_v42 = vmul.f32 0.7978846, %v187_v41  ;;  %v179_v43 = vmul.f32 0.044715, %v171_v40  ;;  %v373_v45 = vpop.eup %372  ;;  %v176_v59 = vmul.f32 0.5, %v171_v40 }
 0x1ac   :  { %v195_v49 = vadd.f32 1.0, %v373_v45 }
 0x1ad   :  { %374 = vtanh.f32 %v190_v42  ;;  %v182_v44 = vmul.f32 %v179_v43, %v171_v40 }
 0x1ae   :  { %v198_v55 = vmul.f32 %v195_v49, %v174_v52 }
 0x1af   :  { %v185_v46 = vmul.f32 %v182_v44, %v171_v40 }
 0x1b0   :  { %v172_v47 = vpop.f32.mrf.mxu0 }
 0x1b1   :  { %v188_v48 = vadd.f32 %v185_v46, %v171_v40 }
 0x1b3   :  { %v375_v50 = vpop.eup %374  ;;  %v191_v51 = vmul.f32 0.7978846, %v188_v48 }
 0x1b4   :  { %v196_v54 = vadd.f32 1.0, %v375_v50 }
 0x1b5   :  { %376 = vtanh.f32 %v191_v51 }
 0x1b6   :  { %v199_v56 = vmul.f32 %v196_v54, %v175_v53 }
 0x1b8   :  { %v201_v57 = vpack.c.bf16 %v199_v56, %v198_v55 }
 0x1ba   :  { %279 = vmatmul.bf16.vlgmr.msra.gmra.mxu1 %v201_v57 }
 0x1bb   :  { %v377_v58 = vpop.eup %376 }
 0x1bc   :  { %v197_v60 = vadd.f32 1.0, %v377_v58 }
 0x1be   :  { %v200_v61 = vmul.f32 %v197_v60, %v176_v59 }
 0x1c0   :  { %v202_v62 = vpack.c.bf16 %v200_v61, %v200_v61 }
 0x1c2   :  { %284 = vmatmul.bf16.vlgmr.msra.gmra.mxu2 %v202_v62 }
 0x237   :  { %v280_v0 = vpop.f32.mrf.mxu1 }
 0x238   :  { %v281_v1 = vadd.f32 %v363_v63, %v280_v0 }
 0x23a   :  { %v289_v3 = vadd.f32 %v281_v1, %v430_v2 }
 0x23c   :  { %292 = vst.msk [vmem:[%s532_s8] sm:$0xff] %vm41_vm0, %v289_v3 }
 0x23f   :  { %v282_v4 = vpop.f32.mrf.mxu1 }
 0x240   :  { %v283_v5 = vadd.f32 %v363_v63, %v282_v4 }
 0x242   :  { %v290_v6 = vadd.f32 %v283_v5, %v450_v10 }
 0x244   :  { %293 = vst.msk [vmem:[%s532_s8 + $0x8] sm:$0xff] %vm41_vm0, %v290_v6 }
 0x245   :  { %v285_v8 = vpop.f32.mrf.mxu2 }
 0x246   :  { %v286_v9 = vadd.f32 %v363_v63, %v285_v8 }
 0x248   :  { %v291_v11 = vadd.f32 %v286_v9, %v444_v7 }
 0x24a   :  { %294 = vst.msk [vmem:[%s532_s8 + $0x10] sm:$0x3] %vm48_vm1, %v291_v11 }
 0x24d   :  { %v287_v2 = vpop.f32.mrf.mxu2 }

// kernel: timesformer_forward.31
= control target key start
LH: loop header
LB: loop body
LE: loop exit
PB: predicated region body
PF: predicated region fallthrough
CT: control target
= control target key end

     0   :  { %vm18_vm0 = vcmask 254976   ;;  %s144_s0 = inlined_call_operand.vmem [shape: f32[2,32], index: 0, kind: input, shape index: {}]   ;;  %s145_s1 = inlined_call_operand.vmem [shape: f32[1,32], index: 1, kind: input, shape index: {}]   ;;  %s146_s2 = inlined_call_operand.vmem [shape: f32[1,32], index: 2, kind: input, shape index: {}]   ;;  %s147_s3 = inlined_call_operand.hbm [shape: f32[2,32], index: 3, kind: output, shape index: {}]  }
   0x1   :  { %v15_v0 = vld [vmem:[%s144_s0] sm:$0x3] }
   0x2   :  { %8 = vsyncpa [#allocation3], 0  ;;  %v19_v1 = vsel %vm18_vm0, %v15_v0, 0.0  ;;  %v107_v2 = vmov 32.0   ;;  %v75_v23 = vld [vmem:[%s145_s1] ss:$0 sm:$0xff] }
   0x3   :  { %20 = vadd.xlane.f32.xlu0 %v19_v1  ;;  %77 = vrcp.f32 %v107_v2  ;;  %v76_v26 = vld [vmem:[%s146_s2] ss:$0 sm:$0xff]  ;;  %s108_s17 = smov [#allocation2]   ;;  %s64_s21 = sshll.u32 %s147_s3, 4  ;;  %s65_s21 = int_to_ptr.hbm [resolvable:$true] %s64_s21 }
   0x4   :  { %s62_s18 = sshll.u32 %s108_s17, 4  ;;  %s63_s18 = int_to_ptr.vmem [resolvable:$true] %s62_s18 }
   0x9   :  { %v78_v3 = vpop.eup %77 }
   0xa   :  { %v23_v4 = vmul.f32 32.0, %v78_v3  ;;  %vm27_vm1 = vweird.f32 %v78_v3 }
   0xc   :  { %v24_v5 = vsub.f32 1.0, %v23_v4 }
   0xe   :  { %v25_v6 = vmul.f32 %v78_v3, %v24_v5 }
  0x10   :  { %v26_v7 = vadd.f32 %v78_v3, %v25_v6 }
  0x12   :  { %v28_v8 = vsel %vm27_vm1, %v78_v3, %v26_v7 }
  0x76   :  { %v21_v9 = vpop.xlane.xlu0 %20 }
  0x77   :  { %v29_v10 = vmul.f32 %v28_v8, %v21_v9 }
  0x79   :  { %v30_v11 = vsub.f32 %v15_v0, %v29_v10 }
  0x7b   :  { %v31_v12 = vmul.f32 %v30_v11, %v30_v11 }
  0x7d   :  { %v32_v13 = vsel %vm18_vm0, %v31_v12, 0.0 }
  0x7e   :  { %33 = vadd.xlane.f32.xlu0 %v32_v13 }
  0xf1   :  { %v34_v14 = vpop.xlane.xlu0 %33 }
  0xf2   :  { %v35_v15 = vmul.f32 %v34_v14, %v28_v8 }
  0xf4   :  { %v36_v16 = vadd.f32 1e-06, %v35_v15 }
  0xf6   :  { %79 = vrsqrt.f32 %v36_v16  ;;  %vm43_vm3 = vweird.f32 %v36_v16 }
  0xfc   :  { %v80_v17 = vpop.eup %79 }
  0xfd   :  { %v38_v18 = vmul.f32 %v80_v17, %v36_v16  ;;  %vm44_vm2 = vweird.f32 %v80_v17 }
  0xfe   :  { %vm45_vm4 = vmor %vm43_vm3, %vm44_vm2 }
  0xff   :  { %v39_v19 = vmul.f32 %v80_v17, %v38_v18 }
 0x101   :  { %v40_v20 = vmul.f32 0.5, %v39_v19 }
 0x103   :  { %v41_v21 = vsub.f32 1.5, %v40_v20 }
 0x105   :  { %v42_v22 = vmul.f32 %v80_v17, %v41_v21 }
 0x107   :  { %v46_v24 = vsel %vm45_vm4, %v80_v17, %v42_v22 }
 0x108   :  { %v47_v25 = vmul.f32 %v46_v24, %v30_v11 }
 0x10a   :  { %v51_v27 = vmul.f32 %v75_v23, %v47_v25 }
 0x10c   :  { %v55_v28 = vadd.f32 %v76_v26, %v51_v27 }
 0x10e   :  { %56 = vst.msk [vmem:[#allocation2] sm:$0x3] %vm18_vm0, %v55_v28 }
 0x10f   :  { %67 = dma.vmem_to_hbm [thread:$0]  %s63_s18, 32, %s65_s21, [#allocation3]  }
 0x110   :  { %105 = dma.done.wait [#allocation3], 32  }
 0x111   :  { %106 = vsyncadd [#allocation3], 4294967264 }
 0x112   :  { %72 = vsyncpa [#allocation3], 1 }

</bundles_post_ra>
